<compile_context>
chip_gen: v6e
topology: v6e:2x2x1
jax: 0.10.0
libtpu: 0.0.40
codegen_flags: <defaults>
</compile_context>

<pallas_src>
import functools

import jax
import jax.numpy as jnp
from jax import lax
from jax.experimental import pallas as pl
from jax.experimental.pallas import tpu as pltpu

IN_FEATURES = 28 * 28          # 784
HIDDEN = (512, 256, 128, 64)
NUM_CLASSES = 10

IN_PAD = 896                   # 7 * 128 (K axis zero-padded -> exact result)
OUT_PAD = 128                  # 10 -> 128 (lane-dense output stores)


def mlp_kernel(x_ref,
               w1_ref, b1_ref,
               w2_ref, b2_ref,
               w3_ref, b3_ref,
               w4_ref, b4_ref,
               w5_ref, b5_ref,
               out_ref):
    # Dropout(p=0.2) is eval-mode identity.
    # TODO(synk): training-mode dropout would use pltpu.prng_seed +
    # pltpu.prng_random_bits to draw a mask and scale by 1/(1-p).
    # TODO(synk): on v7x, w1 (72% of FLOPs) could additionally be fp8 with f32
    # accumulation for ~2x on the dominant matmul; kept bf16 for portability.

    def layer(h_bf16, w_ref, b_ref):
        # bf16 operands, f32 accumulate; bias add + ReLU in f32.
        acc = jnp.dot(h_bf16, w_ref[...], preferred_element_type=jnp.float32)
        return jnp.maximum(acc + b_ref[...], 0.0).astype(jnp.bfloat16)

    h = x_ref[...]                                   # bf16 (tb, 896)
    h = layer(h, w1_ref, b1_ref)
    h = layer(h, w2_ref, b2_ref)
    h = layer(h, w3_ref, b3_ref)
    h = layer(h, w4_ref, b4_ref)

    logits = (jnp.dot(h, w5_ref[...], preferred_element_type=jnp.float32)
              + b5_ref[...])                         # f32 (tb, 128)

    # log_softmax over the 10 real classes; lanes [10, 128) are padding.
    lane = lax.broadcasted_iota(jnp.int32, logits.shape, 1)
    valid = lane < NUM_CLASSES
    masked = jnp.where(valid, logits, jnp.float32(-1e30))
    m = jnp.max(masked, axis=-1, keepdims=True)
    shifted = masked - m
    lse = jnp.log(jnp.sum(jnp.where(valid, jnp.exp(shifted), 0.0),
                          axis=-1, keepdims=True))
    out_ref[...] = jnp.where(valid, shifted - lse, 0.0)


def prepare_params(params):
    """One-time pad + bf16 cast of weights (call once, reuse every forward)."""
    w1 = jnp.zeros((IN_PAD, HIDDEN[0]), jnp.bfloat16
                   ).at[:IN_FEATURES, :].set(params["w1"].astype(jnp.bfloat16))
    w5 = jnp.zeros((HIDDEN[3], OUT_PAD), jnp.bfloat16
                   ).at[:, :NUM_CLASSES].set(params["w5"].astype(jnp.bfloat16))
    b5 = jnp.zeros((1, OUT_PAD), jnp.float32
                   ).at[:, :NUM_CLASSES].set(params["b5"])
    return {
        "w1": w1, "b1": params["b1"],
        "w2": params["w2"].astype(jnp.bfloat16), "b2": params["b2"],
        "w3": params["w3"].astype(jnp.bfloat16), "b3": params["b3"],
        "w4": params["w4"].astype(jnp.bfloat16), "b4": params["b4"],
        "w5": w5, "b5": b5,
    }


def _pick_tb(n):
    # Biggest tile that still gives >=2 grid steps (so v7x can shard the batch
    # across its 2 TensorCores); tiny batches get one 128-row tile.
    for tb in (1024, 512, 256, 128):
        if pl.cdiv(n, tb) >= 2:
            return tb
    return 128


@functools.partial(jax.jit, static_argnames=("tb",))
def classifier_forward(x, prepped, *, tb=None):
    """x: (N, 784) float32. prepped: output of prepare_params()."""
    n, f = x.shape
    assert f == IN_FEATURES
    if tb is None:
        tb = _pick_tb(n)

    # Fused pad (784->896 features, batch->n_pad) + bf16 cast in one op.
    n_pad = pl.cdiv(n, tb) * tb
    x_p = jnp.zeros((n_pad, IN_PAD), jnp.bfloat16
                    ).at[:n, :IN_FEATURES].set(x.astype(jnp.bfloat16))

    args = (x_p,
            prepped["w1"], prepped["b1"],
            prepped["w2"], prepped["b2"],
            prepped["w3"], prepped["b3"],
            prepped["w4"], prepped["b4"],
            prepped["w5"], prepped["b5"])

    grid = (n_pad // tb,)

    # x/out stream per batch tile; weights & biases use constant index_maps so
    # they are DMA'd once and stay VMEM-resident (~1.2 MiB bf16 + f32 biases).
    in_specs = [pl.BlockSpec((tb, IN_PAD), lambda i: (i, 0))] + [
        pl.BlockSpec(a.shape, lambda i: (0, 0)) for a in args[1:]
    ]
    out_specs = pl.BlockSpec((tb, OUT_PAD), lambda i: (i, 0))

    flops = 2 * n_pad * (IN_PAD * 512 + 512 * 256 + 256 * 128
                         + 128 * 64 + 64 * OUT_PAD)
    bytes_accessed = (sum(a.size * a.dtype.itemsize for a in args)
                      + n_pad * OUT_PAD * 4)

    out = pl.pallas_call(
        mlp_kernel,
        out_shape=jax.ShapeDtypeStruct((n_pad, OUT_PAD), jnp.float32),
        grid=grid,
        in_specs=in_specs,
        out_specs=out_specs,
        compiler_params=pltpu.CompilerParams(
            dimension_semantics=("parallel",),   # batch tiles across v7x's 2 TCs
            vmem_limit_bytes=32 * 1024 * 1024),  # footprint <8 MiB; headroom on v7x
        cost_estimate=pl.CostEstimate(
            flops=flops,
            transcendentals=n_pad * OUT_PAD,
            bytes_accessed=bytes_accessed),
    )(*args)
    return out[:n, :NUM_CLASSES]


def init_params(key):
    dims = [(IN_FEATURES, 512), (512, 256), (256, 128), (128, 64),
            (64, NUM_CLASSES)]
    params = {}
    for idx, (fan_in, fan_out) in enumerate(dims, start=1):
        key, kw, kb = jax.random.split(key, 3)
        bound = 1.0 / jnp.sqrt(fan_in)  # PyTorch Linear default init range
        params[f"w{idx}"] = jax.random.uniform(
            kw, (fan_in, fan_out), jnp.float32, minval=-bound, maxval=bound)
        params[f"b{idx}"] = jax.random.uniform(
            kb, (1, fan_out), jnp.float32, minval=-bound, maxval=bound)
    return params


def reference_forward(x, params):
    h = x
    for i in range(1, 5):
        h = jnp.maximum(h @ params[f"w{i}"] + params[f"b{i}"], 0.0)
    logits = h @ params["w5"] + params["b5"]
    return jax.nn.log_softmax(logits, axis=1)


if __name__ == "__main__":
    key = jax.random.PRNGKey(0)
    kx, kp = jax.random.split(key)
    batch = 8
    x = jax.random.normal(kx, (batch, IN_FEATURES), jnp.float32)
    params = init_params(kp)
    prepped = prepare_params(params)

    out = jax.block_until_ready(classifier_forward(x, prepped))
    ref = reference_forward(x, params)

    assert out.shape == (batch, NUM_CLASSES)
    assert bool(jnp.all(jnp.isfinite(out)))
    # bf16 matmul operands (f32 accumulate) vs f32 reference: loosened tolerance.
    assert jnp.allclose(out, ref, atol=2e-2, rtol=2e-2)
    print("KERNEL_OK")
</pallas_src>

<mosaic_0001>
module attributes {stable_mosaic.version = 11 : i64} {
  func.func @mlp_kernel(%arg0: i32, %arg1: memref<128x896xbf16, #tpu.memory_space<vmem>>, %arg2: memref<896x512xbf16, #tpu.memory_space<vmem>>, %arg3: memref<1x512xf32, #tpu.memory_space<vmem>>, %arg4: memref<512x256xbf16, #tpu.memory_space<vmem>>, %arg5: memref<1x256xf32, #tpu.memory_space<vmem>>, %arg6: memref<256x128xbf16, #tpu.memory_space<vmem>>, %arg7: memref<1x128xf32, #tpu.memory_space<vmem>>, %arg8: memref<128x64xbf16, #tpu.memory_space<vmem>>, %arg9: memref<1x64xf32, #tpu.memory_space<vmem>>, %arg10: memref<64x128xbf16, #tpu.memory_space<vmem>>, %arg11: memref<1x128xf32, #tpu.memory_space<vmem>>, %arg12: memref<128x128xf32, #tpu.memory_space<vmem>>) attributes {dimension_semantics = [#tpu.dimension_semantics<parallel>], iteration_bounds = array<i64: 1>, scalar_prefetch = 0 : i64, scratch_operands = 0 : i64, tpu.core_type = #tpu.core_type<tc>, window_params = [{transform_indices = @transform_0, window_bounds = array<i64: 128, 896>}, {pipeline_mode = #tpu.pipeline_mode<synchronous>, transform_indices = @transform_1, window_bounds = array<i64: 896, 512>}, {pipeline_mode = #tpu.pipeline_mode<synchronous>, transform_indices = @transform_2, window_bounds = array<i64: 1, 512>}, {pipeline_mode = #tpu.pipeline_mode<synchronous>, transform_indices = @transform_3, window_bounds = array<i64: 512, 256>}, {pipeline_mode = #tpu.pipeline_mode<synchronous>, transform_indices = @transform_4, window_bounds = array<i64: 1, 256>}, {pipeline_mode = #tpu.pipeline_mode<synchronous>, transform_indices = @transform_5, window_bounds = array<i64: 256, 128>}, {pipeline_mode = #tpu.pipeline_mode<synchronous>, transform_indices = @transform_6, window_bounds = array<i64: 1, 128>}, {pipeline_mode = #tpu.pipeline_mode<synchronous>, transform_indices = @transform_7, window_bounds = array<i64: 128, 64>}, {pipeline_mode = #tpu.pipeline_mode<synchronous>, transform_indices = @transform_8, window_bounds = array<i64: 1, 64>}, {pipeline_mode = #tpu.pipeline_mode<synchronous>, transform_indices = @transform_9, window_bounds = array<i64: 64, 128>}, {pipeline_mode = #tpu.pipeline_mode<synchronous>, transform_indices = @transform_10, window_bounds = array<i64: 1, 128>}, {transform_indices = @transform_11, window_bounds = array<i64: 128, 128>}]} {
    %c0 = arith.constant 0 : index
    %c0_0 = arith.constant 0 : index
    %0 = vector.load %arg1[%c0, %c0_0] : memref<128x896xbf16, #tpu.memory_space<vmem>>, vector<128x896xbf16>
    %c0_1 = arith.constant 0 : index
    %c0_2 = arith.constant 0 : index
    %1 = vector.load %arg2[%c0_1, %c0_2] : memref<896x512xbf16, #tpu.memory_space<vmem>>, vector<896x512xbf16>
    %cst = arith.constant dense<0.000000e+00> : vector<128x512xf32>
    %2 = tpu.matmul %0, %1, %cst {dimension_numbers = #tpu.dot_dimension_numbers<[1], [0], [0], [1], [0, 0, 1, 1], [], []>} : vector<128x896xbf16>, vector<896x512xbf16>, vector<128x512xf32> -> vector<128x512xf32>
    %c0_3 = arith.constant 0 : index
    %c0_4 = arith.constant 0 : index
    %3 = vector.load %arg3[%c0_3, %c0_4] : memref<1x512xf32, #tpu.memory_space<vmem>>, vector<1x512xf32>
    %4 = vector.broadcast %3 : vector<1x512xf32> to vector<128x512xf32>
    %5 = arith.addf %2, %4 : vector<128x512xf32>
    %cst_5 = arith.constant 0.000000e+00 : f32
    %6 = vector.broadcast %cst_5 : f32 to vector<128x512xf32>
    %7 = arith.maximumf %5, %6 : vector<128x512xf32>
    %8 = arith.truncf %7 : vector<128x512xf32> to vector<128x512xbf16>
    %c0_6 = arith.constant 0 : index
    %c0_7 = arith.constant 0 : index
    %9 = vector.load %arg4[%c0_6, %c0_7] : memref<512x256xbf16, #tpu.memory_space<vmem>>, vector<512x256xbf16>
    %cst_8 = arith.constant dense<0.000000e+00> : vector<128x256xf32>
    %10 = tpu.matmul %8, %9, %cst_8 {dimension_numbers = #tpu.dot_dimension_numbers<[1], [0], [0], [1], [0, 0, 1, 1], [], []>} : vector<128x512xbf16>, vector<512x256xbf16>, vector<128x256xf32> -> vector<128x256xf32>
    %c0_9 = arith.constant 0 : index
    %c0_10 = arith.constant 0 : index
    %11 = vector.load %arg5[%c0_9, %c0_10] : memref<1x256xf32, #tpu.memory_space<vmem>>, vector<1x256xf32>
    %12 = vector.broadcast %11 : vector<1x256xf32> to vector<128x256xf32>
    %13 = arith.addf %10, %12 : vector<128x256xf32>
    %cst_11 = arith.constant 0.000000e+00 : f32
    %14 = vector.broadcast %cst_11 : f32 to vector<128x256xf32>
    %15 = arith.maximumf %13, %14 : vector<128x256xf32>
    %16 = arith.truncf %15 : vector<128x256xf32> to vector<128x256xbf16>
    %c0_12 = arith.constant 0 : index
    %c0_13 = arith.constant 0 : index
    %17 = vector.load %arg6[%c0_12, %c0_13] : memref<256x128xbf16, #tpu.memory_space<vmem>>, vector<256x128xbf16>
    %cst_14 = arith.constant dense<0.000000e+00> : vector<128x128xf32>
    %18 = tpu.matmul %16, %17, %cst_14 {dimension_numbers = #tpu.dot_dimension_numbers<[1], [0], [0], [1], [0, 0, 1, 1], [], []>} : vector<128x256xbf16>, vector<256x128xbf16>, vector<128x128xf32> -> vector<128x128xf32>
    %c0_15 = arith.constant 0 : index
    %c0_16 = arith.constant 0 : index
    %19 = vector.load %arg7[%c0_15, %c0_16] : memref<1x128xf32, #tpu.memory_space<vmem>>, vector<1x128xf32>
    %20 = vector.broadcast %19 : vector<1x128xf32> to vector<128x128xf32>
    %21 = arith.addf %18, %20 : vector<128x128xf32>
    %cst_17 = arith.constant 0.000000e+00 : f32
    %22 = vector.broadcast %cst_17 : f32 to vector<128x128xf32>
    %23 = arith.maximumf %21, %22 : vector<128x128xf32>
    %24 = arith.truncf %23 : vector<128x128xf32> to vector<128x128xbf16>
    %c0_18 = arith.constant 0 : index
    %c0_19 = arith.constant 0 : index
    %25 = vector.load %arg8[%c0_18, %c0_19] : memref<128x64xbf16, #tpu.memory_space<vmem>>, vector<128x64xbf16>
    %cst_20 = arith.constant dense<0.000000e+00> : vector<128x64xf32>
    %26 = tpu.matmul %24, %25, %cst_20 {dimension_numbers = #tpu.dot_dimension_numbers<[1], [0], [0], [1], [0, 0, 1, 1], [], []>} : vector<128x128xbf16>, vector<128x64xbf16>, vector<128x64xf32> -> vector<128x64xf32>
    %c0_21 = arith.constant 0 : index
    %c0_22 = arith.constant 0 : index
    %27 = vector.load %arg9[%c0_21, %c0_22] : memref<1x64xf32, #tpu.memory_space<vmem>>, vector<1x64xf32>
    %28 = vector.broadcast %27 : vector<1x64xf32> to vector<128x64xf32>
    %29 = arith.addf %26, %28 : vector<128x64xf32>
    %cst_23 = arith.constant 0.000000e+00 : f32
    %30 = vector.broadcast %cst_23 : f32 to vector<128x64xf32>
    %31 = arith.maximumf %29, %30 : vector<128x64xf32>
    %32 = arith.truncf %31 : vector<128x64xf32> to vector<128x64xbf16>
    %c0_24 = arith.constant 0 : index
    %c0_25 = arith.constant 0 : index
    %33 = vector.load %arg10[%c0_24, %c0_25] : memref<64x128xbf16, #tpu.memory_space<vmem>>, vector<64x128xbf16>
    %cst_26 = arith.constant dense<0.000000e+00> : vector<128x128xf32>
    %34 = tpu.matmul %32, %33, %cst_26 {dimension_numbers = #tpu.dot_dimension_numbers<[1], [0], [0], [1], [0, 0, 1, 1], [], []>} : vector<128x64xbf16>, vector<64x128xbf16>, vector<128x128xf32> -> vector<128x128xf32>
    %c0_27 = arith.constant 0 : index
    %c0_28 = arith.constant 0 : index
    %35 = vector.load %arg11[%c0_27, %c0_28] : memref<1x128xf32, #tpu.memory_space<vmem>>, vector<1x128xf32>
    %36 = vector.broadcast %35 : vector<1x128xf32> to vector<128x128xf32>
    %37 = arith.addf %34, %36 : vector<128x128xf32>
    %38 = tpu.iota {dimensions = array<i32: 1>} : vector<128x128xi32>
    %c10_i32 = arith.constant 10 : i32
    %39 = vector.broadcast %c10_i32 : i32 to vector<128x128xi32>
    %40 = arith.cmpi slt, %38, %39 : vector<128x128xi32>
    %cst_29 = arith.constant -1.000000e+30 : f32
    %41 = vector.broadcast %cst_29 : f32 to vector<128x128xf32>
    %42 = arith.select %40, %37, %41 : vector<128x128xi1>, vector<128x128xf32>
    %cst_30 = arith.constant dense<0xFF800000> : vector<128xf32>
    %43 = vector.multi_reduction <maximumf>, %42, %cst_30 [1] : vector<128x128xf32> to vector<128xf32>
    %44 = vector.shape_cast %43 : vector<128xf32> to vector<128x1xf32>
    %45 = vector.broadcast %44 : vector<128x1xf32> to vector<128x128xf32>
    %46 = arith.subf %42, %45 : vector<128x128xf32>
    %47 = math.exp %46 : vector<128x128xf32>
    %cst_31 = arith.constant 0.000000e+00 : f32
    %48 = vector.broadcast %cst_31 : f32 to vector<128x128xf32>
    %49 = arith.select %40, %47, %48 : vector<128x128xi1>, vector<128x128xf32>
    %cst_32 = arith.constant dense<0.000000e+00> : vector<128xf32>
    %50 = vector.multi_reduction <add>, %49, %cst_32 [1] : vector<128x128xf32> to vector<128xf32>
    %51 = vector.shape_cast %50 : vector<128xf32> to vector<128x1xf32>
    %52 = math.log %51 : vector<128x1xf32>
    %53 = vector.broadcast %52 : vector<128x1xf32> to vector<128x128xf32>
    %54 = arith.subf %46, %53 : vector<128x128xf32>
    %cst_33 = arith.constant 0.000000e+00 : f32
    %55 = vector.broadcast %cst_33 : f32 to vector<128x128xf32>
    %56 = arith.select %40, %54, %55 : vector<128x128xi1>, vector<128x128xf32>
    %c0_34 = arith.constant 0 : index
    %c0_35 = arith.constant 0 : index
    %57 = vector.load %arg12[%c0_34, %c0_35] : memref<128x128xf32, #tpu.memory_space<vmem>>, vector<128x128xf32>
    tpu.vector_store %arg12[%c0_34, %c0_35], %56 {strides = array<i32>} : memref<128x128xf32, #tpu.memory_space<vmem>>, vector<128x128xf32>,
    return
  }
  func.func @transform_0(%arg0: i32) -> (i32, i32) {
    %c0_i32 = arith.constant 0 : i32
    %c0_i32_0 = arith.constant 0 : i32
    return %arg0, %c0_i32 : i32, i32
  }
  func.func @transform_1(%arg0: i32) -> (i32, i32) {
    %c0_i32 = arith.constant 0 : i32
    %c0_i32_0 = arith.constant 0 : i32
    %c0_i32_1 = arith.constant 0 : i32
    return %c0_i32, %c0_i32_0 : i32, i32
  }
  func.func @transform_2(%arg0: i32) -> (i32, i32) {
    %c0_i32 = arith.constant 0 : i32
    %c0_i32_0 = arith.constant 0 : i32
    %c0_i32_1 = arith.constant 0 : i32
    return %c0_i32, %c0_i32_0 : i32, i32
  }
  func.func @transform_3(%arg0: i32) -> (i32, i32) {
    %c0_i32 = arith.constant 0 : i32
    %c0_i32_0 = arith.constant 0 : i32
    %c0_i32_1 = arith.constant 0 : i32
    return %c0_i32, %c0_i32_0 : i32, i32
  }
  func.func @transform_4(%arg0: i32) -> (i32, i32) {
    %c0_i32 = arith.constant 0 : i32
    %c0_i32_0 = arith.constant 0 : i32
    %c0_i32_1 = arith.constant 0 : i32
    return %c0_i32, %c0_i32_0 : i32, i32
  }
  func.func @transform_5(%arg0: i32) -> (i32, i32) {
    %c0_i32 = arith.constant 0 : i32
    %c0_i32_0 = arith.constant 0 : i32
    %c0_i32_1 = arith.constant 0 : i32
    return %c0_i32, %c0_i32_0 : i32, i32
  }
  func.func @transform_6(%arg0: i32) -> (i32, i32) {
    %c0_i32 = arith.constant 0 : i32
    %c0_i32_0 = arith.constant 0 : i32
    %c0_i32_1 = arith.constant 0 : i32
    return %c0_i32, %c0_i32_0 : i32, i32
  }
  func.func @transform_7(%arg0: i32) -> (i32, i32) {
    %c0_i32 = arith.constant 0 : i32
    %c0_i32_0 = arith.constant 0 : i32
    %c0_i32_1 = arith.constant 0 : i32
    return %c0_i32, %c0_i32_0 : i32, i32
  }
  func.func @transform_8(%arg0: i32) -> (i32, i32) {
    %c0_i32 = arith.constant 0 : i32
    %c0_i32_0 = arith.constant 0 : i32
    %c0_i32_1 = arith.constant 0 : i32
    return %c0_i32, %c0_i32_0 : i32, i32
  }
  func.func @transform_9(%arg0: i32) -> (i32, i32) {
    %c0_i32 = arith.constant 0 : i32
    %c0_i32_0 = arith.constant 0 : i32
    %c0_i32_1 = arith.constant 0 : i32
    return %c0_i32, %c0_i32_0 : i32, i32
  }
  func.func @transform_10(%arg0: i32) -> (i32, i32) {
    %c0_i32 = arith.constant 0 : i32
    %c0_i32_0 = arith.constant 0 : i32
    %c0_i32_1 = arith.constant 0 : i32
    return %c0_i32, %c0_i32_0 : i32, i32
  }
  func.func @transform_11(%arg0: i32) -> (i32, i32) {
    %c0_i32 = arith.constant 0 : i32
    %c0_i32_0 = arith.constant 0 : i32
    return %arg0, %c0_i32 : i32, i32
  }
}

</mosaic_0001>

<bundles_post_ra>
// kernel: classifier_forward.1
= control target key start
LH: loop header
LB: loop body
LE: loop exit
PB: predicated region body
PF: predicated region fallthrough
CT: control target
= control target key end

     0   :  { %16 = vsyncpa [#allocation3], 0  ;;  %s7112_s0 = inlined_call_operand.vmem [shape: bf16[128,896], index: 0, kind: input, shape index: {}]   ;;  %s7113_s1 = inlined_call_operand.hbm [shape: bf16[896,512], index: 1, kind: input, shape index: {}]   ;;  %s7114_s2 = inlined_call_operand.hbm [shape: f32[1,512], index: 2, kind: input, shape index: {}]   ;;  %s7115_s3 = inlined_call_operand.vmem [shape: bf16[512,256], index: 3, kind: input, shape index: {}]   ;;  %s7116_s4 = inlined_call_operand.hbm [shape: f32[1,256], index: 4, kind: input, shape index: {}]   ;;  %s7117_s5 = inlined_call_operand.vmem [shape: bf16[256,128], index: 5, kind: input, shape index: {}]   ;;  %s7118_s6 = inlined_call_operand.vmem [shape: f32[1,128], index: 6, kind: input, shape index: {}]   ;;  %s7119_s7 = inlined_call_operand.vmem [shape: bf16[128,64], index: 7, kind: input, shape index: {}]   ;;  %s7120_s8 = inlined_call_operand.hbm [shape: f32[1,64], index: 8, kind: input, shape index: {}]   ;;  %s7121_s9 = inlined_call_operand.hbm [shape: bf16[64,128], index: 9, kind: input, shape index: {}]   ;;  %s7122_s10 = inlined_call_operand.hbm [shape: f32[1,128], index: 10, kind: input, shape index: {}]   ;;  %s7123_s11 = inlined_call_operand.vmem [shape: f32[128,128], index: 11, kind: output, shape index: {}]  }
   0x1   :  { %17 = vsyncpa [#allocation5], 0 }
   0x2   :  { %18 = vsyncpa [#allocation8], 0 }
   0x3   :  { %19 = vsyncpa [#allocation11], 0  ;;  %s5664_s17 = smov [#allocation4]   ;;  %s5665_s19 = smov [#allocation7]  }
   0x4   :  { %s40_s18 = sshll.u32 %s5664_s17, 4  ;;  %s68_s20 = sshll.u32 %s5665_s19, 4  ;;  %s41_s18 = int_to_ptr.vmem [resolvable:$true] %s40_s18  ;;  %s69_s20 = int_to_ptr.vmem [resolvable:$true] %s68_s20 }
   0x5   :  { %s5544_s21 = scalar_lea.vmem %s41_s18, 64  ;;  %p5549_p1 = scmp.lt.s32.totalorder %s41_s18, %s41_s18 }
   0x6   :  { %p5545_p0 = scmp.ne.s32.totalorder %s41_s18, %s5544_s21  ;;  %p5550_p2 = scmp.lt.s32.totalorder %s5544_s21, %s5544_s21 }
   0x8   :  { %p5551_p3 = por %p5550_p2, %p5549_p1 }
   0xa   :  { %p5552_p4 = pnand %p5551_p3, %p5545_p0 }
   0xc   :  { %5555 = shalt.err (!%p5552_p4)
}
   0xd   :  { %43 = dma.hbm_to_vmem [thread:$0]  %s7114_s2, 64, %s41_s18, [#allocation5]  }
   0xe   :  { %s5564_s24 = scalar_lea.vmem %s69_s20, 16  ;;  %s5568_s25 = scalar_lea.vmem %s69_s20, 32 }
   0xf   :  { %p5565_p5 = scmp.ne.s32.totalorder %s69_s20, %s5564_s24  ;;  %p5569_p6 = scmp.lt.s32.totalorder %s69_s20, %s69_s20 }
  0x10   :  { %p5570_p7 = scmp.lt.s32.totalorder %s5568_s25, %s5564_s24 }
  0x12   :  { %p5571_p8 = por %p5570_p7, %p5569_p6 }
  0x14   :  { %p5572_p9 = pnand %p5571_p8, %p5565_p5 }
  0x16   :  { %5575 = shalt.err (!%p5572_p9)
}
  0x17   :  { %71 = dma.hbm_to_vmem [thread:$0]  %s7120_s8, 16, %s69_s20, [#allocation8]  }
  0x18   :  { %s5666_s28 = smov [#allocation2]  }
  0x19   :  { %s27_s29 = sshll.u32 %s5666_s28, 4  ;;  %s28_s29 = int_to_ptr.vmem [resolvable:$true] %s27_s29 }
  0x1a   :  { %s5584_s30 = scalar_lea.vmem %s28_s29, 28672  ;;  %p5589_p11 = scmp.lt.s32.totalorder %s28_s29, %s28_s29 }
  0x1b   :  { %p5585_p10 = scmp.ne.s32.totalorder %s28_s29, %s5584_s30  ;;  %p5590_p12 = scmp.lt.s32.totalorder %s5584_s30, %s5584_s30 }
  0x1d   :  { %p5591_p13 = por %p5590_p12, %p5589_p11 }
  0x1f   :  { %p5592_p0 = pnand %p5591_p13, %p5585_p10 }
  0x21   :  { %5595 = shalt.err (!%p5592_p0)
}
  0x22   :  { %s5667_s2 = smov 256   ;;  %s5668_s12 = smov 16  }
  0x23   :  { %33 = dma.hbm_to_vmem [thread:$0]  %s7113_s1, 28672, %s28_s29, [#allocation3], %s5667_s2, %s5667_s2, %s5668_s12  }
  0x24   :  { %s5669_s15 = smov [#allocation6]   ;;  %s5670_s8 = smov [#allocation9]  }
  0x25   :  { %s52_s16 = sshll.u32 %s5669_s15, 4  ;;  %s77_s17 = sshll.u32 %s5670_s8, 4  ;;  %s53_s16 = int_to_ptr.vmem [resolvable:$true] %s52_s16  ;;  %s78_s17 = int_to_ptr.vmem [resolvable:$true] %s77_s17 }
  0x26   :  { %s5604_s18 = scalar_lea.vmem %s53_s16, 32  ;;  %p5609_p2 = scmp.lt.s32.totalorder %s53_s16, %s53_s16 }
  0x27   :  { %p5605_p1 = scmp.ne.s32.totalorder %s53_s16, %s5604_s18  ;;  %p5610_p3 = scmp.lt.s32.totalorder %s5604_s18, %s5604_s18 }
  0x29   :  { %p5611_p4 = por %p5610_p3, %p5609_p2 }
  0x2b   :  { %p5612_p5 = pnand %p5611_p4, %p5605_p1 }
  0x2d   :  { %5615 = shalt.err (!%p5612_p5)
}
  0x2e   :  { %55 = dma.hbm_to_vmem [thread:$0]  %s7116_s4, 32, %s53_s16, [#allocation5]  }
  0x2f   :  { %s5624_s21 = scalar_lea.vmem %s78_s17, 512  ;;  %p5629_p7 = scmp.lt.s32.totalorder %s78_s17, %s78_s17 }
  0x30   :  { %p5625_p6 = scmp.ne.s32.totalorder %s78_s17, %s5624_s21  ;;  %p5630_p8 = scmp.lt.s32.totalorder %s5624_s21, %s5624_s21 }
  0x32   :  { %p5631_p9 = por %p5630_p8, %p5629_p7 }
  0x34   :  { %p5632_p10 = pnand %p5631_p9, %p5625_p6 }
  0x36   :  { %5635 = shalt.err (!%p5632_p10)
}
  0x37   :  { %s5671_s1 = smov 64   ;;  %s5672_s22 = smov 4  }
  0x38   :  { %83 = dma.hbm_to_vmem [thread:$0]  %s7121_s9, 512, %s78_s17, [#allocation8], %s5671_s1, %s5671_s1, %s5672_s22  }
  0x39   :  { %s5673_s25 = smov [#allocation10]  }
  0x3a   :  { %s90_s26 = sshll.u32 %s5673_s25, 4  ;;  %s91_s26 = int_to_ptr.vmem [resolvable:$true] %s90_s26 }
  0x3b   :  { %s5644_s27 = scalar_lea.vmem %s91_s26, 16  ;;  %s5648_s4 = scalar_lea.vmem %s91_s26, 32 }
  0x3c   :  { %p5645_p11 = scmp.ne.s32.totalorder %s91_s26, %s5644_s27  ;;  %p5649_p12 = scmp.lt.s32.totalorder %s91_s26, %s91_s26 }
  0x3d   :  { %p5650_p13 = scmp.lt.s32.totalorder %s5648_s4, %s5644_s27 }
  0x3f   :  { %p5651_p0 = por %p5650_p13, %p5649_p12 }
  0x41   :  { %p5652_p1 = pnand %p5651_p0, %p5645_p11 }
  0x43   :  { %5655 = shalt.err (!%p5652_p1)
}
  0x44   :  { %93 = dma.hbm_to_vmem [thread:$0]  %s7122_s10, 16, %s91_s26, [#allocation11]  }
  0x45   :  { %5656 = dma.done.wait [#allocation3], 28672  }
  0x46   :  { %5657 = vsyncadd [#allocation3], 4294938624 }
  0x47   :  { %5658 = dma.done.wait [#allocation5], 96  }
  0x48   :  { %5659 = vsyncadd [#allocation5], 4294967200 }
  0x49   :  { %5660 = dma.done.wait [#allocation8], 528  }
  0x4a   :  { %5661 = vsyncadd [#allocation8], 4294966768 }
  0x4b   :  { %5662 = dma.done.wait [#allocation11], 16  }
  0x4c   :  { %5663 = vsyncadd [#allocation11], 4294967280  ;;  %v4887_v0 = vld [vmem:[#allocation2 + $0xe4] ss:$16 sps:$4 sm:$0xff]   ;;  %v4891_v2 = vld [vmem:[#allocation2 + $0xe0] ss:$16 sps:$4 sm:$0xff]  }
  0x4d   :  { %v4889_v1 = vld [vmem:[#allocation2 + $0x2e4] ss:$16 sps:$4 sm:$0xff]   ;;  %1831 = vmatprep.subr.bf16.mxu0 %v4887_v0  ;;  %v4892_v3 = vld [vmem:[#allocation2 + $0x2e0] ss:$16 sps:$4 sm:$0xff]   ;;  %v4988_v51 = vld [vmem:[%s7112_s0 + $0xc] ss:$28 sps:$4 sm:$0xff]  }
  0x4e   :  { %1944 = vmatprep.subr.bf16.mxu1 %v4889_v1  ;;  %v4893_v4 = vld [vmem:[#allocation2 + $0xc4] ss:$16 sps:$4 sm:$0xff]   ;;  %1832 = vmatpush1.bf16.msra.mxu0 %v4891_v2  ;;  %v4897_v6 = vld [vmem:[#allocation2 + $0xc0] ss:$16 sps:$4 sm:$0xff]   ;;  %vm3988_vm0 = vcmask 523264  }
  0x4f   :  { %1945 = vmatpush1.bf16.msra.mxu1 %v4892_v3  ;;  %v4895_v5 = vld [vmem:[#allocation2 + $0x2c4] ss:$16 sps:$4 sm:$0xff]   ;;  %1833 = vmatprep.subr.bf16.mxu0 %v4893_v4  ;;  %v4898_v7 = vld [vmem:[#allocation2 + $0x2c0] ss:$16 sps:$4 sm:$0xff]  }
  0x50   :  { %1946 = vmatprep.subr.bf16.mxu1 %v4895_v5  ;;  %v4899_v8 = vld [vmem:[#allocation2 + $0xa4] ss:$16 sps:$4 sm:$0xff]   ;;  %v4903_v10 = vld [vmem:[#allocation2 + $0xa0] ss:$16 sps:$4 sm:$0xff]   ;;  %1976 = vmatprep.mubr.bf16.mxu1 %v4988_v51 }
  0x51   :  { %v4901_v9 = vld [vmem:[#allocation2 + $0x2a4] ss:$16 sps:$4 sm:$0xff]   ;;  %v4904_v11 = vld [vmem:[#allocation2 + $0x2a0] ss:$16 sps:$4 sm:$0xff]  }
  0x52   :  { %1834 = vmatpush1.bf16.msra.mxu0 %v4897_v6  ;;  %v4905_v12 = vld [vmem:[#allocation2 + $0x84] ss:$16 sps:$4 sm:$0xff]   ;;  %v4909_v14 = vld [vmem:[#allocation2 + $0x80] ss:$16 sps:$4 sm:$0xff]  }
  0x53   :  { %1947 = vmatpush1.bf16.msra.mxu1 %v4898_v7  ;;  %1835 = vmatprep.subr.bf16.mxu0 %v4899_v8  ;;  %v4907_v13 = vld [vmem:[#allocation2 + $0x284] ss:$16 sps:$4 sm:$0xff]   ;;  %v4910_v15 = vld [vmem:[#allocation2 + $0x280] ss:$16 sps:$4 sm:$0xff]  }
  0x54   :  { %1948 = vmatprep.subr.bf16.mxu1 %v4901_v9  ;;  %v4911_v16 = vld [vmem:[#allocation2 + $0x64] ss:$16 sps:$4 sm:$0xff]   ;;  %v4915_v18 = vld [vmem:[#allocation2 + $0x60] ss:$16 sps:$4 sm:$0xff]   ;;  %v4998_v9 = vld [vmem:[%s7112_s0 + $0x3c] ss:$28 sps:$4 sm:$0xff]  }
  0x55   :  { %v4913_v17 = vld [vmem:[#allocation2 + $0x264] ss:$16 sps:$4 sm:$0xff]   ;;  %v4916_v19 = vld [vmem:[#allocation2 + $0x260] ss:$16 sps:$4 sm:$0xff]  }
  0x56   :  { %1836 = vmatpush1.bf16.msra.mxu0 %v4903_v10  ;;  %v4917_v20 = vld [vmem:[#allocation2 + $0x44] ss:$16 sps:$4 sm:$0xff]   ;;  %v4921_v22 = vld [vmem:[#allocation2 + $0x40] ss:$16 sps:$4 sm:$0xff]  }
  0x57   :  { %1949 = vmatpush1.bf16.msra.mxu1 %v4904_v11  ;;  %1837 = vmatprep.subr.bf16.mxu0 %v4905_v12  ;;  %v4919_v21 = vld [vmem:[#allocation2 + $0x244] ss:$16 sps:$4 sm:$0xff]   ;;  %v4922_v23 = vld [vmem:[#allocation2 + $0x240] ss:$16 sps:$4 sm:$0xff]  }
  0x58   :  { %1950 = vmatprep.subr.bf16.mxu1 %v4907_v13  ;;  %v4923_v24 = vld [vmem:[#allocation2 + $0x24] ss:$16 sps:$4 sm:$0xff]   ;;  %v4927_v26 = vld [vmem:[#allocation2 + $0x20] ss:$16 sps:$4 sm:$0xff]  }
  0x59   :  { %v4925_v25 = vld [vmem:[#allocation2 + $0x224] ss:$16 sps:$4 sm:$0xff]   ;;  %v4928_v27 = vld [vmem:[#allocation2 + $0x220] ss:$16 sps:$4 sm:$0xff]  }
  0x5a   :  { %1838 = vmatpush1.bf16.msra.mxu0 %v4909_v14  ;;  %v4929_v28 = vld [vmem:[#allocation2 + $0x4] ss:$16 sps:$4 sm:$0xff]   ;;  %v4933_v30 = vld [vmem:[#allocation2] ss:$16 sps:$4 sm:$0xff]  }
  0x5b   :  { %1951 = vmatpush1.bf16.msra.mxu1 %v4910_v15  ;;  %1839 = vmatprep.subr.bf16.mxu0 %v4911_v16  ;;  %v4931_v29 = vld [vmem:[#allocation2 + $0x204] ss:$16 sps:$4 sm:$0xff]   ;;  %v4934_v31 = vld [vmem:[#allocation2 + $0x200] ss:$16 sps:$4 sm:$0xff]  }
  0x5c   :  { %1952 = vmatprep.subr.bf16.mxu1 %v4913_v17  ;;  %v4935_v32 = vld [vmem:[#allocation2 + $0x1e4] ss:$16 sps:$4 sm:$0xff]   ;;  %v4939_v34 = vld [vmem:[#allocation2 + $0x1e0] ss:$16 sps:$4 sm:$0xff]  }
  0x5d   :  { %v4937_v33 = vld [vmem:[#allocation2 + $0x3e4] ss:$16 sps:$4 sm:$0xff]   ;;  %v4940_v35 = vld [vmem:[#allocation2 + $0x3e0] ss:$16 sps:$4 sm:$0xff]  }
  0x5e   :  { %1840 = vmatpush1.bf16.msra.mxu0 %v4915_v18  ;;  %v4941_v36 = vld [vmem:[#allocation2 + $0x1c4] ss:$16 sps:$4 sm:$0xff]   ;;  %v4945_v38 = vld [vmem:[#allocation2 + $0x1c0] ss:$16 sps:$4 sm:$0xff]  }
  0x5f   :  { %1953 = vmatpush1.bf16.msra.mxu1 %v4916_v19  ;;  %1841 = vmatprep.subr.bf16.mxu0 %v4917_v20  ;;  %v4943_v37 = vld [vmem:[#allocation2 + $0x3c4] ss:$16 sps:$4 sm:$0xff]   ;;  %v4946_v39 = vld [vmem:[#allocation2 + $0x3c0] ss:$16 sps:$4 sm:$0xff]  }
  0x60   :  { %1954 = vmatprep.subr.bf16.mxu1 %v4919_v21  ;;  %v4947_v40 = vld [vmem:[#allocation2 + $0x1a4] ss:$16 sps:$4 sm:$0xff]   ;;  %v4951_v42 = vld [vmem:[#allocation2 + $0x1a0] ss:$16 sps:$4 sm:$0xff]   ;;  %v5015_v21 = vld [vmem:[%s7112_s0 + $0x7c] ss:$28 sps:$4 sm:$0xff]  }
  0x61   :  { %v4949_v41 = vld [vmem:[#allocation2 + $0x3a4] ss:$16 sps:$4 sm:$0xff]   ;;  %v4952_v43 = vld [vmem:[#allocation2 + $0x3a0] ss:$16 sps:$4 sm:$0xff]  }
  0x62   :  { %1842 = vmatpush1.bf16.msra.mxu0 %v4921_v22  ;;  %v4953_v44 = vld [vmem:[#allocation2 + $0x184] ss:$16 sps:$4 sm:$0xff]   ;;  %v4957_v46 = vld [vmem:[#allocation2 + $0x180] ss:$16 sps:$4 sm:$0xff]  }
  0x63   :  { %1955 = vmatpush1.bf16.msra.mxu1 %v4922_v23  ;;  %1843 = vmatprep.subr.bf16.mxu0 %v4923_v24  ;;  %v4955_v45 = vld [vmem:[#allocation2 + $0x384] ss:$16 sps:$4 sm:$0xff]   ;;  %v4958_v47 = vld [vmem:[#allocation2 + $0x380] ss:$16 sps:$4 sm:$0xff]  }
  0x64   :  { %1956 = vmatprep.subr.bf16.mxu1 %v4925_v25  ;;  %v4959_v48 = vld [vmem:[#allocation2 + $0x164] ss:$16 sps:$4 sm:$0xff]   ;;  %v4963_v52 = vld [vmem:[#allocation2 + $0x160] ss:$16 sps:$4 sm:$0xff]  }
  0x65   :  { %v4985_v49 = vld [vmem:[%s7112_s0 + $0x4] ss:$28 sps:$4 sm:$0xff]   ;;  %v5002_v16 = vld [vmem:[%s7112_s0 + $0x38] ss:$28 sps:$4 sm:$0xff]   ;;  %v5017_v25 = vld [vmem:[%s7112_s0 + $0x70] ss:$28 sps:$4 sm:$0xff]  }
  0x66   :  { %1844 = vmatpush1.bf16.msra.mxu0 %v4927_v26  ;;  %v4961_v50 = vld [vmem:[#allocation2 + $0x364] ss:$16 sps:$4 sm:$0xff]   ;;  %1863 = vmatprep.mubr.bf16.mxu0 %v4985_v49  ;;  %v4964_v53 = vld [vmem:[#allocation2 + $0x360] ss:$16 sps:$4 sm:$0xff]  }
  0x67   :  { %1957 = vmatpush1.bf16.msra.mxu1 %v4928_v27  ;;  %1845 = vmatprep.subr.bf16.mxu0 %v4929_v28  ;;  %v4965_v54 = vld [vmem:[#allocation2 + $0x144] ss:$16 sps:$4 sm:$0xff]   ;;  %v4969_v56 = vld [vmem:[#allocation2 + $0x140] ss:$16 sps:$4 sm:$0xff]  }
  0x68   :  { %1958 = vmatprep.subr.bf16.mxu1 %v4931_v29  ;;  %v4967_v55 = vld [vmem:[#allocation2 + $0x344] ss:$16 sps:$4 sm:$0xff]   ;;  %v4970_v57 = vld [vmem:[#allocation2 + $0x340] ss:$16 sps:$4 sm:$0xff]  }
  0x69   :  { %v4971_v58 = vld [vmem:[#allocation2 + $0x124] ss:$16 sps:$4 sm:$0xff]   ;;  %v4975_v60 = vld [vmem:[#allocation2 + $0x120] ss:$16 sps:$4 sm:$0xff]  }
  0x6a   :  { %1846 = vmatpush1.bf16.msra.mxu0 %v4933_v30  ;;  %v4973_v59 = vld [vmem:[#allocation2 + $0x324] ss:$16 sps:$4 sm:$0xff]   ;;  %v4976_v61 = vld [vmem:[#allocation2 + $0x320] ss:$16 sps:$4 sm:$0xff]  }
  0x6b   :  { %1959 = vmatpush1.bf16.msra.mxu1 %v4934_v31  ;;  %1847 = vmatprep.subr.bf16.mxu0 %v4935_v32  ;;  %v4977_v62 = vld [vmem:[#allocation2 + $0x104] ss:$16 sps:$4 sm:$0xff]   ;;  %v4981_v0 = vld [vmem:[#allocation2 + $0x100] ss:$16 sps:$4 sm:$0xff]   ;;  %v5028_v31 = vld [vmem:[%s7112_s0 + $0xac] ss:$28 sps:$4 sm:$0xff]  }
  0x6c   :  { %1960 = vmatprep.subr.bf16.mxu1 %v4937_v33  ;;  %v4979_v63 = vld [vmem:[#allocation2 + $0x304] ss:$16 sps:$4 sm:$0xff]   ;;  %v4982_v1 = vld [vmem:[#allocation2 + $0x300] ss:$16 sps:$4 sm:$0xff]  }
  0x6d   :  { %v4991_v2 = vld [vmem:[#allocation2 + $0x4e4] ss:$16 sps:$4 sm:$0xff]   ;;  %v4983_v4 = vld [vmem:[%s7112_s0] ss:$28 sps:$4 sm:$0xff]  }
  0x6e   :  { %1848 = vmatpush2.bf16.msra.mxu0 %v4939_v34  ;;  %v4994_v3 = vld [vmem:[#allocation2 + $0x6e4] ss:$16 sps:$4 sm:$0xff]   ;;  %v4989_v6 = vld [vmem:[#allocation2 + $0x4e0] ss:$16 sps:$4 sm:$0xff]  }
  0x6f   :  { %1961 = vmatpush2.bf16.msra.mxu1 %v4940_v35  ;;  %1849 = vmatprep.subr.bf16.mxu0 %v4941_v36  ;;  %v4986_v5 = vld [vmem:[%s7112_s0 + $0x8] ss:$28 sps:$4 sm:$0xff]   ;;  %v4992_v7 = vld [vmem:[#allocation2 + $0x6e0] ss:$16 sps:$4 sm:$0xff]   ;;  %v5018_v27 = vld [vmem:[%s7112_s0 + $0x78] ss:$28 sps:$4 sm:$0xff]  }
  0x70   :  { %1962 = vmatprep.subr.bf16.mxu1 %v4943_v37  ;;  %v4997_v8 = vld [vmem:[#allocation2 + $0x4c4] ss:$16 sps:$4 sm:$0xff]   ;;  %v4995_v12 = vld [vmem:[#allocation2 + $0x4c0] ss:$16 sps:$4 sm:$0xff]  }
  0x71   :  { %v5000_v10 = vld [vmem:[%s7112_s0 + $0x44] ss:$28 sps:$4 sm:$0xff]   ;;  %v5013_v20 = vld [vmem:[%s7112_s0 + $0x74] ss:$28 sps:$4 sm:$0xff]  }
  0x72   :  { %1850 = vmatpush2.bf16.msra.mxu0 %v4945_v38  ;;  %v5009_v11 = vld [vmem:[#allocation2 + $0x6c4] ss:$16 sps:$4 sm:$0xff]   ;;  %v5007_v14 = vld [vmem:[#allocation2 + $0x6c0] ss:$16 sps:$4 sm:$0xff]  }
  0x73   :  { %1963 = vmatpush2.bf16.msra.mxu1 %v4946_v39  ;;  %1851 = vmatprep.subr.bf16.mxu0 %v4947_v40  ;;  %v5006_v13 = vld [vmem:[#allocation2 + $0x4a4] ss:$16 sps:$4 sm:$0xff]   ;;  %v5003_v17 = vld [vmem:[%s7112_s0 + $0x40] ss:$28 sps:$4 sm:$0xff]   ;;  %v5033_v39 = vld [vmem:[%s7112_s0 + $0xb0] ss:$28 sps:$4 sm:$0xff]  }
  0x74   :  { %1964 = vmatprep.subr.bf16.mxu1 %v4949_v41  ;;  %v5024_v15 = vld [vmem:[#allocation2 + $0x6a4] ss:$16 sps:$4 sm:$0xff]   ;;  %v5004_v18 = vld [vmem:[#allocation2 + $0x4a0] ss:$16 sps:$4 sm:$0xff]  }
  0x75   :  { %v5012_v19 = vld [vmem:[#allocation2 + $0x484] ss:$16 sps:$4 sm:$0xff]   ;;  %v5022_v22 = vld [vmem:[#allocation2 + $0x6a0] ss:$16 sps:$4 sm:$0xff]  }
  0x76   :  { %1852 = vmatpush2.bf16.msra.mxu0 %v4951_v42  ;;  %v5039_v23 = vld [vmem:[#allocation2 + $0x684] ss:$16 sps:$4 sm:$0xff]   ;;  %v5010_v24 = vld [vmem:[#allocation2 + $0x480] ss:$16 sps:$4 sm:$0xff]  }
  0x77   :  { %1965 = vmatpush2.bf16.msra.mxu1 %v4952_v43  ;;  %1853 = vmatprep.subr.bf16.mxu0 %v4953_v44  ;;  %v5021_v26 = vld [vmem:[#allocation2 + $0x464] ss:$16 sps:$4 sm:$0xff]   ;;  %v5037_v28 = vld [vmem:[#allocation2 + $0x680] ss:$16 sps:$4 sm:$0xff]   ;;  %v5045_v43 = vld [vmem:[%s7112_s0 + $0xec] ss:$28 sps:$4 sm:$0xff]  }
  0x78   :  { %1966 = vmatprep.subr.bf16.mxu1 %v4955_v45  ;;  %v5019_v29 = vld [vmem:[#allocation2 + $0x460] ss:$16 sps:$4 sm:$0xff]   ;;  %v5027_v30 = vld [vmem:[#allocation2 + $0x444] ss:$16 sps:$4 sm:$0xff]  }
  0x79   :  { %v5030_v32 = vld [vmem:[%s7112_s0 + $0xb4] ss:$28 sps:$4 sm:$0xff]   ;;  %v5032_v38 = vld [vmem:[%s7112_s0 + $0xa8] ss:$28 sps:$4 sm:$0xff]  }
  0x7a   :  { %1854 = vmatpush2.bf16.msra.mxu0 %v4957_v46  ;;  %v5054_v33 = vld [vmem:[#allocation2 + $0x664] ss:$16 sps:$4 sm:$0xff]   ;;  %v5052_v34 = vld [vmem:[#allocation2 + $0x660] ss:$16 sps:$4 sm:$0xff]  }
  0x7b   :  { %1967 = vmatpush2.bf16.msra.mxu1 %v4958_v47  ;;  %1855 = vmatprep.subr.bf16.mxu0 %v4959_v48  ;;  %v5025_v35 = vld [vmem:[#allocation2 + $0x440] ss:$16 sps:$4 sm:$0xff]   ;;  %v5069_v36 = vld [vmem:[#allocation2 + $0x644] ss:$16 sps:$4 sm:$0xff]  }
  0x7c   :  { %1968 = vmatprep.subr.bf16.mxu1 %v4961_v50  ;;  %v5036_v37 = vld [vmem:[#allocation2 + $0x424] ss:$16 sps:$4 sm:$0xff]   ;;  %v5034_v40 = vld [vmem:[#allocation2 + $0x420] ss:$16 sps:$4 sm:$0xff]  }
  0x7d   :  { %v5042_v41 = vld [vmem:[#allocation2 + $0x404] ss:$16 sps:$4 sm:$0xff]   ;;  %v5067_v44 = vld [vmem:[#allocation2 + $0x640] ss:$16 sps:$4 sm:$0xff]  }
  0x7e   :  { %1856 = vmatpush2.bf16.msra.mxu0 %v4963_v52  ;;  %v5043_v42 = vld [vmem:[%s7112_s0 + $0xe4] ss:$28 sps:$4 sm:$0xff]  }
  0x7f   :  { %1969 = vmatpush2.bf16.msra.mxu1 %v4964_v53  ;;  %1857 = vmatprep.subr.bf16.mxu0 %v4965_v54  ;;  %v5084_v45 = vld [vmem:[#allocation2 + $0x624] ss:$16 sps:$4 sm:$0xff]   ;;  %v5040_v46 = vld [vmem:[#allocation2 + $0x400] ss:$16 sps:$4 sm:$0xff]   ;;  %v5058_v53 = vld [vmem:[%s7112_s0 + $0x11c] ss:$28 sps:$4 sm:$0xff]  }
  0x80   :  { %1970 = vmatprep.subr.bf16.mxu1 %v4967_v55  ;;  %v5047_v47 = vld [vmem:[%s7112_s0 + $0xe0] ss:$28 sps:$4 sm:$0xff]   ;;  %v5051_v48 = vld [vmem:[#allocation2 + $0x5e4] ss:$16 sps:$4 sm:$0xff]  }
  0x81   :  { %v5048_v49 = vld [vmem:[%s7112_s0 + $0xe8] ss:$28 sps:$4 sm:$0xff]   ;;  %v5082_v50 = vld [vmem:[#allocation2 + $0x620] ss:$16 sps:$4 sm:$0xff]  }
  0x82   :  { %1858 = vmatpush2.bf16.msra.mxu0 %v4969_v56  ;;  %v5049_v51 = vld [vmem:[#allocation2 + $0x5e0] ss:$16 sps:$4 sm:$0xff]   ;;  %v5057_v52 = vld [vmem:[#allocation2 + $0x5c4] ss:$16 sps:$4 sm:$0xff]  }
  0x83   :  { %1971 = vmatpush2.bf16.msra.mxu1 %v4970_v57  ;;  %1859 = vmatprep.subr.bf16.mxu0 %v4971_v58  ;;  %v5060_v54 = vld [vmem:[%s7112_s0 + $0x124] ss:$28 sps:$4 sm:$0xff]   ;;  %v5112_v58 = vld [vmem:[#allocation2 + $0x2ec] ss:$16 sps:$4 sm:$0xff]  }
  0x84   :  { %1972 = vmatprep.subr.bf16.mxu1 %v4973_v59  ;;  %v5099_v55 = vld [vmem:[#allocation2 + $0x604] ss:$16 sps:$4 sm:$0xff]   ;;  %v5097_v56 = vld [vmem:[#allocation2 + $0x600] ss:$16 sps:$4 sm:$0xff]  }
  0x85   :  { %v5055_v57 = vld [vmem:[#allocation2 + $0x5c0] ss:$16 sps:$4 sm:$0xff]   ;;  %v5066_v59 = vld [vmem:[#allocation2 + $0x5a4] ss:$16 sps:$4 sm:$0xff]  }
  0x86   :  { %1860 = vmatpush2.bf16.msra.mxu0 %v4975_v60  ;;  %v5062_v60 = vld [vmem:[%s7112_s0 + $0x118] ss:$28 sps:$4 sm:$0xff]  }
  0x87   :  { %1973 = vmatpush2.bf16.msra.mxu1 %v4976_v61  ;;  %1861 = vmatprep.subr.bf16.mxu0 %v4977_v62  ;;  %v5063_v61 = vld [vmem:[%s7112_s0 + $0x120] ss:$28 sps:$4 sm:$0xff]  }
  0x88   :  { %1974 = vmatprep.subr.bf16.mxu1 %v4979_v63  ;;  %v5064_v62 = vld [vmem:[#allocation2 + $0x5a0] ss:$16 sps:$4 sm:$0xff]   ;;  %v5072_v63 = vld [vmem:[#allocation2 + $0x584] ss:$16 sps:$4 sm:$0xff]  }
  0x8a   :  { %1862 = vmatpush2.bf16.msra.mxu0 %v4981_v0  ;;  %v5073_v0 = vld [vmem:[%s7112_s0 + $0x154] ss:$28 sps:$4 sm:$0xff]  }
  0x8b   :  { %1975 = vmatpush2.bf16.msra.mxu1 %v4982_v1  ;;  %2057 = vmatprep.subr.bf16.mxu0 %v4991_v2  ;;  %v5075_v1 = vld [vmem:[%s7112_s0 + $0x15c] ss:$28 sps:$4 sm:$0xff]   ;;  %v5070_v2 = vld [vmem:[#allocation2 + $0x580] ss:$16 sps:$4 sm:$0xff]  }
  0x8c   :  { %2170 = vmatprep.subr.bf16.mxu1 %v4994_v3  ;;  %v5077_v3 = vld [vmem:[%s7112_s0 + $0x150] ss:$28 sps:$4 sm:$0xff]  }
  0x8d   :  { %1864 = vmatmul.mubr.bf16.vlgmr.msra.gmra.mxu0 %v4983_v4  ;;  %v5081_v4 = vld [vmem:[#allocation2 + $0x564] ss:$16 sps:$4 sm:$0xff]  }
  0x8e   :  { %1977 = vmatmul.mubr.bf16.vlgmr.msra.gmra.mxu1 %v4986_v5  ;;  %2058 = vmatpush1.bf16.msra.mxu0 %v4989_v6  ;;  %v5078_v5 = vld [vmem:[%s7112_s0 + $0x158] ss:$28 sps:$4 sm:$0xff]   ;;  %v5079_v6 = vld [vmem:[#allocation2 + $0x560] ss:$16 sps:$4 sm:$0xff]  }
  0x8f   :  { %2171 = vmatpush1.bf16.msra.mxu1 %v4992_v7  ;;  %2059 = vmatprep.subr.bf16.mxu0 %v4997_v8  ;;  %v5087_v7 = vld [vmem:[#allocation2 + $0x544] ss:$16 sps:$4 sm:$0xff]   ;;  %v5088_v8 = vld [vmem:[%s7112_s0 + $0x18c] ss:$28 sps:$4 sm:$0xff]  }
  0x90   :  { %1873 = vmatprep.mubr.bf16.mxu0 %v4998_v9  ;;  %1986 = vmatprep.mubr.bf16.mxu1 %v5000_v10  ;;  %v5090_v9 = vld [vmem:[%s7112_s0 + $0x194] ss:$28 sps:$4 sm:$0xff]  }
  0x91   :  { %2172 = vmatprep.subr.bf16.mxu1 %v5009_v11  ;;  %v5085_v10 = vld [vmem:[#allocation2 + $0x540] ss:$16 sps:$4 sm:$0xff]   ;;  %v5096_v11 = vld [vmem:[#allocation2 + $0x524] ss:$16 sps:$4 sm:$0xff]  }
  0x92   :  { %2060 = vmatpush1.bf16.msra.mxu0 %v4995_v12  ;;  %v5092_v12 = vld [vmem:[%s7112_s0 + $0x188] ss:$28 sps:$4 sm:$0xff]  }
  0x93   :  { %2173 = vmatpush1.bf16.msra.mxu1 %v5007_v14  ;;  %2061 = vmatprep.subr.bf16.mxu0 %v5006_v13  ;;  %v5093_v13 = vld [vmem:[%s7112_s0 + $0x190] ss:$28 sps:$4 sm:$0xff]  }
  0x94   :  { %2174 = vmatprep.subr.bf16.mxu1 %v5024_v15  ;;  %v5094_v14 = vld [vmem:[#allocation2 + $0x520] ss:$16 sps:$4 sm:$0xff]  }
  0x95   :  { %1874 = vmatmul.mubr.bf16.gmra.mxu0 %v5002_v16  ;;  %v5105_v15 = vld [vmem:[%s7112_s0 + $0x14] ss:$28 sps:$4 sm:$0xff]  }
  0x96   :  { %1987 = vmatmul.mubr.bf16.gmra.mxu1 %v5003_v17  ;;  %2062 = vmatpush1.bf16.msra.mxu0 %v5004_v18  ;;  %v5102_v16 = vld [vmem:[#allocation2 + $0x504] ss:$16 sps:$4 sm:$0xff]   ;;  %v5100_v17 = vld [vmem:[#allocation2 + $0x500] ss:$16 sps:$4 sm:$0xff]   ;;  %v5674_v18 = vmov 0  }
  0x97   :  { %1883 = vmatprep.mubr.bf16.mxu0 %v5013_v20  ;;  %2063 = vmatprep.subr.bf16.mxu0 %v5012_v19  ;;  %v5109_v19 = vld [vmem:[#allocation2 + $0xec] ss:$16 sps:$4 sm:$0xff]  }
  0x98   :  { %1996 = vmatprep.mubr.bf16.mxu1 %v5015_v21  ;;  %2175 = vmatpush1.bf16.msra.mxu1 %v5022_v22  ;;  %v5103_v20 = vld [vmem:[%s7112_s0 + $0x10] ss:$28 sps:$4 sm:$0xff]   ;;  %v5106_v21 = vld [vmem:[%s7112_s0 + $0x18] ss:$28 sps:$4 sm:$0xff]  }
  0x99   :  { %2176 = vmatprep.subr.bf16.mxu1 %v5039_v23  ;;  %v5107_v22 = vld [vmem:[#allocation2 + $0xe8] ss:$16 sps:$4 sm:$0xff]  }
  0x9a   :  { %2064 = vmatpush1.bf16.msra.mxu0 %v5010_v24  ;;  %v5110_v23 = vld [vmem:[#allocation2 + $0x2e8] ss:$16 sps:$4 sm:$0xff]   ;;  %v5115_v24 = vld [vmem:[#allocation2 + $0xcc] ss:$16 sps:$4 sm:$0xff]  }
  0x9b   :  { %2065 = vmatprep.subr.bf16.mxu0 %v5021_v26  ;;  %v5119_v26 = vld [vmem:[%s7112_s0 + $0x4c] ss:$28 sps:$4 sm:$0xff]  }
  0x9c   :  { %2177 = vmatpush1.bf16.msra.mxu1 %v5037_v28  ;;  %v5116_v28 = vld [vmem:[#allocation2 + $0x2c8] ss:$16 sps:$4 sm:$0xff]  }
  0x9d   :  { %1884 = vmatmul.mubr.bf16.gmra.mxu0 %v5017_v25  ;;  %2178 = vmatprep.subr.bf16.mxu1 %v5054_v33  ;;  %v5118_v25 = vld [vmem:[#allocation2 + $0x2cc] ss:$16 sps:$4 sm:$0xff]   ;;  %v5123_v33 = vld [vmem:[#allocation2 + $0xa8] ss:$16 sps:$4 sm:$0xff]  }
  0x9e   :  { %1997 = vmatmul.mubr.bf16.gmra.mxu1 %v5018_v27  ;;  %2066 = vmatpush1.bf16.msra.mxu0 %v5019_v29  ;;  %v5113_v27 = vld [vmem:[#allocation2 + $0xc8] ss:$16 sps:$4 sm:$0xff]   ;;  %v5125_v29 = vld [vmem:[#allocation2 + $0xac] ss:$16 sps:$4 sm:$0xff]  }
  0x9f   :  { %1893 = vmatprep.mubr.bf16.mxu0 %v5028_v31  ;;  %2067 = vmatprep.subr.bf16.mxu0 %v5027_v30  ;;  %v5128_v30 = vld [vmem:[#allocation2 + $0x2ac] ss:$16 sps:$4 sm:$0xff]   ;;  %v5121_v31 = vld [vmem:[%s7112_s0 + $0x48] ss:$28 sps:$4 sm:$0xff]  }
  0xa0   :  { %2006 = vmatprep.mubr.bf16.mxu1 %v5030_v32  ;;  %2179 = vmatpush1.bf16.msra.mxu1 %v5052_v34  ;;  %v5122_v32 = vld [vmem:[%s7112_s0 + $0x50] ss:$28 sps:$4 sm:$0xff]   ;;  %v5126_v34 = vld [vmem:[#allocation2 + $0x2a8] ss:$16 sps:$4 sm:$0xff]  }
  0xa1   :  { %2180 = vmatprep.subr.bf16.mxu1 %v5069_v36  ;;  %v5134_v36 = vld [vmem:[#allocation2 + $0x28c] ss:$16 sps:$4 sm:$0xff]  }
  0xa2   :  { %2068 = vmatpush1.bf16.msra.mxu0 %v5025_v35  ;;  %v5131_v35 = vld [vmem:[#allocation2 + $0x8c] ss:$16 sps:$4 sm:$0xff]  }
  0xa3   :  { %2069 = vmatprep.subr.bf16.mxu0 %v5036_v37  ;;  %v5135_v37 = vld [vmem:[%s7112_s0 + $0x84] ss:$28 sps:$4 sm:$0xff]  }
  0xa4   :  { %2181 = vmatpush1.bf16.msra.mxu1 %v5067_v44  ;;  %v5139_v44 = vld [vmem:[#allocation2 + $0x68] ss:$16 sps:$4 sm:$0xff]  }
  0xa5   :  { %1894 = vmatmul.mubr.bf16.gmra.mxu0 %v5032_v38  ;;  %2182 = vmatprep.subr.bf16.mxu1 %v5084_v45  ;;  %v5129_v38 = vld [vmem:[#allocation2 + $0x88] ss:$16 sps:$4 sm:$0xff]  }
  0xa6   :  { %2007 = vmatmul.mubr.bf16.gmra.mxu1 %v5033_v39  ;;  %2070 = vmatpush1.bf16.msra.mxu0 %v5034_v40  ;;  %v5132_v39 = vld [vmem:[#allocation2 + $0x288] ss:$16 sps:$4 sm:$0xff]   ;;  %v5137_v40 = vld [vmem:[%s7112_s0 + $0x80] ss:$28 sps:$4 sm:$0xff]  }
  0xa7   :  { %1903 = vmatprep.mubr.bf16.mxu0 %v5043_v42  ;;  %2071 = vmatprep.subr.bf16.mxu0 %v5042_v41  ;;  %v5141_v41 = vld [vmem:[#allocation2 + $0x6c] ss:$16 sps:$4 sm:$0xff]   ;;  %v5142_v45 = vld [vmem:[#allocation2 + $0x268] ss:$16 sps:$4 sm:$0xff]  }
  0xa8   :  { %2016 = vmatprep.mubr.bf16.mxu1 %v5045_v43  ;;  %2183 = vmatpush1.bf16.msra.mxu1 %v5082_v50  ;;  %v5144_v42 = vld [vmem:[#allocation2 + $0x26c] ss:$16 sps:$4 sm:$0xff]   ;;  %v5138_v43 = vld [vmem:[%s7112_s0 + $0x88] ss:$28 sps:$4 sm:$0xff]  }
  0xa9   :  { %2184 = vmatprep.subr.bf16.mxu1 %v5099_v55  ;;  %v5148_v50 = vld [vmem:[#allocation2 + $0x248] ss:$16 sps:$4 sm:$0xff]  }
  0xaa   :  { %2072 = vmatpush1.bf16.msra.mxu0 %v5040_v46  ;;  %v5147_v46 = vld [vmem:[#allocation2 + $0x4c] ss:$16 sps:$4 sm:$0xff]   ;;  %v5155_v55 = vld [vmem:[#allocation2 + $0x28] ss:$16 sps:$4 sm:$0xff]  }
  0xab   :  { %2073 = vmatprep.subr.bf16.mxu0 %v5051_v48  ;;  %v5882_v48 = vld [vmem:[%s7112_s0 + $0xbc] ss:$28 sps:$4 sm:$0xff]  }
  0xac   :  { %2185 = vmatpush1.bf16.msra.mxu1 %v5097_v56  ;;  %v5158_v56 = vld [vmem:[#allocation2 + $0x228] ss:$16 sps:$4 sm:$0xff]  }
  0xad   :  { %1904 = vmatmul.mubr.bf16.gmra.mxu0 %v5047_v47  ;;  %2396 = vmatprep.subr.bf16.mxu1 %v5112_v58  ;;  %v5150_v47 = vld [vmem:[#allocation2 + $0x24c] ss:$16 sps:$4 sm:$0xff]  }
  0xae   :  { %2017 = vmatmul.mubr.bf16.gmra.mxu1 %v5048_v49  ;;  %2074 = vmatpush2.bf16.msra.mxu0 %v5049_v51  ;;  %v5145_v49 = vld [vmem:[#allocation2 + $0x48] ss:$16 sps:$4 sm:$0xff]   ;;  %v5166_v58 = vld [vmem:[#allocation2 + $0x20c] ss:$16 sps:$4 sm:$0xff]  }
  0xaf   :  { %1913 = vmatprep.mubr.bf16.mxu0 %v5058_v53  ;;  %2075 = vmatprep.subr.bf16.mxu0 %v5057_v52  ;;  %v5153_v51 = vld [vmem:[%s7112_s0 + $0xb8] ss:$28 sps:$4 sm:$0xff]   ;;  %v5157_v52 = vld [vmem:[#allocation2 + $0x2c] ss:$16 sps:$4 sm:$0xff]  }
  0xb0   :  { %2026 = vmatprep.mubr.bf16.mxu1 %v5060_v54  ;;  %v5160_v53 = vld [vmem:[#allocation2 + $0x22c] ss:$16 sps:$4 sm:$0xff]  }
  0xb1   :  { %v5154_v54 = vld [vmem:[%s7112_s0 + $0xc0] ss:$28 sps:$4 sm:$0xff]  }
  0xb2   :  { %2076 = vmatpush2.bf16.msra.mxu0 %v5055_v57  ;;  %v5163_v57 = vld [vmem:[#allocation2 + $0xc] ss:$16 sps:$4 sm:$0xff]  }
  0xb3   :  { %2077 = vmatprep.subr.bf16.mxu0 %v5066_v59  ;;  %v5895_v59 = vld [vmem:[%s7112_s0 + $0xf4] ss:$28 sps:$4 sm:$0xff]  }
  0xb5   :  { %1914 = vmatmul.mubr.bf16.gmra.mxu0 %v5062_v60  ;;  %v5161_v60 = vld [vmem:[#allocation2 + $0x8] ss:$16 sps:$4 sm:$0xff]  }
  0xb6   :  { %2027 = vmatmul.mubr.bf16.gmra.mxu1 %v5063_v61  ;;  %2078 = vmatpush2.bf16.msra.mxu0 %v5064_v62  ;;  %v5164_v61 = vld [vmem:[#allocation2 + $0x208] ss:$16 sps:$4 sm:$0xff]   ;;  %v5173_v62 = vld [vmem:[#allocation2 + $0x1ec] ss:$16 sps:$4 sm:$0xff]  }
  0xb7   :  { %1923 = vmatprep.mubr.bf16.mxu0 %v5073_v0  ;;  %2079 = vmatprep.subr.bf16.mxu0 %v5072_v63  ;;  %v5176_v63 = vld [vmem:[#allocation2 + $0x3ec] ss:$16 sps:$4 sm:$0xff]  }
  0xb8   :  { %2036 = vmatprep.mubr.bf16.mxu1 %v5075_v1  ;;  %v5169_v0 = vld [vmem:[%s7112_s0 + $0xf0] ss:$28 sps:$4 sm:$0xff]   ;;  %v5170_v1 = vld [vmem:[%s7112_s0 + $0xf8] ss:$28 sps:$4 sm:$0xff]  }
  0xba   :  { %2080 = vmatpush2.bf16.msra.mxu0 %v5070_v2  ;;  %v5171_v2 = vld [vmem:[#allocation2 + $0x1e8] ss:$16 sps:$4 sm:$0xff]  }
  0xbb   :  { %2081 = vmatprep.subr.bf16.mxu0 %v5081_v4  ;;  %v5179_v4 = vld [vmem:[#allocation2 + $0x1cc] ss:$16 sps:$4 sm:$0xff]  }
  0xbd   :  { %1924 = vmatmul.mubr.bf16.gmra.mxu0 %v5077_v3  ;;  %v5174_v3 = vld [vmem:[#allocation2 + $0x3e8] ss:$16 sps:$4 sm:$0xff]  }
  0xbe   :  { %2037 = vmatmul.mubr.bf16.gmra.mxu1 %v5078_v5  ;;  %2082 = vmatpush2.bf16.msra.mxu0 %v5079_v6  ;;  %v5182_v5 = vld [vmem:[#allocation2 + $0x3cc] ss:$16 sps:$4 sm:$0xff]  }
  0xbf   :  { %1933 = vmatprep.mubr.bf16.mxu0 %v5088_v8  ;;  %2083 = vmatprep.subr.bf16.mxu0 %v5087_v7  ;;  %v5908_v6 = vld [vmem:[%s7112_s0 + $0x12c] ss:$28 sps:$4 sm:$0xff]  }
  0xc0   :  { %2046 = vmatprep.mubr.bf16.mxu1 %v5090_v9  ;;  %v5177_v7 = vld [vmem:[#allocation2 + $0x1c8] ss:$16 sps:$4 sm:$0xff]   ;;  %v5189_v9 = vld [vmem:[#allocation2 + $0x1ac] ss:$16 sps:$4 sm:$0xff]  }
  0xc1   :  { %v5180_v8 = vld [vmem:[#allocation2 + $0x3c8] ss:$16 sps:$4 sm:$0xff]  }
  0xc2   :  { %2084 = vmatpush2.bf16.msra.mxu0 %v5085_v10  ;;  %v5192_v10 = vld [vmem:[#allocation2 + $0x3ac] ss:$16 sps:$4 sm:$0xff]  }
  0xc3   :  { %2085 = vmatprep.subr.bf16.mxu0 %v5096_v11  ;;  %v5915_v11 = vld [vmem:[%s7112_s0 + $0x128] ss:$28 sps:$4 sm:$0xff]  }
  0xc5   :  { %1934 = vmatmul.mubr.bf16.gmra.mxu0 %v5092_v12  ;;  %v5920_v12 = vld [vmem:[%s7112_s0 + $0x130] ss:$28 sps:$4 sm:$0xff]  }
  0xc6   :  { %2047 = vmatmul.mubr.bf16.gmra.mxu1 %v5093_v13  ;;  %2086 = vmatpush2.bf16.msra.mxu0 %v5094_v14  ;;  %v5187_v13 = vld [vmem:[#allocation2 + $0x1a8] ss:$16 sps:$4 sm:$0xff]  }
  0xc7   :  { %2089 = vmatprep.mubr.bf16.mxu0 %v5105_v15  ;;  %2087 = vmatprep.subr.bf16.mxu0 %v5102_v16  ;;  %v5190_v14 = vld [vmem:[#allocation2 + $0x3a8] ss:$16 sps:$4 sm:$0xff]   ;;  %v5195_v15 = vld [vmem:[#allocation2 + $0x18c] ss:$16 sps:$4 sm:$0xff]  }
  0xc8   :  { %2202 = vmatprep.mubr.bf16.mxu1 %v5674_v18  ;;  %v5198_v16 = vld [vmem:[#allocation2 + $0x38c] ss:$16 sps:$4 sm:$0xff]  }
  0xca   :  { %2088 = vmatpush2.bf16.msra.mxu0 %v5100_v17  ;;  %v5925_v17 = vld [vmem:[%s7112_s0 + $0x164] ss:$28 sps:$4 sm:$0xff]  }
  0xcb   :  { %2283 = vmatprep.subr.bf16.mxu0 %v5109_v19  ;;  %v5193_v19 = vld [vmem:[#allocation2 + $0x188] ss:$16 sps:$4 sm:$0xff]  }
  0xcd   :  { %2090 = vmatmul.mubr.bf16.vlgmr.msra.gmra.mxu0 %v5103_v20  ;;  %v5196_v20 = vld [vmem:[#allocation2 + $0x388] ss:$16 sps:$4 sm:$0xff]  }
  0xce   :  { %2203 = vmatmul.mubr.bf16.vlgmr.msra.gmra.mxu1 %v5106_v21  ;;  %2284 = vmatpush1.bf16.msra.mxu0 %v5107_v22  ;;  %v5205_v21 = vld [vmem:[#allocation2 + $0x16c] ss:$16 sps:$4 sm:$0xff]  }
  0xcf   :  { %2397 = vmatpush1.bf16.msra.mxu1 %v5110_v23  ;;  %2285 = vmatprep.subr.bf16.mxu0 %v5115_v24  ;;  %v5208_v22 = vld [vmem:[#allocation2 + $0x36c] ss:$16 sps:$4 sm:$0xff]   ;;  %v5939_v24 = vld [vmem:[%s7112_s0 + $0x168] ss:$28 sps:$4 sm:$0xff]  }
  0xd0   :  { %2398 = vmatprep.subr.bf16.mxu1 %v5118_v25  ;;  %2099 = vmatprep.mubr.bf16.mxu0 %v5119_v26  ;;  %v5934_v23 = vld [vmem:[%s7112_s0 + $0x160] ss:$28 sps:$4 sm:$0xff]   ;;  %v5203_v25 = vld [vmem:[#allocation2 + $0x168] ss:$16 sps:$4 sm:$0xff]  }
  0xd1   :  { %2212 = vmatprep.mubr.bf16.mxu1 %v5674_v18  ;;  %v5206_v26 = vld [vmem:[#allocation2 + $0x368] ss:$16 sps:$4 sm:$0xff]  }
  0xd2   :  { %2286 = vmatpush1.bf16.msra.mxu0 %v5113_v27  ;;  %v5211_v27 = vld [vmem:[#allocation2 + $0x14c] ss:$16 sps:$4 sm:$0xff]  }
  0xd3   :  { %2399 = vmatpush1.bf16.msra.mxu1 %v5116_v28  ;;  %2287 = vmatprep.subr.bf16.mxu0 %v5125_v29  ;;  %v5214_v28 = vld [vmem:[#allocation2 + $0x34c] ss:$16 sps:$4 sm:$0xff]  }
  0xd4   :  { %2400 = vmatprep.subr.bf16.mxu1 %v5128_v30  ;;  %v5944_v29 = vld [vmem:[%s7112_s0 + $0x19c] ss:$28 sps:$4 sm:$0xff]  }
  0xd5   :  { %2100 = vmatmul.mubr.bf16.gmra.mxu0 %v5121_v31  ;;  %v5209_v30 = vld [vmem:[#allocation2 + $0x148] ss:$16 sps:$4 sm:$0xff]  }
  0xd6   :  { %2213 = vmatmul.mubr.bf16.gmra.mxu1 %v5122_v32  ;;  %2288 = vmatpush1.bf16.msra.mxu0 %v5123_v33  ;;  %v5212_v31 = vld [vmem:[#allocation2 + $0x348] ss:$16 sps:$4 sm:$0xff]   ;;  %v5221_v32 = vld [vmem:[#allocation2 + $0x12c] ss:$16 sps:$4 sm:$0xff]  }
  0xd7   :  { %2401 = vmatpush1.bf16.msra.mxu1 %v5126_v34  ;;  %2289 = vmatprep.subr.bf16.mxu0 %v5131_v35  ;;  %v5224_v33 = vld [vmem:[#allocation2 + $0x32c] ss:$16 sps:$4 sm:$0xff]   ;;  %v5953_v34 = vld [vmem:[%s7112_s0 + $0x198] ss:$28 sps:$4 sm:$0xff]  }
  0xd8   :  { %2402 = vmatprep.subr.bf16.mxu1 %v5134_v36  ;;  %2109 = vmatprep.mubr.bf16.mxu0 %v5135_v37  ;;  %v5958_v35 = vld [vmem:[%s7112_s0 + $0x1a0] ss:$28 sps:$4 sm:$0xff]   ;;  %v5219_v36 = vld [vmem:[#allocation2 + $0x128] ss:$16 sps:$4 sm:$0xff]  }
  0xd9   :  { %2222 = vmatprep.mubr.bf16.mxu1 %v5674_v18  ;;  %v5222_v37 = vld [vmem:[#allocation2 + $0x328] ss:$16 sps:$4 sm:$0xff]  }
  0xda   :  { %2290 = vmatpush1.bf16.msra.mxu0 %v5129_v38  ;;  %v5227_v38 = vld [vmem:[#allocation2 + $0x10c] ss:$16 sps:$4 sm:$0xff]  }
  0xdb   :  { %2403 = vmatpush1.bf16.msra.mxu1 %v5132_v39  ;;  %2291 = vmatprep.subr.bf16.mxu0 %v5141_v41  ;;  %v5230_v39 = vld [vmem:[#allocation2 + $0x30c] ss:$16 sps:$4 sm:$0xff]   ;;  %v5228_v41 = vld [vmem:[#allocation2 + $0x308] ss:$16 sps:$4 sm:$0xff]  }
  0xdc   :  { %2404 = vmatprep.subr.bf16.mxu1 %v5144_v42  ;;  %v5233_v42 = vld [vmem:[#allocation2 + $0x4ec] ss:$16 sps:$4 sm:$0xff]  }
  0xdd   :  { %2110 = vmatmul.mubr.bf16.gmra.mxu0 %v5137_v40  ;;  %v5225_v40 = vld [vmem:[#allocation2 + $0x108] ss:$16 sps:$4 sm:$0xff]  }
  0xde   :  { %2223 = vmatmul.mubr.bf16.gmra.mxu1 %v5138_v43  ;;  %2292 = vmatpush1.bf16.msra.mxu0 %v5139_v44  ;;  %v5236_v43 = vld [vmem:[#allocation2 + $0x6ec] ss:$16 sps:$4 sm:$0xff]   ;;  %v5491_v44 = vld [vmem:[%s7112_s0 + $0x4] ss:$28 sps:$4 sm:$0xff]  }
  0xdf   :  { %2405 = vmatpush1.bf16.msra.mxu1 %v5142_v45  ;;  %2293 = vmatprep.subr.bf16.mxu0 %v5147_v46  ;;  %v5492_v45 = vld [vmem:[%s7112_s0 + $0xc] ss:$28 sps:$4 sm:$0xff]  }
  0xe0   :  { %2406 = vmatprep.subr.bf16.mxu1 %v5150_v47  ;;  %2119 = vmatprep.mubr.bf16.mxu0 %v5882_v48  ;;  %v5231_v46 = vld [vmem:[#allocation2 + $0x4e8] ss:$16 sps:$4 sm:$0xff]  }
  0xe1   :  { %2232 = vmatprep.mubr.bf16.mxu1 %v5674_v18  ;;  %v5234_v47 = vld [vmem:[#allocation2 + $0x6e8] ss:$16 sps:$4 sm:$0xff]  }
  0xe2   :  { %2294 = vmatpush1.bf16.msra.mxu0 %v5145_v49  ;;  %v5239_v49 = vld [vmem:[#allocation2 + $0x4cc] ss:$16 sps:$4 sm:$0xff]  }
  0xe3   :  { %2407 = vmatpush1.bf16.msra.mxu1 %v5148_v50  ;;  %2295 = vmatprep.subr.bf16.mxu0 %v5157_v52  ;;  %v5245_v50 = vld [vmem:[#allocation2 + $0x6cc] ss:$16 sps:$4 sm:$0xff]   ;;  %v5494_v52 = vld [vmem:[%s7112_s0 + $0x8] ss:$28 sps:$4 sm:$0xff]  }
  0xe4   :  { %2408 = vmatprep.subr.bf16.mxu1 %v5160_v53  ;;  %v5237_v53 = vld [vmem:[#allocation2 + $0x4c8] ss:$16 sps:$4 sm:$0xff]  }
  0xe5   :  { %2120 = vmatmul.mubr.bf16.gmra.mxu0 %v5153_v51  ;;  %v5493_v51 = vld [vmem:[%s7112_s0] ss:$28 sps:$4 sm:$0xff]  }
  0xe6   :  { %2233 = vmatmul.mubr.bf16.gmra.mxu1 %v5154_v54  ;;  %2296 = vmatpush1.bf16.msra.mxu0 %v5155_v55  ;;  %v5243_v54 = vld [vmem:[#allocation2 + $0x6c8] ss:$16 sps:$4 sm:$0xff]  }
  0xe7   :  { %2409 = vmatpush1.bf16.msra.mxu1 %v5158_v56  ;;  %2297 = vmatprep.subr.bf16.mxu0 %v5163_v57  ;;  %v5495_v55 = vld [vmem:[%s7112_s0 + $0x3c] ss:$28 sps:$4 sm:$0xff]  }
  0xe8   :  { %2410 = vmatprep.subr.bf16.mxu1 %v5166_v58  ;;  %2129 = vmatprep.mubr.bf16.mxu0 %v5895_v59  ;;  %v5242_v56 = vld [vmem:[#allocation2 + $0x4ac] ss:$16 sps:$4 sm:$0xff]   ;;  %v5496_v58 = vld [vmem:[%s7112_s0 + $0x44] ss:$28 sps:$4 sm:$0xff]  }
  0xe9   :  { %2242 = vmatprep.mubr.bf16.mxu1 %v5674_v18  ;;  %v5254_v57 = vld [vmem:[#allocation2 + $0x6ac] ss:$16 sps:$4 sm:$0xff]  }
  0xea   :  { %2298 = vmatpush1.bf16.msra.mxu0 %v5161_v60  ;;  %v5240_v60 = vld [vmem:[#allocation2 + $0x4a8] ss:$16 sps:$4 sm:$0xff]  }
  0xeb   :  { %2411 = vmatpush1.bf16.msra.mxu1 %v5164_v61  ;;  %2299 = vmatprep.subr.bf16.mxu0 %v5173_v62  ;;  %v5248_v61 = vld [vmem:[#allocation2 + $0x48c] ss:$16 sps:$4 sm:$0xff]   ;;  %v5252_v62 = vld [vmem:[#allocation2 + $0x6a8] ss:$16 sps:$4 sm:$0xff]  }
  0xec   :  { %2412 = vmatprep.subr.bf16.mxu1 %v5176_v63  ;;  %v5497_v63 = vld [vmem:[%s7112_s0 + $0x38] ss:$28 sps:$4 sm:$0xff]  }
  0xed   :  { %2130 = vmatmul.mubr.bf16.gmra.mxu0 %v5169_v0  ;;  %v5498_v0 = vld [vmem:[%s7112_s0 + $0x40] ss:$28 sps:$4 sm:$0xff]  }
  0xee   :  { %2243 = vmatmul.mubr.bf16.gmra.mxu1 %v5170_v1  ;;  %2300 = vmatpush2.bf16.msra.mxu0 %v5171_v2  ;;  %v5263_v1 = vld [vmem:[#allocation2 + $0x68c] ss:$16 sps:$4 sm:$0xff]   ;;  %v5246_v2 = vld [vmem:[#allocation2 + $0x488] ss:$16 sps:$4 sm:$0xff]  }
  0xef   :  { %2413 = vmatpush2.bf16.msra.mxu1 %v5174_v3  ;;  %2301 = vmatprep.subr.bf16.mxu0 %v5179_v4  ;;  %v5499_v3 = vld [vmem:[%s7112_s0 + $0x74] ss:$28 sps:$4 sm:$0xff]   ;;  %v5500_v4 = vld [vmem:[%s7112_s0 + $0x7c] ss:$28 sps:$4 sm:$0xff]  }
  0xf0   :  { %2414 = vmatprep.subr.bf16.mxu1 %v5182_v5  ;;  %2139 = vmatprep.mubr.bf16.mxu0 %v5908_v6  ;;  %v5251_v5 = vld [vmem:[#allocation2 + $0x46c] ss:$16 sps:$4 sm:$0xff]  }
  0xf1   :  { %2252 = vmatprep.mubr.bf16.mxu1 %v5674_v18 }
  0xf2   :  { %2302 = vmatpush2.bf16.msra.mxu0 %v5177_v7  ;;  %v5261_v7 = vld [vmem:[#allocation2 + $0x688] ss:$16 sps:$4 sm:$0xff]  }
  0xf3   :  { %2415 = vmatpush2.bf16.msra.mxu1 %v5180_v8  ;;  %2303 = vmatprep.subr.bf16.mxu0 %v5189_v9  ;;  %v5249_v8 = vld [vmem:[#allocation2 + $0x468] ss:$16 sps:$4 sm:$0xff]   ;;  %v5257_v9 = vld [vmem:[#allocation2 + $0x44c] ss:$16 sps:$4 sm:$0xff]  }
  0xf4   :  { %2416 = vmatprep.subr.bf16.mxu1 %v5192_v10  ;;  %v5270_v10 = vld [vmem:[#allocation2 + $0x668] ss:$16 sps:$4 sm:$0xff]  }
  0xf5   :  { %2140 = vmatmul.mubr.bf16.gmra.mxu0 %v5915_v11 }
  0xf6   :  { %2253 = vmatmul.mubr.bf16.gmra.mxu1 %v5920_v12  ;;  %2304 = vmatpush2.bf16.msra.mxu0 %v5187_v13  ;;  %v5255_v13 = vld [vmem:[#allocation2 + $0x448] ss:$16 sps:$4 sm:$0xff]  }
  0xf7   :  { %2417 = vmatpush2.bf16.msra.mxu1 %v5190_v14  ;;  %2305 = vmatprep.subr.bf16.mxu0 %v5195_v15  ;;  %v5272_v14 = vld [vmem:[#allocation2 + $0x66c] ss:$16 sps:$4 sm:$0xff]  }
  0xf8   :  { %2418 = vmatprep.subr.bf16.mxu1 %v5198_v16  ;;  %2149 = vmatprep.mubr.bf16.mxu0 %v5925_v17  ;;  %v5281_v15 = vld [vmem:[#allocation2 + $0x64c] ss:$16 sps:$4 sm:$0xff]  }
  0xf9   :  { %2262 = vmatprep.mubr.bf16.mxu1 %v5674_v18  ;;  %v5501_v16 = vld [vmem:[%s7112_s0 + $0x70] ss:$28 sps:$4 sm:$0xff]  }
  0xfa   :  { %2306 = vmatpush2.bf16.msra.mxu0 %v5193_v19  ;;  %v5502_v19 = vld [vmem:[%s7112_s0 + $0x78] ss:$28 sps:$4 sm:$0xff]  }
  0xfb   :  { %2419 = vmatpush2.bf16.msra.mxu1 %v5196_v20  ;;  %2307 = vmatprep.subr.bf16.mxu0 %v5205_v21  ;;  %v5260_v20 = vld [vmem:[#allocation2 + $0x42c] ss:$16 sps:$4 sm:$0xff]  }
  0xfc   :  { %2420 = vmatprep.subr.bf16.mxu1 %v5208_v22  ;;  %v5503_v21 = vld [vmem:[%s7112_s0 + $0xac] ss:$28 sps:$4 sm:$0xff]   ;;  %v5504_v22 = vld [vmem:[%s7112_s0 + $0xb4] ss:$28 sps:$4 sm:$0xff]  }
  0xfd   :  { %2150 = vmatmul.mubr.bf16.gmra.mxu0 %v5934_v23 }
  0xfe   :  { %2263 = vmatmul.mubr.bf16.gmra.mxu1 %v5939_v24  ;;  %2308 = vmatpush2.bf16.msra.mxu0 %v5203_v25  ;;  %v5258_v25 = vld [vmem:[#allocation2 + $0x428] ss:$16 sps:$4 sm:$0xff]  }
  0xff   :  { %2421 = vmatpush2.bf16.msra.mxu1 %v5206_v26  ;;  %2309 = vmatprep.subr.bf16.mxu0 %v5211_v27  ;;  %v5266_v26 = vld [vmem:[#allocation2 + $0x40c] ss:$16 sps:$4 sm:$0xff]   ;;  %v5279_v27 = vld [vmem:[#allocation2 + $0x648] ss:$16 sps:$4 sm:$0xff]  }
 0x100   :  { %2422 = vmatprep.subr.bf16.mxu1 %v5214_v28  ;;  %2159 = vmatprep.mubr.bf16.mxu0 %v5944_v29  ;;  %v5290_v28 = vld [vmem:[#allocation2 + $0x62c] ss:$16 sps:$4 sm:$0xff]  }
 0x101   :  { %2272 = vmatprep.mubr.bf16.mxu1 %v5674_v18 }
 0x102   :  { %2310 = vmatpush2.bf16.msra.mxu0 %v5209_v30  ;;  %v5264_v30 = vld [vmem:[#allocation2 + $0x408] ss:$16 sps:$4 sm:$0xff]  }
 0x103   :  { %2423 = vmatpush2.bf16.msra.mxu1 %v5212_v31  ;;  %2311 = vmatprep.subr.bf16.mxu0 %v5221_v32  ;;  %v5505_v31 = vld [vmem:[%s7112_s0 + $0xa8] ss:$28 sps:$4 sm:$0xff]   ;;  %v5506_v32 = vld [vmem:[%s7112_s0 + $0xb0] ss:$28 sps:$4 sm:$0xff]  }
 0x104   :  { %2424 = vmatprep.subr.bf16.mxu1 %v5224_v33  ;;  %v5269_v33 = vld [vmem:[#allocation2 + $0x5ec] ss:$16 sps:$4 sm:$0xff]  }
 0x105   :  { %2160 = vmatmul.mubr.bf16.gmra.mxu0 %v5953_v34 }
 0x106   :  { %2273 = vmatmul.mubr.bf16.gmra.mxu1 %v5958_v35  ;;  %2312 = vmatpush2.bf16.msra.mxu0 %v5219_v36  ;;  %v5507_v36 = vld [vmem:[%s7112_s0 + $0xe4] ss:$28 sps:$4 sm:$0xff]  }
 0x107   :  { %2425 = vmatpush2.bf16.msra.mxu1 %v5222_v37  ;;  %2313 = vmatprep.subr.bf16.mxu0 %v5227_v38  ;;  %v5288_v37 = vld [vmem:[#allocation2 + $0x628] ss:$16 sps:$4 sm:$0xff]  }
 0x108   :  { %2426 = vmatprep.subr.bf16.mxu1 %v5230_v39  ;;  %2315 = vmatprep.mubr.bf16.mxu0 %v5491_v44  ;;  %v5508_v38 = vld [vmem:[%s7112_s0 + $0xec] ss:$28 sps:$4 sm:$0xff]   ;;  %v5509_v44 = vld [vmem:[%s7112_s0 + $0xe0] ss:$28 sps:$4 sm:$0xff]  }
 0x109   :  { %2428 = vmatprep.mubr.bf16.mxu1 %v5492_v45  ;;  %v5267_v39 = vld [vmem:[#allocation2 + $0x5e8] ss:$16 sps:$4 sm:$0xff]  }
 0x10a   :  { %2314 = vmatpush2.bf16.msra.mxu0 %v5225_v40  ;;  %v5275_v40 = vld [vmem:[#allocation2 + $0x5cc] ss:$16 sps:$4 sm:$0xff]   ;;  %v5510_v45 = vld [vmem:[%s7112_s0 + $0xe8] ss:$28 sps:$4 sm:$0xff]  }
 0x10b   :  { %2427 = vmatpush2.bf16.msra.mxu1 %v5228_v41  ;;  %2509 = vmatprep.subr.bf16.mxu0 %v5233_v42  ;;  %v5299_v41 = vld [vmem:[#allocation2 + $0x60c] ss:$16 sps:$4 sm:$0xff]   ;;  %v5297_v42 = vld [vmem:[#allocation2 + $0x608] ss:$16 sps:$4 sm:$0xff]  }
 0x10c   :  { %2622 = vmatprep.subr.bf16.mxu1 %v5236_v43  ;;  %v5273_v43 = vld [vmem:[#allocation2 + $0x5c8] ss:$16 sps:$4 sm:$0xff]  }
 0x10d   :  { %2316 = vmatmul.mubr.bf16.vlgmr.msra.gmra.mxu0 %v5493_v51  ;;  %v5284_v51 = vld [vmem:[#allocation2 + $0x58c] ss:$16 sps:$4 sm:$0xff]  }
 0x10e   :  { %2429 = vmatmul.mubr.bf16.vlgmr.msra.gmra.mxu1 %v5494_v52  ;;  %2510 = vmatpush1.bf16.msra.mxu0 %v5231_v46  ;;  %v5278_v46 = vld [vmem:[#allocation2 + $0x5ac] ss:$16 sps:$4 sm:$0xff]   ;;  %v5282_v52 = vld [vmem:[#allocation2 + $0x588] ss:$16 sps:$4 sm:$0xff]  }
 0x10f   :  { %2623 = vmatpush1.bf16.msra.mxu1 %v5234_v47  ;;  %2511 = vmatprep.subr.bf16.mxu0 %v5239_v49  ;;  %v5511_v47 = vld [vmem:[%s7112_s0 + $0x11c] ss:$28 sps:$4 sm:$0xff]   ;;  %v5512_v49 = vld [vmem:[%s7112_s0 + $0x124] ss:$28 sps:$4 sm:$0xff]  }
 0x110   :  { %2325 = vmatprep.mubr.bf16.mxu0 %v5495_v55  ;;  %2438 = vmatprep.mubr.bf16.mxu1 %v5496_v58  ;;  %v5287_v55 = vld [vmem:[#allocation2 + $0x56c] ss:$16 sps:$4 sm:$0xff]   ;;  %v5285_v58 = vld [vmem:[#allocation2 + $0x568] ss:$16 sps:$4 sm:$0xff]  }
 0x111   :  { %2624 = vmatprep.subr.bf16.mxu1 %v5245_v50  ;;  %v5276_v50 = vld [vmem:[#allocation2 + $0x5a8] ss:$16 sps:$4 sm:$0xff]  }
 0x112   :  { %2512 = vmatpush1.bf16.msra.mxu0 %v5237_v53  ;;  %v5513_v53 = vld [vmem:[%s7112_s0 + $0x118] ss:$28 sps:$4 sm:$0xff]  }
 0x113   :  { %2625 = vmatpush1.bf16.msra.mxu1 %v5243_v54  ;;  %2513 = vmatprep.subr.bf16.mxu0 %v5242_v56  ;;  %v5514_v54 = vld [vmem:[%s7112_s0 + $0x120] ss:$28 sps:$4 sm:$0xff]   ;;  %v5515_v56 = vld [vmem:[%s7112_s0 + $0x154] ss:$28 sps:$4 sm:$0xff]  }
 0x114   :  { %2626 = vmatprep.subr.bf16.mxu1 %v5254_v57  ;;  %v5516_v57 = vld [vmem:[%s7112_s0 + $0x15c] ss:$28 sps:$4 sm:$0xff]  }
 0x115   :  { %2326 = vmatmul.mubr.bf16.gmra.mxu0 %v5497_v63  ;;  %v5291_v63 = vld [vmem:[#allocation2 + $0x548] ss:$16 sps:$4 sm:$0xff]  }
 0x116   :  { %2439 = vmatmul.mubr.bf16.gmra.mxu1 %v5498_v0  ;;  %2514 = vmatpush1.bf16.msra.mxu0 %v5240_v60  ;;  %v5293_v60 = vld [vmem:[#allocation2 + $0x54c] ss:$16 sps:$4 sm:$0xff]  }
 0x117   :  { %2335 = vmatprep.mubr.bf16.mxu0 %v5499_v3  ;;  %2515 = vmatprep.subr.bf16.mxu0 %v5248_v61  ;;  %v5517_v61 = vld [vmem:[%s7112_s0 + $0x150] ss:$28 sps:$4 sm:$0xff]  }
 0x118   :  { %2448 = vmatprep.mubr.bf16.mxu1 %v5500_v4  ;;  %2627 = vmatpush1.bf16.msra.mxu1 %v5252_v62  ;;  %v5518_v62 = vld [vmem:[%s7112_s0 + $0x158] ss:$28 sps:$4 sm:$0xff]   ;;  %v5519_v0 = vld [vmem:[%s7112_s0 + $0x18c] ss:$28 sps:$4 sm:$0xff]  }
 0x119   :  { %2628 = vmatprep.subr.bf16.mxu1 %v5263_v1  ;;  %v7124_v1 = vlaneseq  ;;  %v5296_v3 = vld [vmem:[#allocation2 + $0x52c] ss:$16 sps:$4 sm:$0xff]   ;;  %v5294_v4 = vld [vmem:[#allocation2 + $0x528] ss:$16 sps:$4 sm:$0xff]  }
 0x11a   :  { %2516 = vmatpush1.bf16.msra.mxu0 %v5246_v2  ;;  %v5520_v2 = vld [vmem:[%s7112_s0 + $0x194] ss:$28 sps:$4 sm:$0xff]  }
 0x11b   :  { %2517 = vmatprep.subr.bf16.mxu0 %v5251_v5  ;;  %v6053_v5 = vshrl.u32 %v7124_v1, 7 }
 0x11c   :  { %2629 = vmatpush1.bf16.msra.mxu1 %v5261_v7  ;;  %v5302_v7 = vld [vmem:[#allocation2 + $0x50c] ss:$16 sps:$4 sm:$0xff]  }
 0x11d   :  { %2336 = vmatmul.mubr.bf16.gmra.mxu0 %v5501_v16  ;;  %2630 = vmatprep.subr.bf16.mxu1 %v5272_v14  ;;  %7132 = vst [vmem:[#allocation16_spill] sm:$0xff] %v6053_v5  ;;  %v7125_v14 = vsub.s32 0, %v6053_v5  ;;  %v5305_v16 = vld [vmem:[%s7115_s3 + $0x74] ss:$8 sps:$4 sm:$0xff]  }
 0x11e   :  { %2449 = vmatmul.mubr.bf16.gmra.mxu1 %v5502_v19  ;;  %2518 = vmatpush1.bf16.msra.mxu0 %v5249_v8  ;;  %v5521_v8 = vld [vmem:[%s7112_s0 + $0x188] ss:$28 sps:$4 sm:$0xff]   ;;  %v7126_v19 = vsub.s32 1, %v6053_v5 }
 0x11f   :  { %2345 = vmatprep.mubr.bf16.mxu0 %v5503_v21  ;;  %2519 = vmatprep.subr.bf16.mxu0 %v5257_v9  ;;  %v5522_v9 = vld [vmem:[%s7112_s0 + $0x190] ss:$28 sps:$4 sm:$0xff]  }
 0x120   :  { %2458 = vmatprep.mubr.bf16.mxu1 %v5504_v22  ;;  %2631 = vmatpush1.bf16.msra.mxu1 %v5270_v10  ;;  %v5300_v10 = vld [vmem:[#allocation2 + $0x508] ss:$16 sps:$4 sm:$0xff]  }
 0x121   :  { %2632 = vmatprep.subr.bf16.mxu1 %v5281_v15  ;;  %v6066_v15 = vld [vmem:[#allocation4] sm:$0xf]  ;;  %v5303_v21 = vld [vmem:[%s7115_s3 + $0x70] ss:$8 sps:$4 sm:$0xff]  }
 0x122   :  { %2520 = vmatpush1.bf16.msra.mxu0 %v5255_v13  ;;  %v5523_v13 = vld [vmem:[%s7112_s0 + $0x14] ss:$28 sps:$4 sm:$0xff]   ;;  %7133 = vst [vmem:[#allocation17_spill] sm:$0xff] %v6066_v15  ;;  %v6083_v22 = vrot.slane %v6066_v15, %v7126_v19 }
 0x123   :  { %2521 = vmatprep.subr.bf16.mxu0 %v5260_v20  ;;  %v6075_v20 = vrot.slane %v6066_v15, %v7125_v14 }
 0x124   :  { %2633 = vmatpush1.bf16.msra.mxu1 %v5279_v27 }
 0x125   :  { %2346 = vmatmul.mubr.bf16.gmra.mxu0 %v5505_v31  ;;  %2634 = vmatprep.subr.bf16.mxu1 %v5290_v28  ;;  %v5524_v28 = vld [vmem:[%s7112_s0 + $0x10] ss:$28 sps:$4 sm:$0xff]  }
 0x126   :  { %2459 = vmatmul.mubr.bf16.gmra.mxu1 %v5506_v32  ;;  %2522 = vmatpush1.bf16.msra.mxu0 %v5258_v25  ;;  %v5308_v25 = vld [vmem:[%s7115_s3 + $0x64] ss:$8 sps:$4 sm:$0xff]  }
 0x127   :  { %2355 = vmatprep.mubr.bf16.mxu0 %v5507_v36  ;;  %2523 = vmatprep.subr.bf16.mxu0 %v5266_v26  ;;  %v5526_v32 = vld [vmem:[%s7112_s0 + $0x4c] ss:$28 sps:$4 sm:$0xff]  }
 0x128   :  { %2468 = vmatprep.mubr.bf16.mxu1 %v5508_v38  ;;  %2635 = vmatpush1.bf16.msra.mxu1 %v5288_v37  ;;  %v5306_v37 = vld [vmem:[%s7115_s3 + $0x60] ss:$8 sps:$4 sm:$0xff]  }
 0x129   :  { %2636 = vmatprep.subr.bf16.mxu1 %v5299_v41 }
 0x12a   :  { %2524 = vmatpush1.bf16.msra.mxu0 %v5264_v30  ;;  %v5525_v30 = vld [vmem:[%s7112_s0 + $0x18] ss:$28 sps:$4 sm:$0xff]  }
 0x12b   :  { %2525 = vmatprep.subr.bf16.mxu0 %v5269_v33 }
 0x12c   :  { %2637 = vmatpush1.bf16.msra.mxu1 %v5297_v42 }
 0x12d   :  { %2356 = vmatmul.mubr.bf16.gmra.mxu0 %v5509_v44 }
 0x12e   :  { %2469 = vmatmul.mubr.bf16.gmra.mxu1 %v5510_v45  ;;  %2526 = vmatpush2.bf16.msra.mxu0 %v5267_v39 }
 0x12f   :  { %2365 = vmatprep.mubr.bf16.mxu0 %v5511_v47  ;;  %2527 = vmatprep.subr.bf16.mxu0 %v5275_v40  ;;  %v5311_v40 = vld [vmem:[%s7115_s3 + $0x54] ss:$8 sps:$4 sm:$0xff]   ;;  %v5314_v47 = vld [vmem:[%s7115_s3 + $0x44] ss:$8 sps:$4 sm:$0xff]  }
 0x130   :  { %2478 = vmatprep.mubr.bf16.mxu1 %v5512_v49 }
 0x132   :  { %2528 = vmatpush2.bf16.msra.mxu0 %v5273_v43 }
 0x133   :  { %2529 = vmatprep.subr.bf16.mxu0 %v5278_v46  ;;  %v5309_v46 = vld [vmem:[%s7115_s3 + $0x50] ss:$8 sps:$4 sm:$0xff]  }
 0x135   :  { %2366 = vmatmul.mubr.bf16.gmra.mxu0 %v5513_v53 }
 0x136   :  { %2479 = vmatmul.mubr.bf16.gmra.mxu1 %v5514_v54  ;;  %2530 = vmatpush2.bf16.msra.mxu0 %v5276_v50  ;;  %v5529_v54 = vld [vmem:[%s7112_s0 + $0x84] ss:$28 sps:$4 sm:$0xff]  }
 0x137   :  { %2375 = vmatprep.mubr.bf16.mxu0 %v5515_v56  ;;  %2531 = vmatprep.subr.bf16.mxu0 %v5284_v51  ;;  %v5527_v51 = vld [vmem:[%s7112_s0 + $0x48] ss:$28 sps:$4 sm:$0xff]  }
 0x138   :  { %2488 = vmatprep.mubr.bf16.mxu1 %v5516_v57  ;;  %v5312_v57 = vld [vmem:[%s7115_s3 + $0x40] ss:$8 sps:$4 sm:$0xff]  }
 0x13a   :  { %2532 = vmatpush2.bf16.msra.mxu0 %v5282_v52  ;;  %v5528_v52 = vld [vmem:[%s7112_s0 + $0x50] ss:$28 sps:$4 sm:$0xff]  }
 0x13b   :  { %2533 = vmatprep.subr.bf16.mxu0 %v5287_v55 }
 0x13d   :  { %2376 = vmatmul.mubr.bf16.gmra.mxu0 %v5517_v61  ;;  %v5317_v61 = vld [vmem:[%s7115_s3 + $0x34] ss:$8 sps:$4 sm:$0xff]  }
 0x13e   :  { %2489 = vmatmul.mubr.bf16.gmra.mxu1 %v5518_v62  ;;  %2534 = vmatpush2.bf16.msra.mxu0 %v5285_v58 }
 0x13f   :  { %2385 = vmatprep.mubr.bf16.mxu0 %v5519_v0  ;;  %2535 = vmatprep.subr.bf16.mxu0 %v5293_v60 }
 0x140   :  { %2498 = vmatprep.mubr.bf16.mxu1 %v5520_v2 }
 0x142   :  { %2536 = vmatpush2.bf16.msra.mxu0 %v5291_v63 }
 0x143   :  { %2537 = vmatprep.subr.bf16.mxu0 %v5296_v3 }
 0x145   :  { %2386 = vmatmul.mubr.bf16.gmra.mxu0 %v5521_v8  ;;  %v5320_v8 = vld [vmem:[%s7115_s3 + $0x24] ss:$8 sps:$4 sm:$0xff]  }
 0x146   :  { %2499 = vmatmul.mubr.bf16.gmra.mxu1 %v5522_v9  ;;  %2538 = vmatpush2.bf16.msra.mxu0 %v5294_v4  ;;  %v5315_v4 = vld [vmem:[%s7115_s3 + $0x30] ss:$8 sps:$4 sm:$0xff]  }
 0x147   :  { %2541 = vmatprep.mubr.bf16.mxu0 %v5523_v13  ;;  %2539 = vmatprep.subr.bf16.mxu0 %v5302_v7  ;;  %v5353_v7 = vld [vmem:[%s7115_s3 + $0x174] ss:$8 sps:$4 sm:$0xff]   ;;  %v5351_v9 = vld [vmem:[%s7115_s3 + $0x170] ss:$8 sps:$4 sm:$0xff]  }
 0x148   :  { %2654 = vmatprep.mubr.bf16.mxu1 %v5674_v18  ;;  %3340 = vmatprep.subr.bf16.mxu1 %v5353_v7 }
 0x14a   :  { %2540 = vmatpush2.bf16.msra.mxu0 %v5300_v10 }
 0x14b   :  { %3227 = vmatprep.subr.bf16.mxu0 %v5305_v16  ;;  %v5530_v16 = vld [vmem:[%s7112_s0 + $0x80] ss:$28 sps:$4 sm:$0xff]  }
 0x14d   :  { %v1865_v26 = vpop.f32.mrf.mxu0  ;;  %2542 = vmatmul.mubr.bf16.vlgmr.msra.gmra.mxu0 %v5524_v28  ;;  %v5318_v28 = vld [vmem:[%s7115_s3 + $0x20] ss:$8 sps:$4 sm:$0xff]  }
 0x14e   :  { %v1978_v27 = vpop.f32.mrf.mxu1  ;;  %2655 = vmatmul.mubr.bf16.vlgmr.msra.gmra.mxu1 %v5525_v30  ;;  %v1866_v31 = vadd.f32 %v1865_v26, %v6075_v20  ;;  %2551 = vmatprep.mubr.bf16.mxu0 %v5526_v32  ;;  %v5356_v30 = vld [vmem:[%s7115_s3 + $0x164] ss:$8 sps:$4 sm:$0xff]  }
 0x14f   :  { %2664 = vmatprep.mubr.bf16.mxu1 %v5674_v18  ;;  %v1867_v33 = vpop.f32.mrf.mxu0  ;;  %3228 = vmatpush1.bf16.msra.mxu0 %v5303_v21  ;;  %v5531_v21 = vld [vmem:[%s7112_s0 + $0x88] ss:$28 sps:$4 sm:$0xff]  }
 0x150   :  { %v1980_v36 = vpop.f32.mrf.mxu1  ;;  %v6102_v38 = vadd.f32 %v1978_v27, %v1866_v31  ;;  %v1868_v39 = vadd.f32 %v1867_v33, %v6083_v22  ;;  %3229 = vmatprep.subr.bf16.mxu0 %v5308_v25  ;;  %3341 = vmatpush1.bf16.msra.mxu1 %v5351_v9  ;;  %v5354_v33 = vld [vmem:[%s7115_s3 + $0x160] ss:$8 sps:$4 sm:$0xff]  }
 0x151   :  { %v6108_v41 = vpop.f32.mrf.mxu0  ;;  %3342 = vmatprep.subr.bf16.mxu1 %v5356_v30  ;;  %v5360_v9 = vld [vmem:[%s7115_s3 + $0x140] ss:$8 sps:$4 sm:$0xff]   ;;  %v5363_v30 = vld [vmem:[%s7115_s3 + $0x130] ss:$8 sps:$4 sm:$0xff]  }
 0x152   :  { %v6110_v42 = vpop.f32.mrf.mxu1  ;;  %v6112_v43 = vadd.f32 %v1980_v36, %v1868_v39 }
 0x153   :  { %v6114_v44 = vpop.f32.mrf.mxu0  ;;  %3230 = vmatpush1.bf16.msra.mxu0 %v5306_v37 }
 0x154   :  { %v6116_v45 = vpop.f32.mrf.mxu1  ;;  %3231 = vmatprep.subr.bf16.mxu0 %v5311_v40  ;;  %3343 = vmatpush1.bf16.msra.mxu1 %v5354_v33  ;;  %v5534_v33 = vld [vmem:[%s7112_s0 + $0xf0] ss:$28 sps:$4 sm:$0xff]  }
 0x155   :  { %v1875_v49 = vpop.f32.mrf.mxu0  ;;  %2552 = vmatmul.mubr.bf16.gmra.mxu0 %v5527_v51  ;;  %v5357_v51 = vld [vmem:[%s7115_s3 + $0x150] ss:$8 sps:$4 sm:$0xff]  }
 0x156   :  { %v1988_v50 = vpop.f32.mrf.mxu1  ;;  %2665 = vmatmul.mubr.bf16.gmra.mxu1 %v5528_v52  ;;  %v1876_v53 = vadd.f32 %v1875_v49, %v6075_v20  ;;  %2561 = vmatprep.mubr.bf16.mxu0 %v5529_v54  ;;  %v5359_v49 = vld [vmem:[%s7115_s3 + $0x154] ss:$8 sps:$4 sm:$0xff]  }
 0x157   :  { %2674 = vmatprep.mubr.bf16.mxu1 %v5674_v18  ;;  %v1877_v55 = vpop.f32.mrf.mxu0  ;;  %3232 = vmatpush1.bf16.msra.mxu0 %v5309_v46  ;;  %v5532_v54 = vld [vmem:[%s7112_s0 + $0xb8] ss:$28 sps:$4 sm:$0xff]  }
 0x158   :  { %v1990_v56 = vpop.f32.mrf.mxu1  ;;  %v6138_v58 = vadd.f32 %v1988_v50, %v1876_v53  ;;  %v1878_v60 = vadd.f32 %v1877_v55, %v6083_v22  ;;  %3233 = vmatprep.subr.bf16.mxu0 %v5314_v47  ;;  %v5321_v47 = vld [vmem:[%s7115_s3 + $0x10] ss:$8 sps:$4 sm:$0xff]   ;;  %v5326_v50 = vld [vmem:[%s7115_s3 + $0x4] ss:$8 sps:$4 sm:$0xff]   ;;  %v5533_v55 = vld [vmem:[%s7112_s0 + $0xc0] ss:$28 sps:$4 sm:$0xff]   ;;  %3344 = vmatprep.subr.bf16.mxu1 %v5359_v49 }
 0x159   :  { %v6144_v62 = vpop.f32.mrf.mxu0  ;;  %3345 = vmatpush1.bf16.msra.mxu1 %v5357_v51 }
 0x15a   :  { %v6146_v63 = vpop.f32.mrf.mxu1  ;;  %v6148_v0 = vadd.f32 %v1990_v56, %v1878_v60 }
 0x15b   :  { %v6150_v2 = vpop.f32.mrf.mxu0  ;;  %3234 = vmatpush1.bf16.msra.mxu0 %v5312_v57 }
 0x15c   :  { %v6152_v3 = vpop.f32.mrf.mxu1  ;;  %3235 = vmatprep.subr.bf16.mxu0 %v5317_v61  ;;  %v5324_v61 = vld [vmem:[%s7115_s3] ss:$8 sps:$4 sm:$0xff]  }
 0x15d   :  { %v1885_v10 = vpop.f32.mrf.mxu0  ;;  %2562 = vmatmul.mubr.bf16.gmra.mxu0 %v5530_v16 }
 0x15e   :  { %v1998_v13 = vpop.f32.mrf.mxu1  ;;  %2675 = vmatmul.mubr.bf16.gmra.mxu1 %v5531_v21  ;;  %v1886_v25 = vadd.f32 %v1885_v10, %v6075_v20  ;;  %2571 = vmatprep.mubr.bf16.mxu0 %v5882_v48  ;;  %v5323_v48 = vld [vmem:[%s7115_s3 + $0x14] ss:$8 sps:$4 sm:$0xff]  }
 0x15f   :  { %2684 = vmatprep.mubr.bf16.mxu1 %v5674_v18  ;;  %v1887_v26 = vpop.f32.mrf.mxu0  ;;  %3236 = vmatpush1.bf16.msra.mxu0 %v5315_v4  ;;  %v5362_v4 = vld [vmem:[%s7115_s3 + $0x144] ss:$8 sps:$4 sm:$0xff]  }
 0x160   :  { %v2000_v27 = vpop.f32.mrf.mxu1  ;;  %v6181_v31 = vadd.f32 %v1998_v13, %v1886_v25  ;;  %v1888_v32 = vadd.f32 %v1887_v26, %v6083_v22  ;;  %3237 = vmatprep.subr.bf16.mxu0 %v5320_v8  ;;  %3346 = vmatprep.subr.bf16.mxu1 %v5362_v4  ;;  %v5327_v26 = vld [vmem:[%s7115_s3 + $0xf0] ss:$8 sps:$4 sm:$0xff]  }
 0x161   :  { %v6190_v36 = vpop.f32.mrf.mxu0  ;;  %3347 = vmatpush1.bf16.msra.mxu1 %v5360_v9  ;;  %v5371_v9 = vld [vmem:[%s7115_s3 + $0x114] ss:$8 sps:$4 sm:$0xff]  }
 0x162   :  { %v6192_v37 = vpop.f32.mrf.mxu1  ;;  %v6194_v39 = vadd.f32 %v2000_v27, %v1888_v32  ;;  %v5365_v27 = vld [vmem:[%s7115_s3 + $0x134] ss:$8 sps:$4 sm:$0xff]  }
 0x163   :  { %v6196_v40 = vpop.f32.mrf.mxu0  ;;  %3238 = vmatpush1.bf16.msra.mxu0 %v5318_v28  ;;  %v5332_v28 = vld [vmem:[%s7115_s3 + $0xe4] ss:$8 sps:$4 sm:$0xff]   ;;  %3348 = vmatprep.subr.bf16.mxu1 %v5365_v27  ;;  %v5369_v27 = vld [vmem:[%s7115_s3 + $0x110] ss:$8 sps:$4 sm:$0xff]  }
 0x164   :  { %v6198_v46 = vpop.f32.mrf.mxu1  ;;  %3239 = vmatprep.subr.bf16.mxu0 %v5323_v48 }
 0x165   :  { %v1895_v52 = vpop.f32.mrf.mxu0  ;;  %2572 = vmatmul.mubr.bf16.gmra.mxu0 %v5532_v54  ;;  %3349 = vmatpush1.bf16.msra.mxu1 %v5363_v30 }
 0x166   :  { %v2008_v53 = vpop.f32.mrf.mxu1  ;;  %2685 = vmatmul.mubr.bf16.gmra.mxu1 %v5533_v55  ;;  %v1896_v56 = vadd.f32 %v1895_v52, %v6075_v20  ;;  %2581 = vmatprep.mubr.bf16.mxu0 %v5895_v59  ;;  %v5329_v59 = vld [vmem:[%s7115_s3 + $0xf4] ss:$8 sps:$4 sm:$0xff]   ;;  %v5330_v52 = vld [vmem:[%s7115_s3 + $0xe0] ss:$8 sps:$4 sm:$0xff]  }
 0x167   :  { %2694 = vmatprep.mubr.bf16.mxu1 %v5674_v18  ;;  %v1897_v57 = vpop.f32.mrf.mxu0  ;;  %3240 = vmatpush1.bf16.msra.mxu0 %v5321_v47  ;;  %v5535_v47 = vld [vmem:[%s7112_s0 + $0xf8] ss:$28 sps:$4 sm:$0xff]  }
 0x168   :  { %v2010_v60 = vpop.f32.mrf.mxu1  ;;  %v6227_v7 = vadd.f32 %v2008_v53, %v1896_v56  ;;  %v1898_v8 = vadd.f32 %v1897_v57, %v6083_v22  ;;  %3241 = vmatprep.subr.bf16.mxu0 %v5326_v50  ;;  %v5368_v53 = vld [vmem:[%s7115_s3 + $0x124] ss:$8 sps:$4 sm:$0xff]   ;;  %v5366_v56 = vld [vmem:[%s7115_s3 + $0x120] ss:$8 sps:$4 sm:$0xff]  }
 0x169   :  { %v6236_v10 = vpop.f32.mrf.mxu0  ;;  %3350 = vmatprep.subr.bf16.mxu1 %v5368_v53 }
 0x16a   :  { %v6238_v13 = vpop.f32.mrf.mxu1  ;;  %v6240_v16 = vadd.f32 %v2010_v60, %v1898_v8  ;;  %3351 = vmatpush1.bf16.msra.mxu1 %v5366_v56  ;;  %v5339_v56 = vld [vmem:[%s7115_s3 + $0xb0] ss:$8 sps:$4 sm:$0xff]  }
 0x16b   :  { %v6242_v21 = vpop.f32.mrf.mxu0  ;;  %3242 = vmatpush1.bf16.msra.mxu0 %v5324_v61  ;;  %3352 = vmatprep.subr.bf16.mxu1 %v5371_v9  ;;  %v5344_v9 = vld [vmem:[%s7115_s3 + $0xa4] ss:$8 sps:$4 sm:$0xff]  }
 0x16c   :  { %v6244_v25 = vpop.f32.mrf.mxu1  ;;  %3243 = vmatprep.subr.bf16.mxu0 %v5329_v59  ;;  %v5333_v59 = vld [vmem:[%s7115_s3 + $0xd0] ss:$8 sps:$4 sm:$0xff]  }
 0x16d   :  { %v1905_v32 = vpop.f32.mrf.mxu0  ;;  %2582 = vmatmul.mubr.bf16.gmra.mxu0 %v5534_v33 }
 0x16e   :  { %v2018_v48 = vpop.f32.mrf.mxu1  ;;  %2695 = vmatmul.mubr.bf16.gmra.mxu1 %v5535_v47  ;;  %v1906_v49 = vadd.f32 %v1905_v32, %v6075_v20  ;;  %2591 = vmatprep.mubr.bf16.mxu0 %v5908_v6  ;;  %v5335_v6 = vld [vmem:[%s7115_s3 + $0xd4] ss:$8 sps:$4 sm:$0xff]   ;;  %v5336_v47 = vld [vmem:[%s7115_s3 + $0xc0] ss:$8 sps:$4 sm:$0xff]  }
 0x16f   :  { %2704 = vmatprep.mubr.bf16.mxu1 %v5674_v18  ;;  %v1907_v50 = vpop.f32.mrf.mxu0  ;;  %3244 = vmatpush2.bf16.msra.mxu0 %v5327_v26  ;;  %v5338_v26 = vld [vmem:[%s7115_s3 + $0xc4] ss:$8 sps:$4 sm:$0xff]  }
 0x170   :  { %v2020_v51 = vpop.f32.mrf.mxu1  ;;  %v6273_v54 = vadd.f32 %v2018_v48, %v1906_v49  ;;  %v1908_v55 = vadd.f32 %v1907_v50, %v6083_v22  ;;  %3245 = vmatprep.subr.bf16.mxu0 %v5332_v28  ;;  %3353 = vmatpush1.bf16.msra.mxu1 %v5369_v27  ;;  %v5372_v50 = vld [vmem:[%s7115_s3 + $0x100] ss:$8 sps:$4 sm:$0xff]  }
 0x171   :  { %v6282_v57 = vpop.f32.mrf.mxu0 }
 0x172   :  { %v6284_v60 = vpop.f32.mrf.mxu1  ;;  %v6286_v61 = vadd.f32 %v2020_v51, %v1908_v55 }
 0x173   :  { %v6288_v4 = vpop.f32.mrf.mxu0  ;;  %3246 = vmatpush2.bf16.msra.mxu0 %v5330_v52 }
 0x174   :  { %v6290_v8 = vpop.f32.mrf.mxu1  ;;  %3247 = vmatprep.subr.bf16.mxu0 %v5335_v6 }
 0x175   :  { %v1915_v28 = vpop.f32.mrf.mxu0  ;;  %2592 = vmatmul.mubr.bf16.gmra.mxu0 %v5915_v11  ;;  %v5374_v11 = vld [vmem:[%s7115_s3 + $0x104] ss:$8 sps:$4 sm:$0xff]  }
 0x176   :  { %v2028_v30 = vpop.f32.mrf.mxu1  ;;  %2705 = vmatmul.mubr.bf16.gmra.mxu1 %v5920_v12  ;;  %v1916_v32 = vadd.f32 %v1915_v28, %v6075_v20  ;;  %2601 = vmatprep.mubr.bf16.mxu0 %v5925_v17  ;;  %v5341_v17 = vld [vmem:[%s7115_s3 + $0xb4] ss:$8 sps:$4 sm:$0xff]  }
 0x177   :  { %2714 = vmatprep.mubr.bf16.mxu1 %v5674_v18  ;;  %v1917_v48 = vpop.f32.mrf.mxu0  ;;  %3248 = vmatpush2.bf16.msra.mxu0 %v5333_v59  ;;  %v5377_v59 = vld [vmem:[%s7115_s3 + $0x1f4] ss:$8 sps:$4 sm:$0xff]  }
 0x178   :  { %v2030_v33 = vpop.f32.mrf.mxu1  ;;  %v6315_v49 = vadd.f32 %v2028_v30, %v1916_v32  ;;  %v1918_v12 = vadd.f32 %v1917_v48, %v6083_v22  ;;  %3249 = vmatprep.subr.bf16.mxu0 %v5338_v26  ;;  %3354 = vmatprep.subr.bf16.mxu1 %v5374_v11  ;;  %v5375_v26 = vld [vmem:[%s7115_s3 + $0x1f0] ss:$8 sps:$4 sm:$0xff]  }
 0x179   :  { %v6324_v51 = vpop.f32.mrf.mxu0  ;;  %3355 = vmatpush1.bf16.msra.mxu1 %v5372_v50 }
 0x17a   :  { %v6326_v52 = vpop.f32.mrf.mxu1  ;;  %v6328_v53 = vadd.f32 %v2030_v33, %v1918_v12  ;;  %v5342_v33 = vld [vmem:[%s7115_s3 + $0xa0] ss:$8 sps:$4 sm:$0xff]   ;;  %3356 = vmatprep.subr.bf16.mxu1 %v5377_v59  ;;  %v5345_v59 = vld [vmem:[%s7115_s3 + $0x90] ss:$8 sps:$4 sm:$0xff]  }
 0x17b   :  { %v6330_v55 = vpop.f32.mrf.mxu0  ;;  %3250 = vmatpush2.bf16.msra.mxu0 %v5336_v47 }
 0x17c   :  { %v6332_v6 = vpop.f32.mrf.mxu1  ;;  %3251 = vmatprep.subr.bf16.mxu0 %v5341_v17 }
 0x17d   :  { %v1925_v27 = vpop.f32.mrf.mxu0  ;;  %2602 = vmatmul.mubr.bf16.gmra.mxu0 %v5934_v23  ;;  %v5380_v23 = vld [vmem:[%s7115_s3 + $0x1e4] ss:$8 sps:$4 sm:$0xff]   ;;  %3357 = vmatpush2.bf16.msra.mxu1 %v5375_v26 }
 0x17e   :  { %v2038_v28 = vpop.f32.mrf.mxu1  ;;  %2715 = vmatmul.mubr.bf16.gmra.mxu1 %v5939_v24  ;;  %v1926_v30 = vadd.f32 %v1925_v27, %v6075_v20  ;;  %2611 = vmatprep.mubr.bf16.mxu0 %v5944_v29  ;;  %v5378_v29 = vld [vmem:[%s7115_s3 + $0x1e0] ss:$8 sps:$4 sm:$0xff]   ;;  %v5350_v26 = vld [vmem:[%s7115_s3 + $0x84] ss:$8 sps:$4 sm:$0xff]   ;;  %v5381_v27 = vld [vmem:[%s7115_s3 + $0x1d0] ss:$8 sps:$4 sm:$0xff]  }
 0x17f   :  { %2724 = vmatprep.mubr.bf16.mxu1 %v5674_v18  ;;  %v1927_v32 = vpop.f32.mrf.mxu0  ;;  %3252 = vmatpush2.bf16.msra.mxu0 %v5339_v56  ;;  %v5347_v18 = vld [vmem:[%s7115_s3 + $0x94] ss:$8 sps:$4 sm:$0xff]  }
 0x180   :  { %v2040_v48 = vpop.f32.mrf.mxu1  ;;  %v6357_v47 = vadd.f32 %v2038_v28, %v1926_v30  ;;  %v1928_v24 = vadd.f32 %v1927_v32, %v6083_v22  ;;  %3253 = vmatprep.subr.bf16.mxu0 %v5344_v9  ;;  %3358 = vmatprep.subr.bf16.mxu1 %v5380_v23  ;;  %v5383_v9 = vld [vmem:[%s7115_s3 + $0x1d4] ss:$8 sps:$4 sm:$0xff]   ;;  %v5348_v23 = vld [vmem:[%s7115_s3 + $0x80] ss:$8 sps:$4 sm:$0xff]  }
 0x181   :  { %v6366_v11 = vpop.f32.mrf.mxu0  ;;  %3359 = vmatpush2.bf16.msra.mxu1 %v5378_v29 }
 0x182   :  { %v6368_v12 = vpop.f32.mrf.mxu1  ;;  %v6370_v17 = vadd.f32 %v2040_v48, %v1928_v24  ;;  %3360 = vmatprep.subr.bf16.mxu1 %v5383_v9  ;;  %v5386_v24 = vld [vmem:[%s7115_s3 + $0x1c4] ss:$8 sps:$4 sm:$0xff]  }
 0x183   :  { %v6372_v50 = vpop.f32.mrf.mxu0  ;;  %3254 = vmatpush2.bf16.msra.mxu0 %v5342_v33 }
 0x184   :  { %v6374_v56 = vpop.f32.mrf.mxu1  ;;  %3255 = vmatprep.subr.bf16.mxu0 %v5347_v18 }
 0x185   :  { %v1935_v28 = vpop.f32.mrf.mxu0  ;;  %2612 = vmatmul.mubr.bf16.gmra.mxu0 %v5953_v34  ;;  %3361 = vmatpush2.bf16.msra.mxu1 %v5381_v27  ;;  %v1870_v27 = vadd.f32 %v6108_v41, %v6075_v20 }
 0x186   :  { %v2048_v30 = vpop.f32.mrf.mxu1  ;;  %2725 = vmatmul.mubr.bf16.gmra.mxu1 %v5958_v35  ;;  %v1936_v32 = vadd.f32 %v1935_v28, %v6075_v20  ;;  %v5384_v35 = vld [vmem:[%s7115_s3 + $0x1c0] ss:$8 sps:$4 sm:$0xff]   ;;  %3362 = vmatprep.subr.bf16.mxu1 %v5386_v24 }
 0x187   :  { %v1937_v48 = vpop.f32.mrf.mxu0  ;;  %3256 = vmatpush2.bf16.msra.mxu0 %v5345_v59  ;;  %v1983_v14 = vadd.f32 %v6110_v42, %v1870_v27  ;;  %v5395_v42 = vld [vmem:[%s7115_s3 + $0x194] ss:$8 sps:$4 sm:$0xff]  }
 0x188   :  { %v2050_v33 = vpop.f32.mrf.mxu1  ;;  %v6397_v18 = vadd.f32 %v2048_v30, %v1936_v32  ;;  %v1938_v34 = vadd.f32 %v1937_v48, %v6083_v22  ;;  %3257 = vmatprep.subr.bf16.mxu0 %v5350_v26  ;;  %v5389_v26 = vld [vmem:[%s7115_s3 + $0x1b4] ss:$8 sps:$4 sm:$0xff]   ;;  %v5387_v30 = vld [vmem:[%s7115_s3 + $0x1b0] ss:$8 sps:$4 sm:$0xff]  }
 0x189   :  { %v6403_v29 = vpop.f32.mrf.mxu0  ;;  %3363 = vmatpush2.bf16.msra.mxu1 %v5384_v35  ;;  %v5390_v35 = vld [vmem:[%s7115_s3 + $0x1a0] ss:$8 sps:$4 sm:$0xff]  }
 0x18a   :  { %7134 = vst [vmem:[#allocation18_spill] sm:$0xff] %v6397_v18  ;;  %v6405_v59 = vpop.f32.mrf.mxu1  ;;  %v6407_v9 = vadd.f32 %v2050_v33, %v1938_v34  ;;  %3364 = vmatprep.subr.bf16.mxu1 %v5389_v26  ;;  %v1872_v33 = vadd.f32 %v6114_v44, %v6083_v22  ;;  %v5392_v34 = vld [vmem:[%s7115_s3 + $0x1a4] ss:$8 sps:$4 sm:$0xff]  }
 0x18b   :  { %7135 = vst [vmem:[#allocation19_spill] sm:$0xff] %v6405_v59  ;;  %v6409_v28 = vpop.f32.mrf.mxu0  ;;  %3258 = vmatpush2.bf16.msra.mxu0 %v5348_v23 }
 0x18c   :  { %7136 = vst [vmem:[#allocation20_spill] sm:$0xff] %v6407_v9  ;;  %v6411_v1 = vpop.f32.mrf.mxu1  ;;  %v1985_v44 = vadd.f32 %v6116_v45, %v1872_v33 }
 0x18d   :  { %7137 = vst [vmem:[#allocation21_spill] sm:$0xff] %v6411_v1  ;;  %v2091_v32 = vpop.f32.mrf.mxu0  ;;  %3365 = vmatpush2.bf16.msra.mxu1 %v5387_v30 }
 0x18e   :  { %v2204_v48 = vpop.f32.mrf.mxu1  ;;  %v2092_v26 = vadd.f32 %v2091_v32, %v6102_v38  ;;  %3366 = vmatprep.subr.bf16.mxu1 %v5392_v34  ;;  %v5393_v38 = vld [vmem:[%s7115_s3 + $0x190] ss:$8 sps:$4 sm:$0xff]  }
 0x18f   :  { %v2093_v24 = vpop.f32.mrf.mxu0 }
 0x190   :  { %v2206_v23 = vpop.f32.mrf.mxu1  ;;  %v2094_v41 = vadd.f32 %v2093_v24, %v6112_v43  ;;  %v1880_v43 = vadd.f32 %v6144_v62, %v6075_v20  ;;  %v2205_v32 = vadd.f32 %v2204_v48, %v2092_v26 }
 0x191   :  { %v2095_v19 = vpop.f32.mrf.mxu0  ;;  %3367 = vmatpush2.bf16.msra.mxu1 %v5390_v35 }
 0x192   :  { %v2208_v15 = vpop.f32.mrf.mxu1  ;;  %v2096_v1 = vadd.f32 %v2095_v19, %v1983_v14  ;;  %v2207_v27 = vadd.f32 %v2206_v23, %v2094_v41  ;;  %3368 = vmatprep.subr.bf16.mxu1 %v5395_v42  ;;  %v1882_v19 = vadd.f32 %v6150_v2, %v6083_v22  ;;  %v5396_v23 = vld [vmem:[%s7115_s3 + $0x180] ss:$8 sps:$4 sm:$0xff]   ;;  %v2735_v2 = vmax.f32 %v2205_v32, 0.0 }
 0x193   :  { %v2097_v18 = vpop.f32.mrf.mxu0 }
 0x194   :  { %v2210_v9 = vpop.f32.mrf.mxu1  ;;  %v2209_v30 = vadd.f32 %v2208_v15, %v2096_v1  ;;  %v2098_v24 = vadd.f32 %v2097_v18, %v1985_v44  ;;  %v5398_v1 = vld [vmem:[%s7115_s3 + $0x184] ss:$8 sps:$4 sm:$0xff]   ;;  %v1993_v15 = vadd.f32 %v6146_v63, %v1880_v43  ;;  %v2736_v62 = vmax.f32 %v2207_v27, 0.0 }
 0x195   :  { %v2101_v45 = vpop.f32.mrf.mxu0  ;;  %3369 = vmatpush2.bf16.msra.mxu1 %v5393_v38  ;;  %v1995_v26 = vadd.f32 %v6152_v3, %v1882_v19  ;;  %v1890_v63 = vadd.f32 %v6190_v36, %v6075_v20  ;;  %v1892_v3 = vadd.f32 %v6196_v40, %v6083_v22 }
 0x196   :  { %v2214_v14 = vpop.f32.mrf.mxu1  ;;  %v2211_v33 = vadd.f32 %v2210_v9, %v2098_v24  ;;  %v2739_v34 = vmax.f32 %v2209_v30, 0.0  ;;  %v2102_v9 = vadd.f32 %v2101_v45, %v6138_v58  ;;  %3370 = vmatprep.subr.bf16.mxu1 %v5398_v1 }
 0x197   :  { %v2103_v59 = vpop.f32.mrf.mxu0  ;;  %v2003_v36 = vadd.f32 %v6192_v37, %v1890_v63 }
 0x198   :  { %v2216_v5 = vpop.f32.mrf.mxu1  ;;  %v2740_v18 = vmax.f32 %v2211_v33, 0.0  ;;  %v2104_v48 = vadd.f32 %v2103_v59, %v6148_v0  ;;  %v2799_v43 = vpack.c.bf16 %v2739_v34, %v2735_v2  ;;  %v2215_v38 = vadd.f32 %v2214_v14, %v2102_v9 }
 0x199   :  { %v2105_v41 = vpop.f32.mrf.mxu0  ;;  %3371 = vmatpush2.bf16.msra.mxu1 %v5396_v23  ;;  %v2005_v23 = vadd.f32 %v6198_v46, %v1892_v3 }
 0x19a   :  { %v2218_v35 = vpop.f32.mrf.mxu1  ;;  %v2106_v44 = vadd.f32 %v2105_v41, %v1993_v15  ;;  %v2800_v42 = vpack.c.bf16 %v2740_v18, %v2736_v62  ;;  %v2217_v27 = vadd.f32 %v2216_v5, %v2104_v48  ;;  %v2743_v62 = vmax.f32 %v2215_v38, 0.0 }
 0x19b   :  { %v2107_v0 = vpop.f32.mrf.mxu0 }
 0x19c   :  { %v2220_v59 = vpop.f32.mrf.mxu1  ;;  %v2219_v30 = vadd.f32 %v2218_v35, %v2106_v44  ;;  %v2108_v24 = vadd.f32 %v2107_v0, %v1995_v26  ;;  %3259 = vmatprep.mubr.bf16.mxu0 %v2800_v42  ;;  %v2744_v34 = vmax.f32 %v2217_v27, 0.0  ;;  %v1900_v26 = vadd.f32 %v6236_v10, %v6075_v20 }
 0x19d   :  { %v2111_v58 = vpop.f32.mrf.mxu0  ;;  %3260 = vmatmul.mubr.bf16.vlgmr.msra.gmra.mxu0 %v2799_v43 }
 0x19e   :  { %v2224_v32 = vpop.f32.mrf.mxu1  ;;  %v2221_v45 = vadd.f32 %v2220_v59, %v2108_v24  ;;  %v2747_v19 = vmax.f32 %v2219_v30, 0.0  ;;  %v2112_v18 = vadd.f32 %v2111_v58, %v6181_v31  ;;  %v1902_v31 = vadd.f32 %v6242_v21, %v6083_v22 }
 0x19f   :  { %v2113_v33 = vpop.f32.mrf.mxu0  ;;  %v2013_v30 = vadd.f32 %v6238_v13, %v1900_v26 }
 0x1a0   :  { %v2226_v1 = vpop.f32.mrf.mxu1  ;;  %v2748_v15 = vmax.f32 %v2221_v45, 0.0  ;;  %v2114_v5 = vadd.f32 %v2113_v33, %v6194_v39  ;;  %v2803_v40 = vpack.c.bf16 %v2747_v19, %v2743_v62  ;;  %v2225_v39 = vadd.f32 %v2224_v32, %v2112_v18 }
 0x1a1   :  { %v2115_v14 = vpop.f32.mrf.mxu0  ;;  %v2015_v19 = vadd.f32 %v6244_v25, %v1902_v31 }
 0x1a2   :  { %v2228_v48 = vpop.f32.mrf.mxu1  ;;  %v2116_v2 = vadd.f32 %v2115_v14, %v2003_v36  ;;  %v2804_v9 = vpack.c.bf16 %v2748_v15, %v2744_v34  ;;  %v2227_v37 = vadd.f32 %v2226_v1, %v2114_v5  ;;  %v2751_v58 = vmax.f32 %v2225_v39, 0.0 }
 0x1a3   :  { %v2117_v41 = vpop.f32.mrf.mxu0  ;;  %v1910_v15 = vadd.f32 %v6282_v57, %v6075_v20 }
 0x1a4   :  { %v2230_v35 = vpop.f32.mrf.mxu1  ;;  %v2229_v44 = vadd.f32 %v2228_v48, %v2116_v2  ;;  %v2118_v42 = vadd.f32 %v2117_v41, %v2005_v23  ;;  %3269 = vmatprep.mubr.bf16.mxu0 %v2804_v9  ;;  %v2752_v24 = vmax.f32 %v2227_v37, 0.0 }
 0x1a5   :  { %v2121_v63 = vpop.f32.mrf.mxu0  ;;  %3270 = vmatmul.mubr.bf16.gmra.mxu0 %v2803_v40  ;;  %v2023_v9 = vadd.f32 %v6284_v60, %v1910_v15 }
 0x1a6   :  { %v2234_v43 = vpop.f32.mrf.mxu1  ;;  %v2231_v46 = vadd.f32 %v2230_v35, %v2118_v42  ;;  %v2755_v0 = vmax.f32 %v2229_v44, 0.0  ;;  %v2122_v3 = vadd.f32 %v2121_v63, %v6227_v7  ;;  %v1912_v7 = vadd.f32 %v6288_v4, %v6083_v22 }
 0x1a7   :  { %v2123_v59 = vpop.f32.mrf.mxu0 }
 0x1a8   :  { %v2236_v27 = vpop.f32.mrf.mxu1  ;;  %v2756_v38 = vmax.f32 %v2231_v46, 0.0  ;;  %v2124_v10 = vadd.f32 %v2123_v59, %v6240_v16  ;;  %v2807_v21 = vpack.c.bf16 %v2755_v0, %v2751_v58  ;;  %v2235_v16 = vadd.f32 %v2234_v43, %v2122_v3 }
 0x1a9   :  { %v2125_v32 = vpop.f32.mrf.mxu0  ;;  %v2025_v42 = vadd.f32 %v6290_v8, %v1912_v7  ;;  %v1920_v46 = vadd.f32 %v6324_v51, %v6075_v20 }
 0x1aa   :  { %v2238_v45 = vpop.f32.mrf.mxu1  ;;  %v2126_v33 = vadd.f32 %v2125_v32, %v2013_v30  ;;  %v2808_v1 = vpack.c.bf16 %v2756_v38, %v2752_v24  ;;  %v2237_v13 = vadd.f32 %v2236_v27, %v2124_v10  ;;  %v2759_v35 = vmax.f32 %v2235_v16, 0.0 }
 0x1ab   :  { %v2127_v36 = vpop.f32.mrf.mxu0  ;;  %v2033_v58 = vadd.f32 %v6326_v52, %v1920_v46 }
 0x1ac   :  { %v2240_v34 = vpop.f32.mrf.mxu1  ;;  %v2239_v5 = vadd.f32 %v2238_v45, %v2126_v33  ;;  %v2128_v62 = vadd.f32 %v2127_v36, %v2015_v19  ;;  %3279 = vmatprep.mubr.bf16.mxu0 %v2808_v1  ;;  %v2760_v40 = vmax.f32 %v2237_v13, 0.0 }
 0x1ad   :  { %v2131_v18 = vpop.f32.mrf.mxu0  ;;  %3280 = vmatmul.mubr.bf16.gmra.mxu0 %v2807_v21 }
 0x1ae   :  { %v2244_v14 = vpop.f32.mrf.mxu1  ;;  %v2241_v25 = vadd.f32 %v2240_v34, %v2128_v62  ;;  %v2763_v48 = vmax.f32 %v2239_v5, 0.0  ;;  %v2132_v26 = vadd.f32 %v2131_v18, %v6273_v54  ;;  %v1922_v54 = vadd.f32 %v6330_v55, %v6083_v22 }
 0x1af   :  { %v2133_v23 = vpop.f32.mrf.mxu0  ;;  %v1930_v5 = vadd.f32 %v6366_v11, %v6075_v20 }
 0x1b0   :  { %v2246_v2 = vpop.f32.mrf.mxu1  ;;  %v2764_v41 = vmax.f32 %v2241_v25, 0.0  ;;  %v2134_v57 = vadd.f32 %v2133_v23, %v6286_v61  ;;  %v2811_v4 = vpack.c.bf16 %v2763_v48, %v2759_v35  ;;  %v2245_v61 = vadd.f32 %v2244_v14, %v2132_v26 }
 0x1b1   :  { %v2135_v37 = vpop.f32.mrf.mxu0  ;;  %v2035_v21 = vadd.f32 %v6332_v6, %v1922_v54  ;;  %v2043_v23 = vadd.f32 %v6368_v12, %v1930_v5 }
 0x1b2   :  { %v2248_v44 = vpop.f32.mrf.mxu1  ;;  %v2136_v39 = vadd.f32 %v2135_v37, %v2023_v9  ;;  %v2812_v63 = vpack.c.bf16 %v2764_v41, %v2760_v40  ;;  %v2247_v60 = vadd.f32 %v2246_v2, %v2134_v57  ;;  %v2767_v45 = vmax.f32 %v2245_v61, 0.0 }
 0x1b3   :  { %v2137_v43 = vpop.f32.mrf.mxu0 }
 0x1b4   :  { %v2250_v31 = vpop.f32.mrf.mxu1  ;;  %v2249_v0 = vadd.f32 %v2248_v44, %v2136_v39  ;;  %v2138_v59 = vadd.f32 %v2137_v43, %v2025_v42  ;;  %3289 = vmatprep.mubr.bf16.mxu0 %v2812_v63  ;;  %v2768_v3 = vmax.f32 %v2247_v60, 0.0  ;;  %v1940_v63 = vadd.f32 %v6403_v29, %v6075_v20  ;;  %v7138_v60 = vld [vmem:[#allocation16_spill] sm:$0xff]  ;;  %v7139_v20 = vld [vmem:[#allocation19_spill] sm:$0xff] }
 0x1b5   :  { %v2141_v27 = vpop.f32.mrf.mxu0  ;;  %3290 = vmatmul.mubr.bf16.gmra.mxu0 %v2811_v4 }
 0x1b6   :  { %v2254_v30 = vpop.f32.mrf.mxu1  ;;  %v2251_v8 = vadd.f32 %v2250_v31, %v2138_v59  ;;  %v2771_v24 = vmax.f32 %v2249_v0, 0.0  ;;  %v2142_v19 = vadd.f32 %v2141_v27, %v6315_v49  ;;  %v1932_v49 = vadd.f32 %v6372_v50, %v6083_v22 }
 0x1b7   :  { %v2143_v38 = vpop.f32.mrf.mxu0  ;;  %v413_v0 = vsub.s32 2, %v7138_v60  ;;  %v2053_v29 = vadd.f32 %v7139_v20, %v1940_v63 }
 0x1b8   :  { %v2256_v10 = vpop.f32.mrf.mxu1  ;;  %v2772_v32 = vmax.f32 %v2251_v8, 0.0  ;;  %v2144_v51 = vadd.f32 %v2143_v38, %v6328_v53  ;;  %v2815_v55 = vpack.c.bf16 %v2771_v24, %v2767_v45  ;;  %v2255_v53 = vadd.f32 %v2254_v30, %v2142_v19  ;;  %v7140_v24 = vld [vmem:[#allocation20_spill] sm:$0xff] }
 0x1b9   :  { %v2145_v33 = vpop.f32.mrf.mxu0  ;;  %v2045_v26 = vadd.f32 %v6374_v56, %v1932_v49  ;;  %v417_v30 = vsub.s32 3, %v7138_v60 }
 0x1ba   :  { %v2258_v1 = vpop.f32.mrf.mxu1  ;;  %v2146_v36 = vadd.f32 %v2145_v33, %v2033_v58  ;;  %v2816_v34 = vpack.c.bf16 %v2772_v32, %v2768_v3  ;;  %v2257_v52 = vadd.f32 %v2256_v10, %v2144_v51  ;;  %v2775_v40 = vmax.f32 %v2255_v53, 0.0  ;;  %v7141_v58 = vld [vmem:[#allocation18_spill] sm:$0xff]  ;;  %v7143_v33 = vld [vmem:[#allocation17_spill] sm:$0xff] }
 0x1bb   :  { %v2147_v15 = vpop.f32.mrf.mxu0  ;;  %v6507_v5 = vrot.slane %v7143_v33, %v417_v30 }
 0x1bc   :  { %v2260_v13 = vpop.f32.mrf.mxu1  ;;  %v2259_v62 = vadd.f32 %v2258_v1, %v2146_v36  ;;  %v2148_v16 = vadd.f32 %v2147_v15, %v2035_v21  ;;  %3299 = vmatprep.mubr.bf16.mxu0 %v2816_v34  ;;  %v2776_v2 = vmax.f32 %v2257_v52, 0.0  ;;  %v6504_v1 = vrot.slane %v7143_v33, %v413_v0 }
 0x1bd   :  { %v2151_v18 = vpop.f32.mrf.mxu0  ;;  %3300 = vmatmul.mubr.bf16.gmra.mxu0 %v2815_v55 }
 0x1be   :  { %v2264_v14 = vpop.f32.mrf.mxu1  ;;  %v2261_v6 = vadd.f32 %v2260_v13, %v2148_v16  ;;  %v2779_v7 = vmax.f32 %v2259_v62, 0.0  ;;  %v2152_v41 = vadd.f32 %v2151_v18, %v6357_v47  ;;  %v1942_v47 = vadd.f32 %v6409_v28, %v6083_v22  ;;  %v7142_v22 = vld [vmem:[#allocation21_spill] sm:$0xff] }
 0x1bf   :  { %v2153_v25 = vpop.f32.mrf.mxu0 }
 0x1c0   :  { %v2266_v48 = vpop.f32.mrf.mxu1  ;;  %v2780_v9 = vmax.f32 %v2261_v6, 0.0  ;;  %v2154_v11 = vadd.f32 %v2153_v25, %v6370_v17  ;;  %v2819_v50 = vpack.c.bf16 %v2779_v7, %v2775_v40  ;;  %v2265_v17 = vadd.f32 %v2264_v14, %v2152_v41 }
 0x1c1   :  { %v2155_v57 = vpop.f32.mrf.mxu0  ;;  %v2055_v28 = vadd.f32 %v7142_v22, %v1942_v47 }
 0x1c2   :  { %v2268_v35 = vpop.f32.mrf.mxu1  ;;  %v2156_v37 = vadd.f32 %v2155_v57, %v2043_v23  ;;  %v2820_v44 = vpack.c.bf16 %v2780_v9, %v2776_v2  ;;  %v2267_v12 = vadd.f32 %v2266_v48, %v2154_v11  ;;  %v2783_v10 = vmax.f32 %v2265_v17, 0.0 }
 0x1c3   :  { %v2157_v42 = vpop.f32.mrf.mxu0 }
 0x1c4   :  { %v2270_v39 = vpop.f32.mrf.mxu1  ;;  %v2269_v4 = vadd.f32 %v2268_v35, %v2156_v37  ;;  %v2158_v43 = vadd.f32 %v2157_v42, %v2045_v26  ;;  %3309 = vmatprep.mubr.bf16.mxu0 %v2820_v44  ;;  %v2784_v54 = vmax.f32 %v2267_v12, 0.0 }
 0x1c5   :  { %v2161_v31 = vpop.f32.mrf.mxu0  ;;  %3310 = vmatmul.mubr.bf16.gmra.mxu0 %v2819_v50 }
 0x1c6   :  { %v2274_v46 = vpop.f32.mrf.mxu1  ;;  %v2271_v56 = vadd.f32 %v2270_v39, %v2158_v43  ;;  %v2787_v59 = vmax.f32 %v2269_v4, 0.0  ;;  %v2162_v3 = vadd.f32 %v2161_v31, %v7141_v58 }
 0x1c7   :  { %v2163_v61 = vpop.f32.mrf.mxu0 }
 0x1c8   :  { %v2276_v27 = vpop.f32.mrf.mxu1  ;;  %v2788_v8 = vmax.f32 %v2271_v56, 0.0  ;;  %v2164_v38 = vadd.f32 %v2163_v61, %v7140_v24  ;;  %v2823_v21 = vpack.c.bf16 %v2787_v59, %v2783_v10  ;;  %v2275_v52 = vadd.f32 %v2274_v46, %v2162_v3 }
 0x1c9   :  { %v2165_v32 = vpop.f32.mrf.mxu0 }
 0x1ca   :  { %v2278_v51 = vpop.f32.mrf.mxu1  ;;  %v2166_v45 = vadd.f32 %v2165_v32, %v2053_v29  ;;  %v2824_v19 = vpack.c.bf16 %v2788_v8, %v2784_v54  ;;  %v2277_v55 = vadd.f32 %v2276_v27, %v2164_v38  ;;  %v2791_v2 = vmax.f32 %v2275_v52, 0.0 }
 0x1cb   :  { %v2167_v36 = vpop.f32.mrf.mxu0 }
 0x1cc   :  { %v2280_v34 = vpop.f32.mrf.mxu1  ;;  %v2279_v15 = vadd.f32 %v2278_v51, %v2166_v45  ;;  %v2168_v13 = vadd.f32 %v2167_v36, %v2055_v28  ;;  %3319 = vmatprep.mubr.bf16.mxu0 %v2824_v19  ;;  %v2792_v7 = vmax.f32 %v2277_v55, 0.0 }
 0x1cd   :  { %v2317_v62 = vpop.f32.mrf.mxu0  ;;  %3320 = vmatmul.mubr.bf16.gmra.mxu0 %v2823_v21 }
 0x1ce   :  { %v2430_v16 = vpop.f32.mrf.mxu1  ;;  %v2281_v53 = vadd.f32 %v2280_v34, %v2168_v13  ;;  %v2318_v18 = vadd.f32 %v2317_v62, %v6504_v1  ;;  %v2795_v14 = vmax.f32 %v2279_v15, 0.0 }
 0x1cf   :  { %v2319_v49 = vpop.f32.mrf.mxu0 }
 0x1d0   :  { %v2432_v6 = vpop.f32.mrf.mxu1  ;;  %v2796_v25 = vmax.f32 %v2281_v53, 0.0  ;;  %v6510_v48 = vadd.f32 %v2430_v16, %v2318_v18  ;;  %v2320_v23 = vadd.f32 %v2319_v49, %v6507_v5  ;;  %v2827_v57 = vpack.c.bf16 %v2795_v14, %v2791_v2 }
 0x1d1   :  { %v6513_v9 = vpop.f32.mrf.mxu0 }
 0x1d2   :  { %v6515_v11 = vpop.f32.mrf.mxu1  ;;  %v6517_v40 = vadd.f32 %v2432_v6, %v2320_v23  ;;  %v2828_v41 = vpack.c.bf16 %v2796_v25, %v2792_v7 }
 0x1d3   :  { %v6519_v35 = vpop.f32.mrf.mxu0 }
 0x1d4   :  { %v6521_v26 = vpop.f32.mrf.mxu1  ;;  %3329 = vmatprep.mubr.bf16.mxu0 %v2828_v41 }
 0x1d5   :  { %v2327_v37 = vpop.f32.mrf.mxu0  ;;  %3330 = vmatmul.mubr.bf16.gmra.mxu0 %v2827_v57 }
 0x1d6   :  { %v2440_v44 = vpop.f32.mrf.mxu1  ;;  %v2328_v50 = vadd.f32 %v2327_v37, %v6504_v1 }
 0x1d7   :  { %v2329_v42 = vpop.f32.mrf.mxu0 }
 0x1d8   :  { %v2442_v39 = vpop.f32.mrf.mxu1  ;;  %v6524_v63 = vadd.f32 %v2440_v44, %v2328_v50  ;;  %v2330_v12 = vadd.f32 %v2329_v42, %v6507_v5 }
 0x1d9   :  { %v6527_v4 = vpop.f32.mrf.mxu0 }
 0x1da   :  { %v6529_v43 = vpop.f32.mrf.mxu1  ;;  %v6531_v17 = vadd.f32 %v2442_v39, %v2330_v12 }
 0x1db   :  { %v6533_v31 = vpop.f32.mrf.mxu0 }
 0x1dc   :  { %v6535_v46 = vpop.f32.mrf.mxu1 }
 0x1dd   :  { %v2337_v47 = vpop.f32.mrf.mxu0 }
 0x1de   :  { %v2450_v56 = vpop.f32.mrf.mxu1  ;;  %v2338_v0 = vadd.f32 %v2337_v47, %v6504_v1 }
 0x1df   :  { %v2339_v59 = vpop.f32.mrf.mxu0 }
 0x1e0   :  { %v2452_v61 = vpop.f32.mrf.mxu1  ;;  %v6538_v27 = vadd.f32 %v2450_v56, %v2338_v0  ;;  %v2340_v30 = vadd.f32 %v2339_v59, %v6507_v5 }
 0x1e1   :  { %v6541_v20 = vpop.f32.mrf.mxu0 }
 0x1e2   :  { %v6543_v29 = vpop.f32.mrf.mxu1  ;;  %v6545_v54 = vadd.f32 %v2452_v61, %v2340_v30 }
 0x1e3   :  { %v6547_v8 = vpop.f32.mrf.mxu0 }
 0x1e4   :  { %v6549_v24 = vpop.f32.mrf.mxu1 }
 0x1e5   :  { %v2347_v38 = vpop.f32.mrf.mxu0 }
 0x1e6   :  { %v2460_v10 = vpop.f32.mrf.mxu1  ;;  %v2348_v58 = vadd.f32 %v2347_v38, %v6504_v1 }
 0x1e7   :  { %v2349_v3 = vpop.f32.mrf.mxu0 }
 0x1e8   :  { %v2462_v32 = vpop.f32.mrf.mxu1  ;;  %v6552_v51 = vadd.f32 %v2460_v10, %v2348_v58  ;;  %v2350_v22 = vadd.f32 %v2349_v3, %v6507_v5 }
 0x1e9   :  { %v6555_v28 = vpop.f32.mrf.mxu0 }
 0x1ea   :  { %v6557_v45 = vpop.f32.mrf.mxu1  ;;  %v6559_v19 = vadd.f32 %v2462_v32, %v2350_v22 }
 0x1eb   :  { %v6561_v33 = vpop.f32.mrf.mxu0 }
 0x1ec   :  { %v6563_v21 = vpop.f32.mrf.mxu1 }
 0x1ed   :  { %v2357_v36 = vpop.f32.mrf.mxu0 }
 0x1ee   :  { %v2470_v34 = vpop.f32.mrf.mxu1  ;;  %v2358_v55 = vadd.f32 %v2357_v36, %v6504_v1 }
 0x1ef   :  { %v2359_v15 = vpop.f32.mrf.mxu0 }
 0x1f0   :  { %v2472_v13 = vpop.f32.mrf.mxu1  ;;  %v6566_v52 = vadd.f32 %v2470_v34, %v2358_v55  ;;  %v2360_v62 = vadd.f32 %v2359_v15, %v6507_v5 }
 0x1f1   :  { %v6569_v16 = vpop.f32.mrf.mxu0 }
 0x1f2   :  { %v6571_v53 = vpop.f32.mrf.mxu1  ;;  %v6573_v18 = vadd.f32 %v2472_v13, %v2360_v62 }
 0x1f3   :  { %v6575_v14 = vpop.f32.mrf.mxu0 }
 0x1f4   :  { %v6577_v49 = vpop.f32.mrf.mxu1 }
 0x1f5   :  { %v2367_v6 = vpop.f32.mrf.mxu0 }
 0x1f6   :  { %v2480_v7 = vpop.f32.mrf.mxu1  ;;  %v2368_v25 = vadd.f32 %v2367_v6, %v6504_v1 }
 0x1f7   :  { %v2369_v23 = vpop.f32.mrf.mxu0 }
 0x1f8   :  { %v2482_v2 = vpop.f32.mrf.mxu1  ;;  %v6580_v41 = vadd.f32 %v2480_v7, %v2368_v25  ;;  %v2370_v57 = vadd.f32 %v2369_v23, %v6507_v5 }
 0x1f9   :  { %v6583_v37 = vpop.f32.mrf.mxu0 }
 0x1fa   :  { %v6585_v44 = vpop.f32.mrf.mxu1  ;;  %v6587_v50 = vadd.f32 %v2482_v2, %v2370_v57  ;;  %v2322_v57 = vadd.f32 %v6513_v9, %v6504_v1 }
 0x1fb   :  { %v6589_v42 = vpop.f32.mrf.mxu0 }
 0x1fc   :  { %v6591_v39 = vpop.f32.mrf.mxu1 }
 0x1fd   :  { %v2377_v12 = vpop.f32.mrf.mxu0 }
 0x1fe   :  { %v2490_v47 = vpop.f32.mrf.mxu1  ;;  %v2378_v56 = vadd.f32 %v2377_v12, %v6504_v1 }
 0x1ff   :  { %v2379_v0 = vpop.f32.mrf.mxu0 }
 0x200   :  { %v2492_v59 = vpop.f32.mrf.mxu1  ;;  %v6594_v61 = vadd.f32 %v2490_v47, %v2378_v56  ;;  %v2380_v30 = vadd.f32 %v2379_v0, %v6507_v5  ;;  %v2324_v56 = vadd.f32 %v6519_v35, %v6507_v5 }
 0x201   :  { %v6597_v38 = vpop.f32.mrf.mxu0 }
 0x202   :  { %v6599_v10 = vpop.f32.mrf.mxu1  ;;  %v6601_v58 = vadd.f32 %v2492_v59, %v2380_v30  ;;  %v2435_v30 = vadd.f32 %v6515_v11, %v2322_v57 }
 0x203   :  { %v6603_v3 = vpop.f32.mrf.mxu0 }
 0x204   :  { %v6605_v32 = vpop.f32.mrf.mxu1 }
 0x205   :  { %v2387_v22 = vpop.f32.mrf.mxu0 }
 0x206   :  { %v2500_v36 = vpop.f32.mrf.mxu1  ;;  %v2388_v34 = vadd.f32 %v2387_v22, %v6504_v1 }
 0x207   :  { %v2389_v55 = vpop.f32.mrf.mxu0 }
 0x208   :  { %v2502_v15 = vpop.f32.mrf.mxu1  ;;  %v6608_v13 = vadd.f32 %v2500_v36, %v2388_v34  ;;  %v2390_v62 = vadd.f32 %v2389_v55, %v6507_v5 }
 0x209   :  { %v6611_v6 = vpop.f32.mrf.mxu0 }
 0x20a   :  { %7144 = vst [vmem:[#allocation19_spill] sm:$0xff] %v6608_v13  ;;  %v6613_v7 = vpop.f32.mrf.mxu1  ;;  %v6615_v25 = vadd.f32 %v2502_v15, %v2390_v62  ;;  %v2437_v15 = vadd.f32 %v6521_v26, %v2324_v56 }
 0x20b   :  { %7145 = vst [vmem:[#allocation20_spill] sm:$0xff] %v6613_v7  ;;  %v6617_v23 = vpop.f32.mrf.mxu0 }
 0x20c   :  { %7146 = vst [vmem:[#allocation18_spill] sm:$0xff] %v6615_v25  ;;  %7147 = vst [vmem:[#allocation21_spill] sm:$0xff] %v6617_v23  ;;  %v6619_v2 = vpop.f32.mrf.mxu1 }
 0x20d   :  { %7148 = vst [vmem:[#allocation17_spill] sm:$0xff] %v6619_v2  ;;  %v2543_v12 = vpop.f32.mrf.mxu0  ;;  %v2332_v2 = vadd.f32 %v6527_v4, %v6504_v1 }
 0x20e   :  { %v2656_v47 = vpop.f32.mrf.mxu1  ;;  %v2544_v36 = vadd.f32 %v2543_v12, %v6510_v48 }
 0x20f   :  { %v2545_v0 = vpop.f32.mrf.mxu0  ;;  %v2445_v26 = vadd.f32 %v6529_v43, %v2332_v2 }
 0x210   :  { %v2658_v59 = vpop.f32.mrf.mxu1  ;;  %v2546_v22 = vadd.f32 %v2545_v0, %v6517_v40  ;;  %v2657_v7 = vadd.f32 %v2656_v47, %v2544_v36  ;;  %v2334_v40 = vadd.f32 %v6533_v31, %v6507_v5 }
 0x211   :  { %v2547_v34 = vpop.f32.mrf.mxu0 }
 0x212   :  { %v2660_v55 = vpop.f32.mrf.mxu1  ;;  %v2548_v62 = vadd.f32 %v2547_v34, %v2435_v30  ;;  %v2659_v13 = vadd.f32 %v2658_v59, %v2546_v22  ;;  %v2737_v4 = vmax.f32 %v2657_v7, 0.0  ;;  %v2447_v22 = vadd.f32 %v6535_v46, %v2334_v40  ;;  %v5401_v46 = vld [vmem:[%s7117_s5 + $0x70] sm:$0xff]  }
 0x213   :  { %v2549_v60 = vpop.f32.mrf.mxu0 }
 0x214   :  { %v2662_v9 = vpop.f32.mrf.mxu1  ;;  %v2661_v35 = vadd.f32 %v2660_v55, %v2548_v62  ;;  %v2550_v25 = vadd.f32 %v2549_v60, %v2437_v15  ;;  %v2738_v56 = vmax.f32 %v2659_v13, 0.0  ;;  %v2342_v62 = vadd.f32 %v6541_v20, %v6504_v1 }
 0x215   :  { %v2553_v23 = vpop.f32.mrf.mxu0  ;;  %v2344_v20 = vadd.f32 %v6547_v8, %v6507_v5  ;;  %v5403_v8 = vld [vmem:[%s7117_s5 + $0x68] sm:$0xff]  }
 0x216   :  { %v2666_v11 = vpop.f32.mrf.mxu1  ;;  %v2663_v48 = vadd.f32 %v2662_v9, %v2550_v25  ;;  %v2741_v57 = vmax.f32 %v2661_v35, 0.0  ;;  %v2554_v59 = vadd.f32 %v2553_v23, %v6524_v63  ;;  %v5399_v63 = vld [vmem:[%s7117_s5 + $0x78] sm:$0xff]  }
 0x217   :  { %v2555_v12 = vpop.f32.mrf.mxu0  ;;  %4728 = vmatprep.subr.bf16.mxu0 %v5399_v63 }
 0x218   :  { %v2668_v0 = vpop.f32.mrf.mxu1  ;;  %v2742_v30 = vmax.f32 %v2663_v48, 0.0  ;;  %v2556_v34 = vadd.f32 %v2555_v12, %v6531_v17  ;;  %v2801_v31 = vpack.c.bf16 %v2741_v57, %v2737_v4  ;;  %v5400_v17 = vld [vmem:[%s7117_s5 + $0x38] sm:$0xff]   ;;  %v2667_v7 = vadd.f32 %v2666_v11, %v2554_v59  ;;  %v5402_v12 = vld [vmem:[%s7117_s5 + $0x30] sm:$0xff]  }
 0x219   :  { %v2557_v60 = vpop.f32.mrf.mxu0  ;;  %4729 = vmatpush3.bf16.msra.mxu0 %v5400_v17 }
 0x21a   :  { %v2670_v47 = vpop.f32.mrf.mxu1  ;;  %v2802_v36 = vpack.c.bf16 %v2742_v30, %v2738_v56  ;;  %v2558_v55 = vadd.f32 %v2557_v60, %v2445_v26  ;;  %v2669_v43 = vadd.f32 %v2668_v0, %v2556_v34  ;;  %v2455_v0 = vadd.f32 %v6543_v29, %v2342_v62  ;;  %4730 = vmatprep.subr.bf16.mxu0 %v5401_v46 }
 0x21b   :  { %v2559_v25 = vpop.f32.mrf.mxu0  ;;  %v2745_v30 = vmax.f32 %v2667_v7, 0.0  ;;  %v2457_v60 = vadd.f32 %v6549_v24, %v2344_v20  ;;  %v2352_v29 = vadd.f32 %v6555_v28, %v6504_v1  ;;  %v5405_v24 = vld [vmem:[%s7117_s5 + $0x60] sm:$0xff]  }
 0x21c   :  { %v2672_v15 = vpop.f32.mrf.mxu1  ;;  %v2671_v13 = vadd.f32 %v2670_v47, %v2558_v55  ;;  %v2560_v2 = vadd.f32 %v2559_v25, %v2447_v22  ;;  %3372 = vmatprep.mubr.bf16.mxu1 %v2802_v36  ;;  %v2746_v26 = vmax.f32 %v2669_v43, 0.0  ;;  %v5406_v7 = vld [vmem:[%s7117_s5 + $0x20] sm:$0xff]  }
 0x21d   :  { %v2563_v23 = vpop.f32.mrf.mxu0  ;;  %3373 = vmatmul.mubr.bf16.vlgmr.msra.gmra.mxu1 %v2801_v31  ;;  %4731 = vmatpush3.bf16.msra.mxu0 %v5402_v12  ;;  %v5404_v31 = vld [vmem:[%s7117_s5 + $0x28] sm:$0xff]  }
 0x21e   :  { %v2676_v9 = vpop.f32.mrf.mxu1  ;;  %v2673_v35 = vadd.f32 %v2672_v15, %v2560_v2  ;;  %v2749_v40 = vmax.f32 %v2671_v13, 0.0  ;;  %v2564_v34 = vadd.f32 %v2563_v23, %v6538_v27  ;;  %4732 = vmatprep.subr.bf16.mxu0 %v5403_v8  ;;  %v2354_v13 = vadd.f32 %v6561_v33, %v6507_v5  ;;  %v5407_v33 = vld [vmem:[%s7117_s5 + $0x58] sm:$0xff]  }
 0x21f   :  { %v2565_v48 = vpop.f32.mrf.mxu0  ;;  %v2465_v23 = vadd.f32 %v6557_v45, %v2352_v29  ;;  %v2362_v45 = vadd.f32 %v6569_v16, %v6504_v1 }
 0x220   :  { %v2678_v57 = vpop.f32.mrf.mxu1  ;;  %v2750_v11 = vmax.f32 %v2673_v35, 0.0  ;;  %v2566_v56 = vadd.f32 %v2565_v48, %v6545_v54  ;;  %v2805_v36 = vpack.c.bf16 %v2749_v40, %v2745_v30  ;;  %v2677_v62 = vadd.f32 %v2676_v9, %v2564_v34  ;;  %v5408_v30 = vld [vmem:[%s7117_s5 + $0x18] sm:$0xff]  }
 0x221   :  { %v2567_v4 = vpop.f32.mrf.mxu0  ;;  %4733 = vmatpush3.bf16.msra.mxu0 %v5404_v31  ;;  %v2475_v31 = vadd.f32 %v6571_v53, %v2362_v45  ;;  %v2372_v53 = vadd.f32 %v6583_v37, %v6504_v1  ;;  %v2374_v37 = vadd.f32 %v6589_v42, %v6507_v5 }
 0x222   :  { %v2680_v59 = vpop.f32.mrf.mxu1  ;;  %v2806_v47 = vpack.c.bf16 %v2750_v11, %v2746_v26  ;;  %v2568_v22 = vadd.f32 %v2567_v4, %v2455_v0  ;;  %v2679_v25 = vadd.f32 %v2678_v57, %v2566_v56  ;;  %4734 = vmatprep.subr.bf16.mxu0 %v5405_v24  ;;  %v2753_v40 = vmax.f32 %v2677_v62, 0.0 }
 0x223   :  { %v2569_v55 = vpop.f32.mrf.mxu0  ;;  %v2467_v0 = vadd.f32 %v6563_v21, %v2354_v13  ;;  %v5409_v21 = vld [vmem:[%s7117_s5 + $0x50] sm:$0xff]  }
 0x224   :  { %v2682_v54 = vpop.f32.mrf.mxu1  ;;  %v2681_v15 = vadd.f32 %v2680_v59, %v2568_v22  ;;  %v2570_v27 = vadd.f32 %v2569_v55, %v2457_v60  ;;  %3382 = vmatprep.mubr.bf16.mxu1 %v2806_v47  ;;  %v2754_v20 = vmax.f32 %v2679_v25, 0.0  ;;  %v2364_v47 = vadd.f32 %v6575_v14, %v6507_v5  ;;  %v5411_v14 = vld [vmem:[%s7117_s5 + $0x48] sm:$0xff]  }
 0x225   :  { %v2573_v43 = vpop.f32.mrf.mxu0  ;;  %3383 = vmatmul.mubr.bf16.gmra.mxu1 %v2805_v36  ;;  %4735 = vmatpush3.bf16.msra.mxu0 %v5406_v7  ;;  %v5412_v7 = vld [vmem:[%s7117_s5 + $0x8] sm:$0xff]  }
 0x226   :  { %v2686_v28 = vpop.f32.mrf.mxu1  ;;  %v2683_v2 = vadd.f32 %v2682_v54, %v2570_v27  ;;  %v2757_v63 = vmax.f32 %v2681_v15, 0.0  ;;  %v2574_v48 = vadd.f32 %v2573_v43, %v6552_v51  ;;  %4736 = vmatprep.subr.bf16.mxu0 %v5407_v33  ;;  %v5410_v54 = vld [vmem:[%s7117_s5 + $0x10] sm:$0xff]   ;;  %v2477_v13 = vadd.f32 %v6577_v49, %v2364_v47 }
 0x227   :  { %v2575_v17 = vpop.f32.mrf.mxu0 }
 0x228   :  { %v2688_v46 = vpop.f32.mrf.mxu1  ;;  %v2758_v35 = vmax.f32 %v2683_v2, 0.0  ;;  %v2576_v9 = vadd.f32 %v2575_v17, %v6559_v19  ;;  %v2809_v56 = vpack.c.bf16 %v2757_v63, %v2753_v40  ;;  %v2687_v59 = vadd.f32 %v2686_v28, %v2574_v48 }
 0x229   :  { %v2577_v57 = vpop.f32.mrf.mxu0  ;;  %4737 = vmatpush3.bf16.msra.mxu0 %v5408_v30  ;;  %v2487_v30 = vadd.f32 %v6591_v39, %v2374_v37 }
 0x22a   :  { %v2690_v12 = vpop.f32.mrf.mxu1  ;;  %v2810_v26 = vpack.c.bf16 %v2758_v35, %v2754_v20  ;;  %v2578_v11 = vadd.f32 %v2577_v57, %v2465_v23  ;;  %v2689_v34 = vadd.f32 %v2688_v46, %v2576_v9  ;;  %4738 = vmatprep.subr.bf16.mxu0 %v5409_v21  ;;  %v2761_v24 = vmax.f32 %v2687_v59, 0.0 }
 0x22b   :  { %v2579_v8 = vpop.f32.mrf.mxu0  ;;  %v2382_v59 = vadd.f32 %v6597_v38, %v6504_v1 }
 0x22c   :  { %v2692_v19 = vpop.f32.mrf.mxu1  ;;  %v2691_v4 = vadd.f32 %v2690_v12, %v2578_v11  ;;  %v2580_v51 = vadd.f32 %v2579_v8, %v2467_v0  ;;  %3392 = vmatprep.mubr.bf16.mxu1 %v2810_v26  ;;  %v2762_v25 = vmax.f32 %v2689_v34, 0.0  ;;  %v2485_v12 = vadd.f32 %v6585_v44, %v2372_v53 }
 0x22d   :  { %v2583_v60 = vpop.f32.mrf.mxu0  ;;  %3393 = vmatmul.mubr.bf16.gmra.mxu1 %v2809_v56  ;;  %4739 = vmatpush3.bf16.msra.mxu0 %v5410_v54  ;;  %v2495_v54 = vadd.f32 %v6599_v10, %v2382_v59 }
 0x22e   :  { %v2696_v16 = vpop.f32.mrf.mxu1  ;;  %v2693_v22 = vadd.f32 %v2692_v19, %v2580_v51  ;;  %v2765_v29 = vmax.f32 %v2691_v4, 0.0  ;;  %v2584_v62 = vadd.f32 %v2583_v60, %v6566_v52  ;;  %4740 = vmatprep.subr.bf16.mxu0 %v5411_v14 }
 0x22f   :  { %v2585_v36 = vpop.f32.mrf.mxu0 }
 0x230   :  { %v2698_v55 = vpop.f32.mrf.mxu1  ;;  %v2766_v15 = vmax.f32 %v2693_v22, 0.0  ;;  %v2586_v27 = vadd.f32 %v2585_v36, %v6573_v18  ;;  %v2813_v17 = vpack.c.bf16 %v2765_v29, %v2761_v24  ;;  %v2697_v35 = vadd.f32 %v2696_v16, %v2584_v62 }
 0x231   :  { %v2587_v43 = vpop.f32.mrf.mxu0  ;;  %4741 = vmatpush3.bf16.msra.mxu0 %v5412_v7 }
 0x232   :  { %v2700_v28 = vpop.f32.mrf.mxu1  ;;  %v2814_v2 = vpack.c.bf16 %v2766_v15, %v2762_v25  ;;  %v2588_v63 = vadd.f32 %v2587_v43, %v2475_v31  ;;  %v2699_v23 = vadd.f32 %v2698_v55, %v2586_v27  ;;  %v2769_v45 = vmax.f32 %v2697_v35, 0.0  ;;  %v7150_v35 = vld [vmem:[#allocation20_spill] sm:$0xff] }
 0x233   :  { %v2589_v46 = vpop.f32.mrf.mxu0 }
 0x234   :  { %v2702_v18 = vpop.f32.mrf.mxu1  ;;  %v2701_v20 = vadd.f32 %v2700_v28, %v2588_v63  ;;  %v2590_v52 = vadd.f32 %v2589_v46, %v2477_v13  ;;  %3402 = vmatprep.mubr.bf16.mxu1 %v2814_v2  ;;  %v2770_v0 = vmax.f32 %v2699_v23, 0.0  ;;  %v2392_v63 = vadd.f32 %v6611_v6, %v6504_v1  ;;  %v7151_v1 = vld [vmem:[#allocation18_spill] sm:$0xff] }
 0x235   :  { %v2593_v49 = vpop.f32.mrf.mxu0  ;;  %3403 = vmatmul.mubr.bf16.gmra.mxu1 %v2813_v17 }
 0x236   :  { %v2706_v9 = vpop.f32.mrf.mxu1  ;;  %v2703_v33 = vadd.f32 %v2702_v18, %v2590_v52  ;;  %v2773_v40 = vmax.f32 %v2701_v20, 0.0  ;;  %v2594_v56 = vadd.f32 %v2593_v49, %v6580_v41  ;;  %v2384_v41 = vadd.f32 %v6603_v3, %v6507_v5 }
 0x237   :  { %v2595_v48 = vpop.f32.mrf.mxu0  ;;  %v2505_v49 = vadd.f32 %v7150_v35, %v2392_v63 }
 0x238   :  { %v2708_v57 = vpop.f32.mrf.mxu1  ;;  %v2774_v26 = vmax.f32 %v2703_v33, 0.0  ;;  %v2596_v11 = vadd.f32 %v2595_v48, %v6587_v50  ;;  %v2817_v4 = vpack.c.bf16 %v2773_v40, %v2769_v45  ;;  %v2707_v50 = vadd.f32 %v2706_v9, %v2594_v56  ;;  %v7152_v40 = vld [vmem:[#allocation19_spill] sm:$0xff] }
 0x239   :  { %v2597_v8 = vpop.f32.mrf.mxu0  ;;  %v2497_v62 = vadd.f32 %v6605_v32, %v2384_v41 }
 0x23a   :  { %v2710_v19 = vpop.f32.mrf.mxu1  ;;  %v2818_v34 = vpack.c.bf16 %v2774_v26, %v2770_v0  ;;  %v2598_v42 = vadd.f32 %v2597_v8, %v2485_v12  ;;  %v2709_v44 = vadd.f32 %v2708_v57, %v2596_v11  ;;  %v2777_v15 = vmax.f32 %v2707_v50, 0.0  ;;  %v7153_v0 = vld [vmem:[#allocation17_spill] sm:$0xff]  ;;  %v5413_v50 = vld [vmem:[%s7117_s5 + $0x40] sm:$0xff]  }
 0x23b   :  { %v2599_v51 = vpop.f32.mrf.mxu0  ;;  %4742 = vmatprep.subr.bf16.mxu0 %v5413_v50 }
 0x23c   :  { %v2712_v21 = vpop.f32.mrf.mxu1  ;;  %v2711_v60 = vadd.f32 %v2710_v19, %v2598_v42  ;;  %v2600_v16 = vadd.f32 %v2599_v51, %v2487_v30  ;;  %3412 = vmatprep.mubr.bf16.mxu1 %v2818_v34  ;;  %v2778_v31 = vmax.f32 %v2709_v44, 0.0 }
 0x23d   :  { %v2603_v47 = vpop.f32.mrf.mxu0  ;;  %3413 = vmatmul.mubr.bf16.gmra.mxu1 %v2817_v4 }
 0x23e   :  { %v2716_v22 = vpop.f32.mrf.mxu1  ;;  %v2713_v39 = vadd.f32 %v2712_v21, %v2600_v16  ;;  %v2781_v29 = vmax.f32 %v2711_v60, 0.0  ;;  %v2604_v27 = vadd.f32 %v2603_v47, %v6594_v61  ;;  %v7149_v61 = vld [vmem:[#allocation21_spill] sm:$0xff]  ;;  %v5414_v47 = vld [vmem:[%s7117_s5] sm:$0xff]  }
 0x23f   :  { %v2605_v36 = vpop.f32.mrf.mxu0  ;;  %v2394_v7 = vadd.f32 %v7149_v61, %v6507_v5  ;;  %4743 = vmatpush3.bf16.msra.mxu0 %v5414_v47 }
 0x240   :  { %v2718_v55 = vpop.f32.mrf.mxu1  ;;  %v2782_v25 = vmax.f32 %v2713_v39, 0.0  ;;  %v2606_v38 = vadd.f32 %v2605_v36, %v6601_v58  ;;  %v2821_v3 = vpack.c.bf16 %v2781_v29, %v2777_v15  ;;  %v2717_v58 = vadd.f32 %v2716_v22, %v2604_v27  ;;  %v5415_v29 = vld [vmem:[%s7119_s7 + $0x38] sm:$0xff]   ;;  %v5416_v36 = vld [vmem:[%s7119_s7 + $0x30] sm:$0xff]  }
 0x241   :  { %v2607_v14 = vpop.f32.mrf.mxu0  ;;  %v2507_v26 = vadd.f32 %v7153_v0, %v2394_v7  ;;  %4820 = vmatprep.subr.bf16.mxu1 %v5415_v29 }
 0x242   :  { %v2720_v24 = vpop.f32.mrf.mxu1  ;;  %v2822_v43 = vpack.c.bf16 %v2782_v25, %v2778_v31  ;;  %v2608_v28 = vadd.f32 %v2607_v14, %v2495_v54  ;;  %v2719_v10 = vadd.f32 %v2718_v55, %v2606_v38  ;;  %v2785_v33 = vmax.f32 %v2717_v58, 0.0  ;;  %4821 = vmatpush3.bf16.msra.mxu1 %v5415_v29  ;;  %v5417_v54 = vld [vmem:[%s7119_s7 + $0x28] sm:$0xff]  }
 0x243   :  { %v2609_v13 = vpop.f32.mrf.mxu0  ;;  %4822 = vmatprep.subr.bf16.mxu1 %v5416_v36 }
 0x244   :  { %v2722_v2 = vpop.f32.mrf.mxu1  ;;  %v2721_v53 = vadd.f32 %v2720_v24, %v2608_v28  ;;  %v2610_v17 = vadd.f32 %v2609_v13, %v2497_v62  ;;  %3422 = vmatprep.mubr.bf16.mxu1 %v2822_v43  ;;  %v2786_v9 = vmax.f32 %v2719_v10, 0.0  ;;  %v7154_v10 = vld [vmem:[#allocation16_spill] sm:$0xff] }
 0x245   :  { %v2613_v46 = vpop.f32.mrf.mxu0  ;;  %3423 = vmatmul.mubr.bf16.gmra.mxu1 %v2821_v3  ;;  %v7156_v58 = vsub.s32 0, %v7154_v10 }
 0x246   :  { %v2726_v18 = vpop.f32.mrf.mxu1  ;;  %v2723_v32 = vadd.f32 %v2722_v2, %v2610_v17  ;;  %v2789_v23 = vmax.f32 %v2721_v53, 0.0  ;;  %v2614_v48 = vadd.f32 %v2613_v46, %v7152_v40  ;;  %4823 = vmatpush3.bf16.msra.mxu1 %v5416_v36  ;;  %v2895_v2 = vld [vmem:[#allocation6] sm:$0x3]  ;;  %v7155_v53 = vsub.s32 1, %v7154_v10 }
 0x247   :  { %v2615_v20 = vpop.f32.mrf.mxu0  ;;  %4824 = vmatprep.subr.bf16.mxu1 %v5417_v54  ;;  %v6758_v46 = vrot.slane %v2895_v2, %v7156_v58 }
 0x248   :  { %v2728_v52 = vpop.f32.mrf.mxu1  ;;  %v2790_v37 = vmax.f32 %v2723_v32, 0.0  ;;  %v2616_v6 = vadd.f32 %v2615_v20, %v7151_v1  ;;  %v2825_v5 = vpack.c.bf16 %v2789_v23, %v2785_v33  ;;  %v2727_v34 = vadd.f32 %v2726_v18, %v2614_v48 }
 0x249   :  { %v2617_v57 = vpop.f32.mrf.mxu0  ;;  %v6754_v17 = vrot.slane %v2895_v2, %v7155_v53 }
 0x24a   :  { %v2730_v12 = vpop.f32.mrf.mxu1  ;;  %v2826_v11 = vpack.c.bf16 %v2790_v37, %v2786_v9  ;;  %v2618_v45 = vadd.f32 %v2617_v57, %v2505_v49  ;;  %v2729_v8 = vadd.f32 %v2728_v52, %v2616_v6  ;;  %v2793_v44 = vmax.f32 %v2727_v34, 0.0  ;;  %4825 = vmatpush3.bf16.msra.mxu1 %v5417_v54 }
 0x24b   :  { %v2619_v56 = vpop.f32.mrf.mxu0 }
 0x24c   :  { %v2731_v19 = vadd.f32 %v2730_v12, %v2618_v45  ;;  %v2620_v30 = vadd.f32 %v2619_v56, %v2507_v26  ;;  %3432 = vmatprep.mubr.bf16.mxu1 %v2826_v11  ;;  %v2732_v42 = vpop.f32.mrf.mxu1  ;;  %v2794_v21 = vmax.f32 %v2729_v8, 0.0 }
 0x24d   :  { %3433 = vmatmul.mubr.bf16.gmra.mxu1 %v2825_v5 }
 0x24e   :  { %v2733_v4 = vadd.f32 %v2732_v42, %v2620_v30  ;;  %v2797_v51 = vmax.f32 %v2731_v19, 0.0 }
 0x250   :  { %v2798_v59 = vmax.f32 %v2733_v4, 0.0  ;;  %v2829_v16 = vpack.c.bf16 %v2797_v51, %v2793_v44 }
 0x252   :  { %v2830_v60 = vpack.c.bf16 %v2798_v59, %v2794_v21 }
 0x254   :  { %3442 = vmatprep.mubr.bf16.mxu1 %v2830_v60 }
 0x255   :  { %3443 = vmatmul.mubr.bf16.gmra.mxu1 %v2829_v16 }
 0x25d   :  { %v3261_v22 = vpop.f32.mrf.mxu0 }
 0x25e   :  { %v3262_v20 = vadd.f32 %v3261_v22, %v6758_v46 }
 0x25f   :  { %v3263_v41 = vpop.f32.mrf.mxu0 }
 0x260   :  { %v3264_v32 = vadd.f32 %v3263_v41, %v6754_v17 }
 0x261   :  { %v3265_v39 = vpop.f32.mrf.mxu0 }
 0x262   :  { %v3266_v23 = vadd.f32 %v3265_v39, %v6758_v46 }
 0x263   :  { %v3267_v55 = vpop.f32.mrf.mxu0 }
 0x264   :  { %v3268_v35 = vadd.f32 %v3267_v55, %v6754_v17 }
 0x265   :  { %v3271_v31 = vpop.f32.mrf.mxu0 }
 0x266   :  { %v3272_v8 = vadd.f32 %v3271_v31, %v6758_v46 }
 0x267   :  { %v3273_v25 = vpop.f32.mrf.mxu0 }
 0x268   :  { %v3274_v45 = vadd.f32 %v3273_v25, %v6754_v17 }
 0x269   :  { %v3275_v38 = vpop.f32.mrf.mxu0 }
 0x26a   :  { %v3276_v5 = vadd.f32 %v3275_v38, %v6758_v46 }
 0x26b   :  { %v3277_v15 = vpop.f32.mrf.mxu0 }
 0x26c   :  { %v3278_v34 = vadd.f32 %v3277_v15, %v6754_v17 }
 0x26d   :  { %v3281_v27 = vpop.f32.mrf.mxu0 }
 0x26e   :  { %v3282_v54 = vadd.f32 %v3281_v27, %v6758_v46 }
 0x26f   :  { %v3283_v14 = vpop.f32.mrf.mxu0 }
 0x270   :  { %v3284_v29 = vadd.f32 %v3283_v14, %v6754_v17 }
 0x271   :  { %v3285_v24 = vpop.f32.mrf.mxu0 }
 0x272   :  { %v3286_v36 = vadd.f32 %v3285_v24, %v6758_v46 }
 0x273   :  { %v3287_v62 = vpop.f32.mrf.mxu0 }
 0x274   :  { %v3288_v38 = vadd.f32 %v3287_v62, %v6754_v17 }
 0x275   :  { %v6742_v43 = vpop.f32.mrf.mxu0 }
 0x277   :  { %v6744_v28 = vpop.f32.mrf.mxu0 }
 0x278   :  { %v3294_v27 = vadd.f32 %v6744_v28, %v6754_v17 }
 0x279   :  { %v6746_v3 = vpop.f32.mrf.mxu0 }
 0x27a   :  { %v3296_v62 = vadd.f32 %v6746_v3, %v6758_v46 }
 0x27b   :  { %v6748_v13 = vpop.f32.mrf.mxu0 }
 0x27d   :  { %v6750_v63 = vpop.f32.mrf.mxu0 }
 0x27f   :  { %v6760_v61 = vpop.f32.mrf.mxu0 }
 0x281   :  { %v6766_v37 = vpop.f32.mrf.mxu0 }
 0x283   :  { %v6768_v0 = vpop.f32.mrf.mxu0 }
 0x285   :  { %v6774_v51 = vpop.f32.mrf.mxu0 }
 0x287   :  { %v6776_v22 = vpop.f32.mrf.mxu0 }
 0x289   :  { %v3315_v10 = vpop.f32.mrf.mxu0 }
 0x28b   :  { %v3317_v24 = vpop.f32.mrf.mxu0 }
 0x2dd   :  { %v3374_v18 = vpop.f32.mrf.mxu1 }
 0x2de   :  { %v3375_v1 = vadd.f32 %v3374_v18, %v3262_v20 }
 0x2df   :  { %v3376_v7 = vpop.f32.mrf.mxu1 }
 0x2e0   :  { %v3377_v49 = vadd.f32 %v3376_v7, %v3264_v32  ;;  %v3453_v26 = vmax.f32 %v3375_v1, 0.0 }
 0x2e1   :  { %v3378_v52 = vpop.f32.mrf.mxu1 }
 0x2e2   :  { %v3379_v9 = vadd.f32 %v3378_v52, %v3266_v23  ;;  %v3454_v57 = vmax.f32 %v3377_v49, 0.0  ;;  %v3292_v49 = vadd.f32 %v6742_v43, %v6758_v46 }
 0x2e3   :  { %v3380_v6 = vpop.f32.mrf.mxu1 }
 0x2e4   :  { %v3381_v33 = vadd.f32 %v3380_v6, %v3268_v35  ;;  %v3455_v40 = vmax.f32 %v3379_v9, 0.0  ;;  %v3298_v6 = vadd.f32 %v6748_v13, %v6754_v17  ;;  %v3306_v13 = vadd.f32 %v6766_v37, %v6758_v46 }
 0x2e5   :  { %v3384_v48 = vpop.f32.mrf.mxu1 }
 0x2e6   :  { %v3456_v12 = vmax.f32 %v3381_v33, 0.0  ;;  %v3485_v19 = vpack.c.bf16 %v3455_v40, %v3453_v26  ;;  %v3385_v21 = vadd.f32 %v3384_v48, %v3272_v8  ;;  %v3321_v48 = vpop.f32.mrf.mxu0  ;;  %v3304_v8 = vadd.f32 %v6760_v61, %v6754_v17 }
 0x2e7   :  { %v3386_v11 = vpop.f32.mrf.mxu1 }
 0x2e8   :  { %v3486_v56 = vpack.c.bf16 %v3456_v12, %v3454_v57  ;;  %v3387_v42 = vadd.f32 %v3386_v11, %v3274_v45  ;;  %v3457_v41 = vmax.f32 %v3385_v21, 0.0 }
 0x2e9   :  { %v3388_v30 = vpop.f32.mrf.mxu1 }
 0x2ea   :  { %v3389_v4 = vadd.f32 %v3388_v30, %v3276_v5  ;;  %3668 = vmatprep.mubr.bf16.mxu0 %v3486_v56  ;;  %v3458_v50 = vmax.f32 %v3387_v42, 0.0  ;;  %v3323_v5 = vpop.f32.mrf.mxu0  ;;  %v3302_v30 = vadd.f32 %v6750_v63, %v6758_v46 }
 0x2eb   :  { %v3390_v59 = vpop.f32.mrf.mxu1  ;;  %3669 = vmatmul.mubr.bf16.vlgmr.msra.gmra.mxu0 %v3485_v19 }
 0x2ec   :  { %v3391_v44 = vadd.f32 %v3390_v59, %v3278_v34  ;;  %v3459_v60 = vmax.f32 %v3389_v4, 0.0  ;;  %v3308_v4 = vadd.f32 %v6768_v0, %v6754_v17  ;;  %v3316_v0 = vadd.f32 %v3315_v10, %v6758_v46 }
 0x2ed   :  { %v3394_v16 = vpop.f32.mrf.mxu1 }
 0x2ee   :  { %v3460_v47 = vmax.f32 %v3391_v44, 0.0  ;;  %v3487_v31 = vpack.c.bf16 %v3459_v60, %v3457_v41  ;;  %v3395_v53 = vadd.f32 %v3394_v16, %v3282_v54  ;;  %v3325_v44 = vpop.f32.mrf.mxu0  ;;  %v3312_v54 = vadd.f32 %v6774_v51, %v6758_v46 }
 0x2ef   :  { %v3396_v39 = vpop.f32.mrf.mxu1  ;;  %v3324_v51 = vadd.f32 %v3323_v5, %v6754_v17 }
 0x2f0   :  { %v3488_v55 = vpack.c.bf16 %v3460_v47, %v3458_v50  ;;  %v3397_v15 = vadd.f32 %v3396_v39, %v3284_v29  ;;  %v3461_v20 = vmax.f32 %v3395_v53, 0.0  ;;  %v3327_v39 = vpop.f32.mrf.mxu0 }
 0x2f1   :  { %v3398_v25 = vpop.f32.mrf.mxu1 }
 0x2f2   :  { %v3399_v2 = vadd.f32 %v3398_v25, %v3286_v36  ;;  %3676 = vmatprep.mubr.bf16.mxu0 %v3488_v55  ;;  %v3462_v14 = vmax.f32 %v3397_v15, 0.0  ;;  %v3314_v36 = vadd.f32 %v6776_v22, %v6754_v17  ;;  %v3331_v53 = vpop.f32.mrf.mxu0 }
 0x2f3   :  { %v3400_v58 = vpop.f32.mrf.mxu1  ;;  %3677 = vmatmul.mubr.bf16.gmra.mxu0 %v3487_v31 }
 0x2f4   :  { %v3401_v18 = vadd.f32 %v3400_v58, %v3288_v38  ;;  %v3463_v7 = vmax.f32 %v3399_v2, 0.0  ;;  %v3318_v38 = vadd.f32 %v3317_v24, %v6754_v17 }
 0x2f5   :  { %v3404_v32 = vpop.f32.mrf.mxu1 }
 0x2f6   :  { %v3464_v23 = vmax.f32 %v3401_v18, 0.0  ;;  %v3489_v9 = vpack.c.bf16 %v3463_v7, %v3461_v20  ;;  %v3405_v57 = vadd.f32 %v3404_v32, %v3292_v49 }
 0x2f7   :  { %v3406_v52 = vpop.f32.mrf.mxu1 }
 0x2f8   :  { %v3490_v35 = vpack.c.bf16 %v3464_v23, %v3462_v14  ;;  %v3407_v33 = vadd.f32 %v3406_v52, %v3294_v27  ;;  %v3465_v56 = vmax.f32 %v3405_v57, 0.0  ;;  %v3333_v23 = vpop.f32.mrf.mxu0  ;;  %v3326_v27 = vadd.f32 %v3325_v44, %v6758_v46 }
 0x2f9   :  { %v3408_v1 = vpop.f32.mrf.mxu1 }
 0x2fa   :  { %v3409_v40 = vadd.f32 %v3408_v1, %v3296_v62  ;;  %3684 = vmatprep.mubr.bf16.mxu0 %v3490_v35  ;;  %v3466_v3 = vmax.f32 %v3407_v33, 0.0  ;;  %v3322_v62 = vadd.f32 %v3321_v48, %v6758_v46  ;;  %v3335_v33 = vpop.f32.mrf.mxu0  ;;  %v3334_v48 = vadd.f32 %v3333_v23, %v6754_v17 }
 0x2fb   :  { %v3410_v12 = vpop.f32.mrf.mxu1  ;;  %3685 = vmatmul.mubr.bf16.gmra.mxu0 %v3489_v9  ;;  %v3328_v9 = vadd.f32 %v3327_v39, %v6754_v17  ;;  %v5421_v39 = vld [vmem:[%s7119_s7 + $0x8] sm:$0xff]  }
 0x2fc   :  { %v3411_v28 = vadd.f32 %v3410_v12, %v3298_v6  ;;  %v3467_v26 = vmax.f32 %v3409_v40, 0.0 }
 0x2fd   :  { %v3414_v11 = vpop.f32.mrf.mxu1 }
 0x2fe   :  { %v3468_v45 = vmax.f32 %v3411_v28, 0.0  ;;  %v3491_v34 = vpack.c.bf16 %v3467_v26, %v3465_v56  ;;  %v3415_v60 = vadd.f32 %v3414_v11, %v3302_v30 }
 0x2ff   :  { %v3416_v43 = vpop.f32.mrf.mxu1 }
 0x300   :  { %v3492_v19 = vpack.c.bf16 %v3468_v45, %v3466_v3  ;;  %v3417_v21 = vadd.f32 %v3416_v43, %v3304_v8  ;;  %v3469_v29 = vmax.f32 %v3415_v60, 0.0  ;;  %v3337_v45 = vpop.f32.mrf.mxu0  ;;  %v3336_v43 = vadd.f32 %v3335_v33, %v6758_v46 }
 0x301   :  { %v3418_v42 = vpop.f32.mrf.mxu1 }
 0x302   :  { %v3419_v59 = vadd.f32 %v3418_v42, %v3306_v13  ;;  %3692 = vmatprep.mubr.bf16.mxu0 %v3492_v19  ;;  %v3470_v37 = vmax.f32 %v3417_v21, 0.0  ;;  %v3332_v13 = vadd.f32 %v3331_v53, %v6758_v46  ;;  %v5418_v46 = vld [vmem:[%s7119_s7 + $0x20] sm:$0xff]  }
 0x303   :  { %v3420_v16 = vpop.f32.mrf.mxu1  ;;  %3693 = vmatmul.mubr.bf16.gmra.mxu0 %v3491_v34  ;;  %v3338_v34 = vadd.f32 %v3337_v45, %v6754_v17  ;;  %4826 = vmatprep.subr.bf16.mxu1 %v5418_v46  ;;  %v5419_v17 = vld [vmem:[%s7119_s7 + $0x18] sm:$0xff]  }
 0x304   :  { %v3421_v61 = vadd.f32 %v3420_v16, %v3308_v4  ;;  %v3471_v50 = vmax.f32 %v3419_v59, 0.0  ;;  %4827 = vmatpush3.bf16.msra.mxu1 %v5418_v46 }
 0x305   :  { %v3424_v47 = vpop.f32.mrf.mxu1  ;;  %4828 = vmatprep.subr.bf16.mxu1 %v5419_v17 }
 0x306   :  { %v3472_v41 = vmax.f32 %v3421_v61, 0.0  ;;  %v3493_v31 = vpack.c.bf16 %v3471_v50, %v3469_v29  ;;  %v3425_v58 = vadd.f32 %v3424_v47, %v3312_v54  ;;  %v5422_v29 = vld [vmem:[%s7119_s7] sm:$0xff]  }
 0x307   :  { %v3426_v63 = vpop.f32.mrf.mxu1  ;;  %v6830_v54 = vld [vmem:[%s7118_s6] ss:$0 sm:$0xff] }
 0x308   :  { %v3494_v55 = vpack.c.bf16 %v3472_v41, %v3470_v37  ;;  %v3427_v15 = vadd.f32 %v3426_v63, %v3314_v36  ;;  %v3473_v20 = vmax.f32 %v3425_v58, 0.0  ;;  %4829 = vmatpush3.bf16.msra.mxu1 %v5419_v17  ;;  %v5420_v41 = vld [vmem:[%s7119_s7 + $0x10] sm:$0xff]   ;;  %v5423_v63 = vld [vmem:[#allocation9 + $0x18] sm:$0xff]  }
 0x309   :  { %v3428_v25 = vpop.f32.mrf.mxu1  ;;  %4830 = vmatprep.subr.bf16.mxu1 %v5420_v41 }
 0x30a   :  { %v3429_v2 = vadd.f32 %v3428_v25, %v3316_v0  ;;  %3700 = vmatprep.mubr.bf16.mxu0 %v3494_v55  ;;  %v3474_v14 = vmax.f32 %v3427_v15, 0.0 }
 0x30b   :  { %v3430_v18 = vpop.f32.mrf.mxu1  ;;  %3701 = vmatmul.mubr.bf16.gmra.mxu0 %v3493_v31 }
 0x30c   :  { %v3431_v7 = vadd.f32 %v3430_v18, %v3318_v38  ;;  %v3475_v32 = vmax.f32 %v3429_v2, 0.0  ;;  %4831 = vmatpush3.bf16.msra.mxu1 %v5420_v41 }
 0x30d   :  { %v3434_v22 = vpop.f32.mrf.mxu1  ;;  %4832 = vmatprep.subr.bf16.mxu1 %v5421_v39 }
 0x30e   :  { %v3476_v10 = vmax.f32 %v3431_v7, 0.0  ;;  %v3495_v35 = vpack.c.bf16 %v3475_v32, %v3473_v20  ;;  %v3435_v40 = vadd.f32 %v3434_v22, %v3322_v62 }
 0x30f   :  { %v3436_v52 = vpop.f32.mrf.mxu1 }
 0x310   :  { %v3496_v24 = vpack.c.bf16 %v3476_v10, %v3474_v14  ;;  %v3437_v1 = vadd.f32 %v3436_v52, %v3324_v51  ;;  %v3477_v5 = vmax.f32 %v3435_v40, 0.0  ;;  %4833 = vmatpush3.bf16.msra.mxu1 %v5421_v39 }
 0x311   :  { %v3438_v49 = vpop.f32.mrf.mxu1  ;;  %4834 = vmatprep.subr.bf16.mxu1 %v5422_v29 }
 0x312   :  { %v3439_v6 = vadd.f32 %v3438_v49, %v3326_v27  ;;  %3708 = vmatprep.mubr.bf16.mxu0 %v3496_v24  ;;  %v3478_v11 = vmax.f32 %v3437_v1, 0.0 }
 0x313   :  { %v3440_v57 = vpop.f32.mrf.mxu1  ;;  %3709 = vmatmul.mubr.bf16.gmra.mxu0 %v3495_v35 }
 0x314   :  { %v3441_v12 = vadd.f32 %v3440_v57, %v3328_v9  ;;  %v3479_v28 = vmax.f32 %v3439_v6, 0.0  ;;  %4835 = vmatpush3.bf16.msra.mxu1 %v5422_v29 }
 0x315   :  { %v3444_v26 = vpop.f32.mrf.mxu1  ;;  %4852 = vmatprep.subr.bf16.mxu1 %v5423_v63 }
 0x316   :  { %v3480_v3 = vmax.f32 %v3441_v12, 0.0  ;;  %v3497_v19 = vpack.c.bf16 %v3479_v28, %v3477_v5  ;;  %v3445_v21 = vadd.f32 %v3444_v26, %v3332_v13 }
 0x317   :  { %v3446_v56 = vpop.f32.mrf.mxu1 }
 0x318   :  { %v3498_v8 = vpack.c.bf16 %v3480_v3, %v3478_v11  ;;  %v3447_v42 = vadd.f32 %v3446_v56, %v3334_v48  ;;  %v3481_v50 = vmax.f32 %v3445_v21, 0.0 }
 0x319   :  { %v3448_v30 = vpop.f32.mrf.mxu1 }
 0x31a   :  { %v3449_v4 = vadd.f32 %v3448_v30, %v3336_v43  ;;  %3716 = vmatprep.mubr.bf16.mxu0 %v3498_v8  ;;  %v3482_v16 = vmax.f32 %v3447_v42, 0.0 }
 0x31b   :  { %v3450_v59 = vpop.f32.mrf.mxu1  ;;  %3717 = vmatmul.mubr.bf16.gmra.mxu0 %v3497_v19 }
 0x31c   :  { %v3451_v44 = vadd.f32 %v3450_v59, %v3338_v34  ;;  %v3483_v60 = vmax.f32 %v3449_v4, 0.0 }
 0x31e   :  { %v3484_v61 = vmax.f32 %v3451_v44, 0.0  ;;  %v3499_v37 = vpack.c.bf16 %v3483_v60, %v3481_v50 }
 0x320   :  { %v3500_v47 = vpack.c.bf16 %v3484_v61, %v3482_v16 }
 0x322   :  { %3724 = vmatprep.mubr.bf16.mxu0 %v3500_v47 }
 0x323   :  { %3725 = vmatmul.mubr.bf16.gmra.mxu0 %v3499_v37 }
 0x3ab   :  { %v4744_v36 = vpop.f32.mrf.mxu0 }
 0x3ad   :  { %v4745_v0 = vpop.f32.mrf.mxu0 }
 0x3ae   :  { %v4746_v55 = vadd.f32 %v4745_v0, %v4744_v36 }
 0x3af   :  { %v4747_v31 = vpop.f32.mrf.mxu0 }
 0x3b0   :  { %v3671_v38 = vadd.f32 %v4746_v55, %v6830_v54 }
 0x3b1   :  { %v4748_v25 = vpop.f32.mrf.mxu0 }
 0x3b2   :  { %v4749_v15 = vadd.f32 %v4748_v25, %v4747_v31  ;;  %v3733_v18 = vmax.f32 %v3671_v38, 0.0 }
 0x3b3   :  { %v4750_v2 = vpop.f32.mrf.mxu0 }
 0x3b4   :  { %v3674_v53 = vadd.f32 %v4749_v15, %v6830_v54 }
 0x3b5   :  { %v4751_v58 = vpop.f32.mrf.mxu0 }
 0x3b6   :  { %v3734_v7 = vmax.f32 %v3674_v53, 0.0  ;;  %v4752_v32 = vadd.f32 %v4751_v58, %v4750_v2 }
 0x3b7   :  { %v4753_v22 = vpop.f32.mrf.mxu0 }
 0x3b8   :  { %v3749_v14 = vpack.c.bf16 %v3734_v7, %v3733_v18  ;;  %v3679_v23 = vadd.f32 %v4752_v32, %v6830_v54 }
 0x3b9   :  { %v4754_v10 = vpop.f32.mrf.mxu0 }
 0x3ba   :  { %v4755_v20 = vadd.f32 %v4754_v10, %v4753_v22  ;;  %4836 = vmatprep.mubr.bf16.mxu1 %v3749_v14  ;;  %v3735_v24 = vmax.f32 %v3679_v23, 0.0 }
 0x3bb   :  { %v4756_v52 = vpop.f32.mrf.mxu0 }
 0x3bc   :  { %v3682_v51 = vadd.f32 %v4755_v20, %v6830_v54 }
 0x3bd   :  { %v4757_v27 = vpop.f32.mrf.mxu0 }
 0x3be   :  { %v3736_v62 = vmax.f32 %v3682_v51, 0.0  ;;  %v4758_v35 = vadd.f32 %v4757_v27, %v4756_v52 }
 0x3bf   :  { %v4759_v49 = vpop.f32.mrf.mxu0 }
 0x3c0   :  { %v3750_v9 = vpack.c.bf16 %v3736_v62, %v3735_v24  ;;  %v3687_v6 = vadd.f32 %v4758_v35, %v6830_v54 }
 0x3c1   :  { %v4760_v1 = vpop.f32.mrf.mxu0 }
 0x3c2   :  { %v4761_v33 = vadd.f32 %v4760_v1, %v4759_v49  ;;  %4837 = vmatmul.mubr.bf16.vlgmr.msra.gmra.mxu1 %v3750_v9  ;;  %v3737_v28 = vmax.f32 %v3687_v6, 0.0  ;;  %v5424_v9 = vld [vmem:[#allocation9 + $0x10] sm:$0xff]   ;;  %v5425_v1 = vld [vmem:[#allocation9 + $0x8] sm:$0xff]   ;;  %v5426_v6 = vld [vmem:[#allocation9] sm:$0xff]  }
 0x3c3   :  { %v4762_v40 = vpop.f32.mrf.mxu0  ;;  %4853 = vmatpush3.bf16.msra.mxu1 %v5423_v63 }
 0x3c4   :  { %v3690_v57 = vadd.f32 %v4761_v33, %v6830_v54  ;;  %4854 = vmatprep.subr.bf16.mxu1 %v5424_v9 }
 0x3c5   :  { %v4763_v12 = vpop.f32.mrf.mxu0 }
 0x3c6   :  { %v3738_v26 = vmax.f32 %v3690_v57, 0.0  ;;  %v4764_v11 = vadd.f32 %v4763_v12, %v4762_v40  ;;  %v4706_v57 = vld [vmem:[#allocation7] ss:$0 sm:$0xff] }
 0x3c7   :  { %v4765_v3 = vpop.f32.mrf.mxu0  ;;  %4855 = vmatpush3.bf16.msra.mxu1 %v5424_v9 }
 0x3c8   :  { %v3751_v45 = vpack.c.bf16 %v3738_v26, %v3737_v28  ;;  %v3695_v56 = vadd.f32 %v4764_v11, %v6830_v54  ;;  %4856 = vmatprep.subr.bf16.mxu1 %v5425_v1 }
 0x3c9   :  { %v4766_v5 = vpop.f32.mrf.mxu0 }
 0x3ca   :  { %v4767_v48 = vadd.f32 %v4766_v5, %v4765_v3  ;;  %4840 = vmatprep.mubr.bf16.mxu1 %v3751_v45  ;;  %v3739_v19 = vmax.f32 %v3695_v56, 0.0 }
 0x3cb   :  { %v4768_v43 = vpop.f32.mrf.mxu0  ;;  %4857 = vmatpush3.bf16.msra.mxu1 %v5425_v1 }
 0x3cc   :  { %v3698_v8 = vadd.f32 %v4767_v48, %v6830_v54  ;;  %4858 = vmatprep.subr.bf16.mxu1 %v5426_v6 }
 0x3cd   :  { %v4769_v13 = vpop.f32.mrf.mxu0 }
 0x3ce   :  { %v3740_v30 = vmax.f32 %v3698_v8, 0.0  ;;  %v4770_v34 = vadd.f32 %v4769_v13, %v4768_v43 }
 0x3cf   :  { %v4771_v42 = vpop.f32.mrf.mxu0  ;;  %4859 = vmatpush3.bf16.msra.mxu1 %v5426_v6 }
 0x3d0   :  { %v3752_v4 = vpack.c.bf16 %v3740_v30, %v3739_v19  ;;  %v3703_v59 = vadd.f32 %v4770_v34, %v6830_v54 }
 0x3d1   :  { %v4772_v21 = vpop.f32.mrf.mxu0 }
 0x3d2   :  { %v4773_v44 = vadd.f32 %v4772_v21, %v4771_v42  ;;  %4841 = vmatmul.mubr.bf16.gmra.mxu1 %v3752_v4  ;;  %v3741_v50 = vmax.f32 %v3703_v59, 0.0 }
 0x3d3   :  { %v4774_v60 = vpop.f32.mrf.mxu0 }
 0x3d4   :  { %v3706_v16 = vadd.f32 %v4773_v44, %v6830_v54 }
 0x3d5   :  { %v4775_v61 = vpop.f32.mrf.mxu0 }
 0x3d6   :  { %v3742_v47 = vmax.f32 %v3706_v16, 0.0  ;;  %v4776_v37 = vadd.f32 %v4775_v61, %v4774_v60 }
 0x3d7   :  { %v4777_v46 = vpop.f32.mrf.mxu0 }
 0x3d8   :  { %v3753_v17 = vpack.c.bf16 %v3742_v47, %v3741_v50  ;;  %v3711_v39 = vadd.f32 %v4776_v37, %v6830_v54 }
 0x3d9   :  { %v4778_v41 = vpop.f32.mrf.mxu0 }
 0x3da   :  { %v4779_v29 = vadd.f32 %v4778_v41, %v4777_v46  ;;  %4844 = vmatprep.mubr.bf16.mxu1 %v3753_v17  ;;  %v3743_v55 = vmax.f32 %v3711_v39, 0.0 }
 0x3db   :  { %v4780_v63 = vpop.f32.mrf.mxu0 }
 0x3dc   :  { %v3714_v36 = vadd.f32 %v4779_v29, %v6830_v54 }
 0x3dd   :  { %v4781_v0 = vpop.f32.mrf.mxu0 }
 0x3de   :  { %v3744_v31 = vmax.f32 %v3714_v36, 0.0  ;;  %v4782_v25 = vadd.f32 %v4781_v0, %v4780_v63 }
 0x3df   :  { %v4783_v38 = vpop.f32.mrf.mxu0 }
 0x3e0   :  { %v3754_v15 = vpack.c.bf16 %v3744_v31, %v3743_v55  ;;  %v3719_v53 = vadd.f32 %v4782_v25, %v6830_v54 }
 0x3e1   :  { %v4784_v2 = vpop.f32.mrf.mxu0 }
 0x3e2   :  { %v4785_v58 = vadd.f32 %v4784_v2, %v4783_v38  ;;  %4845 = vmatmul.mubr.bf16.gmra.mxu1 %v3754_v15  ;;  %v3745_v22 = vmax.f32 %v3719_v53, 0.0 }
 0x3e3   :  { %v4786_v18 = vpop.f32.mrf.mxu0 }
 0x3e4   :  { %v3722_v7 = vadd.f32 %v4785_v58, %v6830_v54 }
 0x3e5   :  { %v4787_v32 = vpop.f32.mrf.mxu0 }
 0x3e6   :  { %v3746_v14 = vmax.f32 %v3722_v7, 0.0  ;;  %v4788_v10 = vadd.f32 %v4787_v32, %v4786_v18 }
 0x3e7   :  { %v4789_v23 = vpop.f32.mrf.mxu0 }
 0x3e8   :  { %v3755_v20 = vpack.c.bf16 %v3746_v14, %v3745_v22  ;;  %v3727_v51 = vadd.f32 %v4788_v10, %v6830_v54 }
 0x3e9   :  { %v4790_v52 = vpop.f32.mrf.mxu0 }
 0x3ea   :  { %v4791_v27 = vadd.f32 %v4790_v52, %v4789_v23  ;;  %4848 = vmatprep.mubr.bf16.mxu1 %v3755_v20  ;;  %v3747_v62 = vmax.f32 %v3727_v51, 0.0 }
 0x3ec   :  { %v3730_v24 = vadd.f32 %v4791_v27, %v6830_v54 }
 0x3ee   :  { %v3748_v35 = vmax.f32 %v3730_v24, 0.0  ;;  %v7157_v24 = vlaneseq }
 0x3f0   :  { %v3756_v49 = vpack.c.bf16 %v3748_v35, %v3747_v62  ;;  %v6857_v62 = vand.u32 127, %v7157_v24  ;;  %v4715_v35 = vld [vmem:[#allocation10] ss:$0 sm:$0xff] }
 0x3f2   :  { %4849 = vmatmul.mubr.bf16.gmra.mxu1 %v3756_v49  ;;  %vm4112_vm1 = vcmp.lt.s32.totalorder %v6857_v62, 10 }
 0x482   :  { %v4838_v33 = vpop.f32.mrf.mxu1 }
 0x483   :  { %v3871_v54 = vadd.f32 %v4838_v33, %v4706_v57 }
 0x484   :  { %v3862_v40 = vpop.f32.mrf.mxu1 }
 0x485   :  { %v3863_v28 = vadd.f32 %v4706_v57, %v3862_v40  ;;  %v3927_v48 = vmax.f32 %v3871_v54, 0.0 }
 0x486   :  { %v4839_v12 = vpop.f32.mrf.mxu1 }
 0x487   :  { %v3874_v26 = vadd.f32 %v4839_v12, %v4706_v57  ;;  %v3925_v5 = vmax.f32 %v3863_v28, 0.0 }
 0x488   :  { %v3865_v11 = vpop.f32.mrf.mxu1 }
 0x489   :  { %v3866_v3 = vadd.f32 %v4706_v57, %v3865_v11  ;;  %v3928_v45 = vmax.f32 %v3874_v26, 0.0 }
 0x48b   :  { %v3926_v56 = vmax.f32 %v3866_v3, 0.0  ;;  %v3942_v8 = vpack.c.bf16 %v3928_v45, %v3927_v48 }
 0x48d   :  { %v3941_v43 = vpack.c.bf16 %v3926_v56, %v3925_v5 }
 0x48f   :  { %4860 = vmatprep.mubr.msk.bf16.mxu1 %vm3988_vm0, %v3941_v43 }
 0x490   :  { %4861 = vmatmul.mubr.msk.bf16.vlgmr.msra.gmra.mxu1 %vm3988_vm0, %v3942_v8 }
 0x492   :  { %v4842_v13 = vpop.f32.mrf.mxu1 }
 0x493   :  { %v3887_v4 = vadd.f32 %v4842_v13, %v4706_v57 }
 0x494   :  { %v3878_v19 = vpop.f32.mrf.mxu1 }
 0x495   :  { %v3879_v34 = vadd.f32 %v4706_v57, %v3878_v19  ;;  %v3931_v61 = vmax.f32 %v3887_v4, 0.0 }
 0x496   :  { %v4843_v30 = vpop.f32.mrf.mxu1 }
 0x497   :  { %v3890_v42 = vadd.f32 %v4843_v30, %v4706_v57  ;;  %v3929_v60 = vmax.f32 %v3879_v34, 0.0 }
 0x498   :  { %v3881_v21 = vpop.f32.mrf.mxu1 }
 0x499   :  { %v3882_v59 = vadd.f32 %v4706_v57, %v3881_v21  ;;  %v3932_v44 = vmax.f32 %v3890_v42, 0.0 }
 0x49b   :  { %v3930_v16 = vmax.f32 %v3882_v59, 0.0  ;;  %v3944_v47 = vpack.c.bf16 %v3932_v44, %v3931_v61 }
 0x49d   :  { %v3943_v50 = vpack.c.bf16 %v3930_v16, %v3929_v60 }
 0x49f   :  { %4864 = vmatprep.mubr.msk.bf16.mxu1 %vm3988_vm0, %v3943_v50 }
 0x4a0   :  { %4865 = vmatmul.mubr.msk.bf16.gmra.mxu1 %vm3988_vm0, %v3944_v47 }
 0x4a2   :  { %v4846_v37 = vpop.f32.mrf.mxu1 }
 0x4a3   :  { %v3903_v29 = vadd.f32 %v4846_v37, %v4706_v57 }
 0x4a4   :  { %v3894_v46 = vpop.f32.mrf.mxu1 }
 0x4a5   :  { %v3895_v41 = vadd.f32 %v4706_v57, %v3894_v46  ;;  %v3935_v25 = vmax.f32 %v3903_v29, 0.0 }
 0x4a6   :  { %v4847_v17 = vpop.f32.mrf.mxu1 }
 0x4a7   :  { %v3906_v39 = vadd.f32 %v4847_v17, %v4706_v57  ;;  %v3933_v55 = vmax.f32 %v3895_v41, 0.0 }
 0x4a8   :  { %v3897_v63 = vpop.f32.mrf.mxu1 }
 0x4a9   :  { %v3898_v36 = vadd.f32 %v4706_v57, %v3897_v63  ;;  %v3936_v0 = vmax.f32 %v3906_v39, 0.0 }
 0x4ab   :  { %v3934_v31 = vmax.f32 %v3898_v36, 0.0  ;;  %v3946_v15 = vpack.c.bf16 %v3936_v0, %v3935_v25 }
 0x4ad   :  { %v3945_v38 = vpack.c.bf16 %v3934_v31, %v3933_v55 }
 0x4af   :  { %4868 = vmatprep.mubr.msk.bf16.mxu1 %vm3988_vm0, %v3945_v38 }
 0x4b0   :  { %4869 = vmatmul.mubr.msk.bf16.gmra.mxu1 %vm3988_vm0, %v3946_v15 }
 0x4b2   :  { %v4850_v2 = vpop.f32.mrf.mxu1 }
 0x4b3   :  { %v3919_v32 = vadd.f32 %v4850_v2, %v4706_v57 }
 0x4b4   :  { %v3910_v53 = vpop.f32.mrf.mxu1 }
 0x4b5   :  { %v3911_v18 = vadd.f32 %v4706_v57, %v3910_v53  ;;  %v3939_v52 = vmax.f32 %v3919_v32, 0.0 }
 0x4b6   :  { %v4851_v58 = vpop.f32.mrf.mxu1 }
 0x4b7   :  { %v3922_v7 = vadd.f32 %v4851_v58, %v4706_v57  ;;  %v3937_v23 = vmax.f32 %v3911_v18, 0.0 }
 0x4b8   :  { %v3913_v22 = vpop.f32.mrf.mxu1 }
 0x4b9   :  { %v3914_v14 = vadd.f32 %v4706_v57, %v3913_v22  ;;  %v3940_v10 = vmax.f32 %v3922_v7, 0.0 }
 0x4bb   :  { %v3938_v20 = vmax.f32 %v3914_v14, 0.0  ;;  %v3948_v27 = vpack.c.bf16 %v3940_v10, %v3939_v52 }
 0x4bd   :  { %v3947_v51 = vpack.c.bf16 %v3938_v20, %v3937_v23 }
 0x4bf   :  { %4872 = vmatprep.mubr.msk.bf16.mxu1 %vm3988_vm0, %v3947_v51 }
 0x4c0   :  { %4873 = vmatmul.mubr.msk.bf16.gmra.mxu1 %vm3988_vm0, %v3948_v27 }
 0x550   :  { %v4862_v49 = vpop.f32.mrf.mxu1 }
 0x551   :  { %v4056_v9 = vadd.f32 %v4862_v49, %v4715_v35 }
 0x552   :  { %v4047_v1 = vpop.f32.mrf.mxu1 }
 0x553   :  { %v4048_v6 = vadd.f32 %v4715_v35, %v4047_v1  ;;  %v4115_v33 = vsel %vm4112_vm1, %v4056_v9, -1e+30 }
 0x554   :  { %4133 = vmax.xlane.f32.xlu1 %v4115_v33  ;;  %v4863_v40 = vpop.f32.mrf.mxu1 }
 0x555   :  { %v4059_v57 = vadd.f32 %v4863_v40, %v4715_v35  ;;  %v4113_v12 = vsel %vm4112_vm1, %v4048_v6, -1e+30 }
 0x556   :  { %v4050_v28 = vpop.f32.mrf.mxu1  ;;  %4129 = vmax.xlane.f32.xlu0 %v4113_v12 }
 0x557   :  { %v4051_v26 = vadd.f32 %v4715_v35, %v4050_v28  ;;  %v4116_v54 = vsel %vm4112_vm1, %v4059_v57, -1e+30 }
 0x558   :  { %4135 = vmax.xlane.f32.xlu1 %v4116_v54 }
 0x559   :  { %v4114_v11 = vsel %vm4112_vm1, %v4051_v26, -1e+30 }
 0x55a   :  { %4131 = vmax.xlane.f32.xlu0 %v4114_v11 }
 0x560   :  { %v4866_v3 = vpop.f32.mrf.mxu1 }
 0x561   :  { %v4072_v45 = vadd.f32 %v4866_v3, %v4715_v35 }
 0x562   :  { %v4063_v5 = vpop.f32.mrf.mxu1 }
 0x563   :  { %v4064_v56 = vadd.f32 %v4715_v35, %v4063_v5  ;;  %v4119_v48 = vsel %vm4112_vm1, %v4072_v45, -1e+30 }
 0x564   :  { %v4867_v43 = vpop.f32.mrf.mxu1  ;;  %4141 = vmax.xlane.f32.xlu0 %v4119_v48 }
 0x565   :  { %v4075_v8 = vadd.f32 %v4867_v43, %v4715_v35  ;;  %v6876_v34 = vsel %vm4112_vm1, %v4064_v56, -1e+30 }
 0x566   :  { %v4066_v13 = vpop.f32.mrf.mxu1 }
 0x567   :  { %v4067_v19 = vadd.f32 %v4715_v35, %v4066_v13  ;;  %v6872_v30 = vsel %vm4112_vm1, %v4075_v8, -1e+30 }
 0x568   :  { %4143 = vmax.xlane.f32.xlu1 %v6872_v30  ;;  %4137 = vmax.xlane.f32.xlu0 %v6876_v34 }
 0x569   :  { %v6882_v42 = vsel %vm4112_vm1, %v4067_v19, -1e+30 }
 0x56c   :  { %4139 = vmax.xlane.f32.xlu1 %v6882_v42 }
 0x570   :  { %v4870_v4 = vpop.f32.mrf.mxu1 }
 0x571   :  { %v4088_v21 = vadd.f32 %v4870_v4, %v4715_v35 }
 0x572   :  { %v4079_v59 = vpop.f32.mrf.mxu1 }
 0x573   :  { %v4080_v44 = vadd.f32 %v4715_v35, %v4079_v59  ;;  %v6887_v60 = vsel %vm4112_vm1, %v4088_v21, -1e+30 }
 0x574   :  { %v4871_v16 = vpop.f32.mrf.mxu1  ;;  %4149 = vmax.xlane.f32.xlu0 %v6887_v60 }
 0x575   :  { %v4091_v61 = vadd.f32 %v4871_v16, %v4715_v35  ;;  %v6896_v46 = vsel %vm4112_vm1, %v4080_v44, -1e+30 }
 0x576   :  { %v4082_v50 = vpop.f32.mrf.mxu1 }
 0x577   :  { %v4083_v47 = vadd.f32 %v4715_v35, %v4082_v50  ;;  %v6892_v37 = vsel %vm4112_vm1, %v4091_v61, -1e+30 }
 0x578   :  { %4151 = vmax.xlane.f32.xlu1 %v6892_v37  ;;  %4145 = vmax.xlane.f32.xlu0 %v6896_v46 }
 0x579   :  { %v6902_v17 = vsel %vm4112_vm1, %v4083_v47, -1e+30 }
 0x57c   :  { %4147 = vmax.xlane.f32.xlu1 %v6902_v17 }
 0x580   :  { %v4874_v41 = vpop.f32.mrf.mxu1 }
 0x581   :  { %v4104_v36 = vadd.f32 %v4874_v41, %v4715_v35 }
 0x582   :  { %v4095_v39 = vpop.f32.mrf.mxu1 }
 0x583   :  { %v4096_v29 = vadd.f32 %v4715_v35, %v4095_v39  ;;  %v6916_v15 = vsel %vm4112_vm1, %v4104_v36, -1e+30 }
 0x584   :  { %v4875_v63 = vpop.f32.mrf.mxu1 }
 0x585   :  { %v6907_v0 = vsel %vm4112_vm1, %v4096_v29, -1e+30  ;;  %v4107_v25 = vadd.f32 %v4875_v63, %v4715_v35 }
 0x586   :  { %v4098_v55 = vpop.f32.mrf.mxu1  ;;  %4153 = vmax.xlane.f32.xlu0 %v6907_v0 }
 0x587   :  { %v4099_v31 = vadd.f32 %v4715_v35, %v4098_v55  ;;  %v6922_v2 = vsel %vm4112_vm1, %v4107_v25, -1e+30 }
 0x589   :  { %v6912_v38 = vsel %vm4112_vm1, %v4099_v31, -1e+30 }
 0x58a   :  { %4155 = vmax.xlane.f32.xlu1 %v6912_v38  ;;  %4157 = vmax.xlane.f32.xlu0 %v6916_v15 }
 0x58e   :  { %4159 = vmax.xlane.f32.xlu1 %v6922_v2 }
 0x5dd   :  { %v4134_v53 = vpop.xlane.xlu1 %4133 }
 0x5de   :  { %v6925_v58 = vsub.f32 %v4115_v33, %v4134_v53 }
 0x5df   :  { %v4130_v18 = vpop.xlane.xlu0 %4129 }
 0x5e0   :  { %v4181_v7 = vmul.f32 1.442695, %v6925_v58  ;;  %v6928_v32 = vsub.f32 %v4113_v12, %v4130_v18 }
 0x5e1   :  { %v4136_v22 = vpop.xlane.xlu1 %4135 }
 0x5e2   :  { %5427 = vpow2.f32 %v4181_v7  ;;  %v4177_v14 = vmul.f32 1.442695, %v6928_v32  ;;  %v6931_v10 = vsub.f32 %v4116_v54, %v4136_v22 }
 0x5e3   :  { %v4132_v23 = vpop.xlane.xlu0 %4131 }
 0x5e4   :  { %5429 = vpow2.f32 %v4177_v14  ;;  %v4183_v20 = vmul.f32 1.442695, %v6931_v10  ;;  %v6934_v52 = vsub.f32 %v4114_v11, %v4132_v23 }
 0x5e6   :  { %5431 = vpow2.f32 %v4183_v20  ;;  %v4179_v51 = vmul.f32 1.442695, %v6934_v52 }
 0x5e8   :  { %5433 = vpow2.f32 %v4179_v51 }
 0x5ed   :  { %v4142_v27 = vpop.xlane.xlu0 %4141 }
 0x5ee   :  { %v6937_v24 = vsub.f32 %v4119_v48, %v4142_v27 }
 0x5ef   :  { %v5428_v35 = vpop.eup %5427 }
 0x5f0   :  { %v4189_v49 = vmul.f32 1.442695, %v6937_v24  ;;  %v4211_v9 = vsel %vm4112_vm1, %v5428_v35, 0.0 }
 0x5f1   :  { %v5430_v1 = vpop.eup %5429  ;;  %v4144_v6 = vpop.xlane.xlu1 %4143  ;;  %4229 = vadd.xlane.f32.xlu0 %v4211_v9 }
 0x5f2   :  { %v4138_v33 = vpop.xlane.xlu0 %4137  ;;  %5435 = vpow2.f32 %v4189_v49  ;;  %v6943_v40 = vsub.f32 %v6872_v30, %v4144_v6  ;;  %v4209_v11 = vsel %vm4112_vm1, %v5430_v1, 0.0 }
 0x5f3   :  { %v6946_v57 = vsub.f32 %v6876_v34, %v4138_v33  ;;  %v5432_v12 = vpop.eup %5431 }
 0x5f4   :  { %v4191_v28 = vmul.f32 1.442695, %v6943_v40  ;;  %v4212_v54 = vsel %vm4112_vm1, %v5432_v12, 0.0 }
 0x5f5   :  { %v4185_v26 = vmul.f32 1.442695, %v6946_v57  ;;  %v5434_v3 = vpop.eup %5433  ;;  %4231 = vadd.xlane.f32.xlu1 %v4212_v54  ;;  %v4140_v45 = vpop.xlane.xlu1 %4139  ;;  %4225 = vadd.xlane.f32.xlu0 %v4209_v11 }
 0x5f6   :  { %5437 = vpow2.f32 %v4191_v28  ;;  %v6955_v5 = vsub.f32 %v6882_v42, %v4140_v45  ;;  %v4210_v48 = vsel %vm4112_vm1, %v5434_v3, 0.0 }
 0x5f7   :  { %5439 = vpow2.f32 %v4185_v26 }
 0x5f8   :  { %v4187_v56 = vmul.f32 1.442695, %v6955_v5 }
 0x5f9   :  { %4227 = vadd.xlane.f32.xlu1 %v4210_v48 }
 0x5fa   :  { %5441 = vpow2.f32 %v4187_v56 }
 0x5fd   :  { %v4150_v43 = vpop.xlane.xlu0 %4149 }
 0x5fe   :  { %v6961_v8 = vsub.f32 %v6887_v60, %v4150_v43 }
 0x5ff   :  { %v5436_v13 = vpop.eup %5435 }
 0x600   :  { %v4197_v19 = vmul.f32 1.442695, %v6961_v8  ;;  %v4215_v30 = vsel %vm4112_vm1, %v5436_v13, 0.0 }
 0x601   :  { %v4152_v34 = vpop.xlane.xlu1 %4151  ;;  %4237 = vadd.xlane.f32.xlu0 %v4215_v30  ;;  %v4146_v42 = vpop.xlane.xlu0 %4145 }
 0x602   :  { %5443 = vpow2.f32 %v4197_v19  ;;  %v6967_v4 = vsub.f32 %v6892_v37, %v4152_v34  ;;  %v6970_v21 = vsub.f32 %v6896_v46, %v4146_v42 }
 0x603   :  { %v5438_v59 = vpop.eup %5437 }
 0x604   :  { %v5440_v44 = vpop.eup %5439  ;;  %v4199_v60 = vmul.f32 1.442695, %v6967_v4  ;;  %v4193_v16 = vmul.f32 1.442695, %v6970_v21  ;;  %v4216_v61 = vsel %vm4112_vm1, %v5438_v59, 0.0 }
 0x605   :  { %v4148_v50 = vpop.xlane.xlu1 %4147  ;;  %4239 = vadd.xlane.f32.xlu1 %v4216_v61  ;;  %v4213_v47 = vsel %vm4112_vm1, %v5440_v44, 0.0 }
 0x606   :  { %5445 = vpow2.f32 %v4199_v60  ;;  %v6979_v37 = vsub.f32 %v6902_v17, %v4148_v50  ;;  %4233 = vadd.xlane.f32.xlu0 %v4213_v47 }
 0x607   :  { %v5442_v46 = vpop.eup %5441  ;;  %5447 = vpow2.f32 %v4193_v16 }
 0x608   :  { %v4195_v41 = vmul.f32 1.442695, %v6979_v37  ;;  %v4214_v39 = vsel %vm4112_vm1, %v5442_v46, 0.0 }
 0x609   :  { %4235 = vadd.xlane.f32.xlu1 %v4214_v39 }
 0x60a   :  { %5449 = vpow2.f32 %v4195_v41 }
 0x60f   :  { %v5444_v29 = vpop.eup %5443  ;;  %v4154_v63 = vpop.xlane.xlu0 %4153 }
 0x610   :  { %v6985_v36 = vsub.f32 %v6907_v0, %v4154_v63  ;;  %v4219_v55 = vsel %vm4112_vm1, %v5444_v29, 0.0 }
 0x611   :  { %4245 = vadd.xlane.f32.xlu0 %v4219_v55 }
 0x612   :  { %v4201_v17 = vmul.f32 1.442695, %v6985_v36 }
 0x613   :  { %v5446_v31 = vpop.eup %5445  ;;  %v4156_v25 = vpop.xlane.xlu1 %4155 }
 0x614   :  { %v4158_v53 = vpop.xlane.xlu0 %4157  ;;  %v5448_v18 = vpop.eup %5447  ;;  %5451 = vpow2.f32 %v4201_v17  ;;  %v6991_v7 = vsub.f32 %v6912_v38, %v4156_v25  ;;  %v4220_v0 = vsel %vm4112_vm1, %v5446_v31, 0.0 }
 0x615   :  { %v6994_v22 = vsub.f32 %v6916_v15, %v4158_v53  ;;  %4247 = vadd.xlane.f32.xlu1 %v4220_v0  ;;  %v4217_v14 = vsel %vm4112_vm1, %v5448_v18, 0.0 }
 0x616   :  { %v4203_v23 = vmul.f32 1.442695, %v6991_v7  ;;  %4241 = vadd.xlane.f32.xlu0 %v4217_v14 }
 0x617   :  { %v4205_v20 = vmul.f32 1.442695, %v6994_v22  ;;  %v5450_v51 = vpop.eup %5449  ;;  %v4160_v27 = vpop.xlane.xlu1 %4159 }
 0x618   :  { %5453 = vpow2.f32 %v4203_v23  ;;  %v7003_v38 = vsub.f32 %v6922_v2, %v4160_v27  ;;  %v4218_v15 = vsel %vm4112_vm1, %v5450_v51, 0.0 }
 0x619   :  { %5455 = vpow2.f32 %v4205_v20  ;;  %4243 = vadd.xlane.f32.xlu1 %v4218_v15 }
 0x61a   :  { %v4207_v35 = vmul.f32 1.442695, %v7003_v38 }
 0x61c   :  { %5457 = vpow2.f32 %v4207_v35 }
 0x621   :  { %v5452_v49 = vpop.eup %5451 }
 0x622   :  { %v4221_v9 = vsel %vm4112_vm1, %v5452_v49, 0.0 }
 0x623   :  { %4249 = vadd.xlane.f32.xlu0 %v4221_v9 }
 0x625   :  { %v5454_v1 = vpop.eup %5453 }
 0x626   :  { %v5456_v6 = vpop.eup %5455  ;;  %v4222_v33 = vsel %vm4112_vm1, %v5454_v1, 0.0 }
 0x627   :  { %4251 = vadd.xlane.f32.xlu1 %v4222_v33  ;;  %v4223_v2 = vsel %vm4112_vm1, %v5456_v6, 0.0 }
 0x628   :  { %4253 = vadd.xlane.f32.xlu0 %v4223_v2 }
 0x629   :  { %v5458_v12 = vpop.eup %5457 }
 0x62a   :  { %v4224_v28 = vsel %vm4112_vm1, %v5458_v12, 0.0 }
 0x62b   :  { %4255 = vadd.xlane.f32.xlu1 %v4224_v28 }
 0x67a   :  { %v4230_v26 = vpop.xlane.xlu0 %4229 }
 0x67b   :  { %5459 = vlog2.f32 %v4230_v26 }
 0x67e   :  { %v4232_v54 = vpop.xlane.xlu1 %4231  ;;  %v4226_v11 = vpop.xlane.xlu0 %4225 }
 0x67f   :  { %5461 = vlog2.f32 %v4232_v54 }
 0x680   :  { %5463 = vlog2.f32 %v4226_v11 }
 0x682   :  { %v4228_v3 = vpop.xlane.xlu1 %4227 }
 0x683   :  { %5465 = vlog2.f32 %v4228_v3 }
 0x688   :  { %v5460_v45 = vpop.eup %5459 }
 0x689   :  { %v4262_v56 = vmul.f32 0.6931472, %v5460_v45 }
 0x68a   :  { %v4238_v48 = vpop.xlane.xlu0 %4237 }
 0x68b   :  { %v4291_v43 = vsub.f32 %v6925_v58, %v4262_v56  ;;  %5467 = vlog2.f32 %v4238_v48 }
 0x68c   :  { %v5462_v13 = vpop.eup %5461 }
 0x68d   :  { %v5464_v19 = vpop.eup %5463  ;;  %v4307_v30 = vsel %vm4112_vm1, %v4291_v43, 0.0  ;;  %v4264_v34 = vmul.f32 0.6931472, %v5462_v13 }
 0x68e   :  { %4323 = vst [vmem:[%s7123_s11 + $0x10] sm:$0xff] %v4307_v30  ;;  %v4258_v42 = vmul.f32 0.6931472, %v5464_v19  ;;  %v4240_v59 = vpop.xlane.xlu1 %4239 }
 0x68f   :  { %v4292_v44 = vsub.f32 %v6931_v10, %v4264_v34  ;;  %5469 = vlog2.f32 %v4240_v59  ;;  %v4234_v60 = vpop.xlane.xlu0 %4233 }
 0x690   :  { %v5466_v16 = vpop.eup %5465  ;;  %v4289_v58 = vsub.f32 %v6928_v32, %v4258_v42  ;;  %5471 = vlog2.f32 %v4234_v60 }
 0x691   :  { %v4308_v61 = vsel %vm4112_vm1, %v4292_v44, 0.0  ;;  %v4260_v50 = vmul.f32 0.6931472, %v5466_v16 }
 0x692   :  { %4324 = vst [vmem:[%s7123_s11 + $0x18] sm:$0xff] %v4308_v61  ;;  %v4305_v47 = vsel %vm4112_vm1, %v4289_v58, 0.0  ;;  %v4236_v46 = vpop.xlane.xlu1 %4235 }
 0x693   :  { %4321 = vst [vmem:[%s7123_s11] sm:$0xff] %v4305_v47  ;;  %v4290_v10 = vsub.f32 %v6934_v52, %v4260_v50  ;;  %5473 = vlog2.f32 %v4236_v46 }
 0x695   :  { %v4306_v32 = vsel %vm4112_vm1, %v4290_v10, 0.0 }
 0x696   :  { %4322 = vst [vmem:[%s7123_s11 + $0x8] sm:$0xff] %v4306_v32 }
 0x698   :  { %v5468_v41 = vpop.eup %5467 }
 0x699   :  { %v4270_v39 = vmul.f32 0.6931472, %v5468_v41 }
 0x69a   :  { %v4246_v29 = vpop.xlane.xlu0 %4245 }
 0x69b   :  { %v4295_v63 = vsub.f32 %v6937_v24, %v4270_v39  ;;  %5475 = vlog2.f32 %v4246_v29 }
 0x69c   :  { %v5470_v55 = vpop.eup %5469 }
 0x69d   :  { %v5472_v17 = vpop.eup %5471  ;;  %v4311_v31 = vsel %vm4112_vm1, %v4295_v63, 0.0  ;;  %v4272_v52 = vmul.f32 0.6931472, %v5470_v55 }
 0x69e   :  { %4327 = vst [vmem:[%s7123_s11 + $0x30] sm:$0xff] %v4311_v31  ;;  %v4266_v25 = vmul.f32 0.6931472, %v5472_v17  ;;  %v4248_v53 = vpop.xlane.xlu1 %4247 }
 0x69f   :  { %v4296_v18 = vsub.f32 %v6943_v40, %v4272_v52  ;;  %5477 = vlog2.f32 %v4248_v53  ;;  %v4242_v0 = vpop.xlane.xlu0 %4241 }
 0x6a0   :  { %v5474_v14 = vpop.eup %5473  ;;  %v4293_v24 = vsub.f32 %v6946_v57, %v4266_v25  ;;  %5479 = vlog2.f32 %v4242_v0 }
 0x6a1   :  { %v4312_v23 = vsel %vm4112_vm1, %v4296_v18, 0.0  ;;  %v4268_v20 = vmul.f32 0.6931472, %v5474_v14 }
 0x6a2   :  { %4328 = vst [vmem:[%s7123_s11 + $0x38] sm:$0xff] %v4312_v23  ;;  %v4309_v51 = vsel %vm4112_vm1, %v4293_v24, 0.0  ;;  %v4244_v27 = vpop.xlane.xlu1 %4243 }
 0x6a3   :  { %4325 = vst [vmem:[%s7123_s11 + $0x20] sm:$0xff] %v4309_v51  ;;  %v4294_v40 = vsub.f32 %v6955_v5, %v4268_v20  ;;  %5481 = vlog2.f32 %v4244_v27 }
 0x6a5   :  { %v4310_v57 = vsel %vm4112_vm1, %v4294_v40, 0.0 }
 0x6a6   :  { %4326 = vst [vmem:[%s7123_s11 + $0x28] sm:$0xff] %v4310_v57 }
 0x6a8   :  { %v5476_v15 = vpop.eup %5475 }
 0x6a9   :  { %v4278_v35 = vmul.f32 0.6931472, %v5476_v15 }
 0x6ab   :  { %v4299_v49 = vsub.f32 %v6961_v8, %v4278_v35 }
 0x6ac   :  { %v5478_v9 = vpop.eup %5477  ;;  %v4250_v1 = vpop.xlane.xlu0 %4249 }
 0x6ad   :  { %v5480_v6 = vpop.eup %5479  ;;  %v4315_v33 = vsel %vm4112_vm1, %v4299_v49, 0.0  ;;  %v4280_v2 = vmul.f32 0.6931472, %v5478_v9  ;;  %5483 = vlog2.f32 %v4250_v1 }
 0x6ae   :  { %4331 = vst [vmem:[%s7123_s11 + $0x50] sm:$0xff] %v4315_v33  ;;  %v4274_v5 = vmul.f32 0.6931472, %v5480_v6 }
 0x6af   :  { %v4300_v12 = vsub.f32 %v6967_v4, %v4280_v2 }
 0x6b0   :  { %v5482_v28 = vpop.eup %5481  ;;  %v4297_v26 = vsub.f32 %v6970_v21, %v4274_v5  ;;  %v4252_v54 = vpop.xlane.xlu1 %4251 }
 0x6b1   :  { %v4316_v8 = vsel %vm4112_vm1, %v4300_v12, 0.0  ;;  %v4276_v11 = vmul.f32 0.6931472, %v5482_v28  ;;  %5485 = vlog2.f32 %v4252_v54  ;;  %v4254_v3 = vpop.xlane.xlu0 %4253 }
 0x6b2   :  { %4332 = vst [vmem:[%s7123_s11 + $0x58] sm:$0xff] %v4316_v8  ;;  %v4313_v45 = vsel %vm4112_vm1, %v4297_v26, 0.0  ;;  %5487 = vlog2.f32 %v4254_v3 }
 0x6b3   :  { %4329 = vst [vmem:[%s7123_s11 + $0x40] sm:$0xff] %v4313_v45  ;;  %v4298_v4 = vsub.f32 %v6979_v37, %v4276_v11 }
 0x6b4   :  { %v4256_v21 = vpop.xlane.xlu1 %4255 }
 0x6b5   :  { %v4314_v56 = vsel %vm4112_vm1, %v4298_v4, 0.0  ;;  %5489 = vlog2.f32 %v4256_v21 }
 0x6b6   :  { %4330 = vst [vmem:[%s7123_s11 + $0x48] sm:$0xff] %v4314_v56 }
 0x6ba   :  { %v5484_v48 = vpop.eup %5483 }
 0x6bb   :  { %v4282_v43 = vmul.f32 0.6931472, %v5484_v48 }
 0x6bd   :  { %v4301_v13 = vsub.f32 %v6985_v36, %v4282_v43 }
 0x6be   :  { %v5486_v19 = vpop.eup %5485 }
 0x6bf   :  { %v5488_v30 = vpop.eup %5487  ;;  %v4317_v34 = vsel %vm4112_vm1, %v4301_v13, 0.0  ;;  %v4284_v42 = vmul.f32 0.6931472, %v5486_v19 }
 0x6c0   :  { %4333 = vst [vmem:[%s7123_s11 + $0x60] sm:$0xff] %v4317_v34  ;;  %v4286_v37 = vmul.f32 0.6931472, %v5488_v30 }
 0x6c1   :  { %v4302_v59 = vsub.f32 %v6991_v7, %v4284_v42 }
 0x6c2   :  { %v5490_v44 = vpop.eup %5489  ;;  %v4303_v60 = vsub.f32 %v6994_v22, %v4286_v37 }
 0x6c3   :  { %v4318_v16 = vsel %vm4112_vm1, %v4302_v59, 0.0  ;;  %v4288_v36 = vmul.f32 0.6931472, %v5490_v44 }
 0x6c4   :  { %4334 = vst [vmem:[%s7123_s11 + $0x68] sm:$0xff] %v4318_v16  ;;  %v4319_v58 = vsel %vm4112_vm1, %v4303_v60, 0.0 }
 0x6c5   :  { %4335 = vst [vmem:[%s7123_s11 + $0x70] sm:$0xff] %v4319_v58  ;;  %v4304_v7 = vsub.f32 %v7003_v38, %v4288_v36 }
 0x6c7   :  { %v4320_v22 = vsel %vm4112_vm1, %v4304_v7, 0.0 }
 0x6c8   :  { %4336 = vst [vmem:[%s7123_s11 + $0x78] sm:$0xff] %v4320_v22 }
 0x6c9   :  { %4341 = vsyncpa [#allocation3], 1 }
 0x6ca   :  { %4342 = vsyncpa [#allocation5], 1 }
 0x6cb   :  { %4343 = vsyncpa [#allocation8], 1 }
 0x6cc   :  { %4344 = vsyncpa [#allocation11], 1 }

</bundles_post_ra>
